<compile_context>
chip_gen: v6e
topology: v6e:2x2x1
jax: 0.10.0
libtpu: 0.0.40
codegen_flags: <defaults>
</compile_context>

<pallas_src>
import jax
import jax.numpy as jnp
from jax.experimental import pallas as pl
from jax.experimental.pallas import tpu as pltpu

_EPS = 1e-5


# --------------------------------------------------------------------------
# Kernel bodies
# --------------------------------------------------------------------------
def _conv3x3_taps(xpad_ref, w_ref, interior_bf16):
    """Zero-halo pad + 9 shifted-slice MXU matmuls with f32 accumulation.

    xpad_ref      : VMEM (B, H+2, W+2, CP) bf16 scratch (halo re-zeroed here)
    w_ref         : VMEM (9, CP, CP) bf16 weights, tap-major
    interior_bf16 : (B, H, W, CP) bf16 values for the interior
    returns       : (B*H*W, CP) f32 convolution output
    """
    B, Hp, Wp, CP = xpad_ref.shape
    H, W = Hp - 2, Wp - 2
    bf16 = jnp.bfloat16

    # Zero only the 1-px halo strips (padded channel lanes arrive already zero).
    xpad_ref[:, 0:1, :, :] = jnp.zeros((B, 1, Wp, CP), bf16)
    xpad_ref[:, H + 1:H + 2, :, :] = jnp.zeros((B, 1, Wp, CP), bf16)
    xpad_ref[:, 1:H + 1, 0:1, :] = jnp.zeros((B, H, 1, CP), bf16)
    xpad_ref[:, 1:H + 1, W + 1:W + 2, :] = jnp.zeros((B, H, 1, CP), bf16)
    xpad_ref[:, 1:H + 1, 1:W + 1, :] = interior_bf16

    acc = jnp.zeros((B * H * W, CP), jnp.float32)
    for kh in range(3):
        for kw in range(3):
            tap = xpad_ref[:, kh:kh + H, kw:kw + W, :].reshape(B * H * W, CP)
            acc = acc + jnp.dot(tap, w_ref[kh * 3 + kw],
                                preferred_element_type=jnp.float32)
    return acc


def _write_partial_stats(p_ref, acc):
    # Raw per-tile sums; the hierarchical reduction is finished outside.
    p_ref[0:1, 0:1, :] = jnp.sum(acc, axis=0, keepdims=True)[None]
    p_ref[0:1, 1:2, :] = jnp.sum(acc * acc, axis=0, keepdims=True)[None]


def _conv1_stats_kernel(x_ref, w_ref, y_ref, p_ref, xpad_ref):
    """conv1 (3x3, pad 1) + per-tile BN partial sums."""
    acc = _conv3x3_taps(xpad_ref, w_ref, x_ref[...])
    y_ref[...] = acc.reshape(y_ref.shape)
    _write_partial_stats(p_ref, acc)


def _bn1_relu_conv2_stats_kernel(y1_ref, s_ref, b_ref, w_ref, y_ref, p_ref,
                                 xpad_ref):
    """bn1 (folded scale/bias) + relu + conv2 + per-tile BN partial sums."""
    a1 = jnp.maximum(y1_ref[...] * s_ref[...] + b_ref[...], 0.0)
    acc = _conv3x3_taps(xpad_ref, w_ref, a1.astype(jnp.bfloat16))
    y_ref[...] = acc.reshape(y_ref.shape)
    _write_partial_stats(p_ref, acc)


def _bn2_add_relu_kernel(y2_ref, s_ref, b_ref, x_ref, o_ref):
    """bn2 (folded) + residual add + relu; single lane-dense store."""
    o_ref[...] = jnp.maximum(
        y2_ref[...] * s_ref[...] + b_ref[...] + x_ref[...], 0.0)


# --------------------------------------------------------------------------
# Host-side glue
# --------------------------------------------------------------------------
def _fold_bn(partials, gamma_p, beta_p, count):
    """Finalize two-pass BN stats and fold into per-channel scale / bias."""
    s = jnp.sum(partials[:, 0, :], axis=0)
    ss = jnp.sum(partials[:, 1, :], axis=0)
    mean = s / float(count)
    # One-pass variance can cancel slightly negative in f32 -> clamp >= 0.
    var = jnp.maximum(ss / float(count) - mean * mean, 0.0)
    scale = gamma_p * jax.lax.rsqrt(var + _EPS)
    bias = beta_p - mean * scale
    return scale[None, :], bias[None, :]          # (1, CP) each


def basic_block_forward(x_nchw, params, *, tile_batch=1):
    """x_nchw: (N, C, H, W) float32 (PyTorch layout). Returns (N, C, H, W) f32."""
    w1, g1, b1, w2, g2, b2 = params
    N, Cin, H, W = x_nchw.shape
    C = w1.shape[-1]
    assert Cin == C, "BasicBlock without downsample requires inplanes == planes"
    assert N % tile_batch == 0
    TB = tile_batch
    n_tiles = N // TB
    CP = ((C + 127) // 128) * 128                 # lane-padded channel width
    NHW = N * H * W

    # Lane-padded inputs (padded lanes are zero -> all in-kernel stores dense).
    x_nhwc = jnp.transpose(x_nchw, (0, 2, 3, 1)).astype(jnp.float32)
    x_f32 = jnp.zeros((N, H, W, CP), jnp.float32).at[..., :C].set(x_nhwc)
    x_b16 = x_f32.astype(jnp.bfloat16)

    def prep_w(w):
        # (3, 3, cin, C) HWIO -> channel-pad to CP -> (9, CP, CP) bf16 tap-major.
        cin = w.shape[2]
        wp = jnp.zeros((3, 3, CP, CP), jnp.float32).at[:, :, :cin, :C].set(w)
        return wp.reshape(9, CP, CP).astype(jnp.bfloat16)

    def prep_v(v):
        return jnp.zeros((CP,), jnp.float32).at[:C].set(v)

    w1p, w2p = prep_w(w1), prep_w(w2)
    g1p, b1p, g2p, b2p = prep_v(g1), prep_v(b1), prep_v(g2), prep_v(b2)

    # Block specs: activations tiled over batch; weights / scale / bias are
    # grid-invariant (constant index_map -> DMA'd once).
    act_spec = pl.BlockSpec((TB, H, W, CP), lambda i: (i, 0, 0, 0))
    w_spec = pl.BlockSpec((9, CP, CP), lambda i: (0, 0, 0))
    vec_spec = pl.BlockSpec((1, CP), lambda i: (0, 0))
    p_spec = pl.BlockSpec((1, 2, CP), lambda i: (i, 0, 0))

    y_shape = jax.ShapeDtypeStruct((N, H, W, CP), jnp.float32)
    p_shape = jax.ShapeDtypeStruct((n_tiles, 2, CP), jnp.float32)
    xpad_scratch = pltpu.VMEM((TB, H + 2, W + 2, CP), jnp.bfloat16)

    # 48 MiB scoped VMEM: plenty of headroom on v5e/v6e, below v7x's 64 MiB.
    cparams = pltpu.CompilerParams(
        dimension_semantics=("parallel",),
        vmem_limit_bytes=48 * 1024 * 1024)

    # ---- stage 1: conv1 + partial batch stats ------------------------------
    y1, p1 = pl.pallas_call(
        _conv1_stats_kernel,
        grid_spec=pltpu.PrefetchScalarGridSpec(
            num_scalar_prefetch=0, grid=(n_tiles,),
            in_specs=[act_spec, w_spec],
            out_specs=[act_spec, p_spec],
            scratch_shapes=[xpad_scratch]),
        out_shape=(y_shape, p_shape),
        compiler_params=cparams,
    )(x_b16, w1p)

    s1, t1 = _fold_bn(p1, g1p, b1p, NHW)

    # ---- stage 2: bn1 + relu + conv2 + partial batch stats -----------------
    y2, p2 = pl.pallas_call(
        _bn1_relu_conv2_stats_kernel,
        grid_spec=pltpu.PrefetchScalarGridSpec(
            num_scalar_prefetch=0, grid=(n_tiles,),
            in_specs=[act_spec, vec_spec, vec_spec, w_spec],
            out_specs=[act_spec, p_spec],
            scratch_shapes=[xpad_scratch]),
        out_shape=(y_shape, p_shape),
        compiler_params=cparams,
    )(y1, s1, t1, w2p)

    s2, t2 = _fold_bn(p2, g2p, b2p, NHW)

    # ---- stage 3: bn2 + residual + relu (single unmasked store) ------------
    out = pl.pallas_call(
        _bn2_add_relu_kernel,
        grid_spec=pltpu.PrefetchScalarGridSpec(
            num_scalar_prefetch=0, grid=(n_tiles,),
            in_specs=[act_spec, vec_spec, vec_spec, act_spec],
            out_specs=act_spec),
        out_shape=y_shape,
        compiler_params=cparams,
    )(y2, s2, t2, x_f32)

    return jnp.transpose(out[..., :C], (0, 3, 1, 2))


# --------------------------------------------------------------------------
# Pure-JAX reference & test
# --------------------------------------------------------------------------
def _reference(x_nchw, params, *, bf16_matmul_operands):
    """Mirrors the PyTorch BasicBlock forward.

    With bf16_matmul_operands=True, conv inputs/weights are rounded to bf16
    (exactly what the kernel feeds the MXU) while BN / residual math stays f32.
    """
    w1, g1, b1, w2, g2, b2 = params

    def rnd(a):
        return a.astype(jnp.bfloat16).astype(jnp.float32) if bf16_matmul_operands else a

    def conv(x, w):
        return jax.lax.conv_general_dilated(
            rnd(x), rnd(w), window_strides=(1, 1), padding=((1, 1), (1, 1)),
            dimension_numbers=('NCHW', 'HWIO', 'NCHW'),
            precision=jax.lax.Precision.HIGHEST)

    def bn(y, g, b):
        mean = jnp.mean(y, axis=(0, 2, 3), keepdims=True)
        var = jnp.mean((y - mean) ** 2, axis=(0, 2, 3), keepdims=True)
        return ((y - mean) * jax.lax.rsqrt(var + _EPS)
                * g.reshape(1, -1, 1, 1) + b.reshape(1, -1, 1, 1))

    out = jax.nn.relu(bn(conv(x_nchw, w1), g1, b1))
    out = bn(conv(out, w2), g2, b2)
    return jax.nn.relu(out + x_nchw)


def make_params(inplanes, planes, key):
    # Deterministic synthetic init (shapes match nn.Conv2d / BatchNorm2d params).
    k1, k2, k3, k4 = jax.random.split(key, 4)
    w1 = jax.random.normal(k1, (3, 3, inplanes, planes), jnp.float32) * 0.1
    w2 = jax.random.normal(k2, (3, 3, planes, planes), jnp.float32) * 0.1
    g1 = 1.0 + 0.05 * jax.random.normal(k3, (planes,), jnp.float32)
    b1 = 0.05 * jax.random.normal(k4, (planes,), jnp.float32)
    g2 = jnp.linspace(0.9, 1.1, planes, dtype=jnp.float32)
    b2 = jnp.linspace(-0.05, 0.05, planes, dtype=jnp.float32)
    return (w1, g1, b1, w2, g2, b2)


if __name__ == "__main__":
    # Small shapes: batch=2, inplanes=planes=4, spatial=16x16 (stride=1,
    # downsample=None -> identity skip, the module's default configuration).
    N, C, H, W = 2, 4, 16, 16
    key = jax.random.PRNGKey(0)
    kx, kp = jax.random.split(key)
    x = jax.random.normal(kx, (N, C, H, W), jnp.float32)
    params = make_params(C, C, kp)

    out = jax.block_until_ready(basic_block_forward(x, params))
    assert out.shape == (N, C, H, W)

    # Tight check vs a reference that rounds conv operands to bf16 exactly the
    # way the kernel feeds the MXU (tolerance covers accumulation order and the
    # rare one-ulp double-rounding divergence on the conv2 input).
    ref_bf16 = jax.block_until_ready(_reference(x, params, bf16_matmul_operands=True))
    err_tight = float(jnp.max(jnp.abs(out - ref_bf16)))
    assert err_tight < 2e-2, err_tight

    # Sanity check vs exact f32 module semantics; the gap is only the bf16
    # rounding of the two convolutions' operands (MXU-native precision).
    ref_f32 = jax.block_until_ready(_reference(x, params, bf16_matmul_operands=False))
    err_f32 = float(jnp.max(jnp.abs(out - ref_f32)))
    assert err_f32 < 1e-1, err_f32

    print("KERNEL_OK")
</pallas_src>

<mosaic_0001>
module attributes {stable_mosaic.version = 11 : i64} {
  func.func @_conv1_stats_kernel(%arg0: i32, %arg1: memref<1x16x16x128xbf16, #tpu.memory_space<vmem>>, %arg2: memref<9x128x128xbf16, #tpu.memory_space<vmem>>, %arg3: memref<1x16x16x128xf32, #tpu.memory_space<vmem>>, %arg4: memref<1x2x128xf32, #tpu.memory_space<vmem>>, %arg5: memref<1x18x18x128xbf16, #tpu.memory_space<vmem>>) attributes {dimension_semantics = [#tpu.dimension_semantics<parallel>], iteration_bounds = array<i64: 2>, scalar_prefetch = 0 : i64, scratch_operands = 1 : i64, tpu.core_type = #tpu.core_type<tc>, window_params = [{transform_indices = @transform_0, window_bounds = array<i64: 1, 16, 16, 128>}, {pipeline_mode = #tpu.pipeline_mode<synchronous>, transform_indices = @transform_1, window_bounds = array<i64: 9, 128, 128>}, {transform_indices = @transform_2, window_bounds = array<i64: 1, 16, 16, 128>}, {transform_indices = @transform_3, window_bounds = array<i64: 1, 2, 128>}]} {
    %c0 = arith.constant 0 : index
    %c0_0 = arith.constant 0 : index
    %c0_1 = arith.constant 0 : index
    %c0_2 = arith.constant 0 : index
    %0 = vector.load %arg1[%c0, %c0_0, %c0_1, %c0_2] : memref<1x16x16x128xbf16, #tpu.memory_space<vmem>>, vector<1x16x16x128xbf16>
    %cst = arith.constant 0.000000e+00 : bf16
    %1 = vector.broadcast %cst : bf16 to vector<1x1x18x128xbf16>
    %c0_3 = arith.constant 0 : index
    %c0_4 = arith.constant 0 : index
    %c0_5 = arith.constant 0 : index
    %c0_6 = arith.constant 0 : index
    %2 = vector.load %arg5[%c0_3, %c0_4, %c0_5, %c0_6] : memref<1x18x18x128xbf16, #tpu.memory_space<vmem>>, vector<1x1x18x128xbf16>
    tpu.vector_store %arg5[%c0_3, %c0_4, %c0_5, %c0_6], %1 {strides = array<i32>} : memref<1x18x18x128xbf16, #tpu.memory_space<vmem>>, vector<1x1x18x128xbf16>,
    %cst_7 = arith.constant 0.000000e+00 : bf16
    %3 = vector.broadcast %cst_7 : bf16 to vector<1x1x18x128xbf16>
    %c0_8 = arith.constant 0 : index
    %c17 = arith.constant 17 : index
    %c0_9 = arith.constant 0 : index
    %c0_10 = arith.constant 0 : index
    %4 = vector.load %arg5[%c0_8, %c17, %c0_9, %c0_10] : memref<1x18x18x128xbf16, #tpu.memory_space<vmem>>, vector<1x1x18x128xbf16>
    tpu.vector_store %arg5[%c0_8, %c17, %c0_9, %c0_10], %3 {strides = array<i32>} : memref<1x18x18x128xbf16, #tpu.memory_space<vmem>>, vector<1x1x18x128xbf16>,
    %cst_11 = arith.constant 0.000000e+00 : bf16
    %5 = vector.broadcast %cst_11 : bf16 to vector<1x16x1x128xbf16>
    %c0_12 = arith.constant 0 : index
    %c1 = arith.constant 1 : index
    %c0_13 = arith.constant 0 : index
    %c0_14 = arith.constant 0 : index
    %6 = vector.load %arg5[%c0_12, %c1, %c0_13, %c0_14] : memref<1x18x18x128xbf16, #tpu.memory_space<vmem>>, vector<1x16x1x128xbf16>
    tpu.vector_store %arg5[%c0_12, %c1, %c0_13, %c0_14], %5 {strides = array<i32>} : memref<1x18x18x128xbf16, #tpu.memory_space<vmem>>, vector<1x16x1x128xbf16>,
    %cst_15 = arith.constant 0.000000e+00 : bf16
    %7 = vector.broadcast %cst_15 : bf16 to vector<1x16x1x128xbf16>
    %c0_16 = arith.constant 0 : index
    %c1_17 = arith.constant 1 : index
    %c17_18 = arith.constant 17 : index
    %c0_19 = arith.constant 0 : index
    %8 = vector.load %arg5[%c0_16, %c1_17, %c17_18, %c0_19] : memref<1x18x18x128xbf16, #tpu.memory_space<vmem>>, vector<1x16x1x128xbf16>
    tpu.vector_store %arg5[%c0_16, %c1_17, %c17_18, %c0_19], %7 {strides = array<i32>} : memref<1x18x18x128xbf16, #tpu.memory_space<vmem>>, vector<1x16x1x128xbf16>,
    %c0_20 = arith.constant 0 : index
    %c1_21 = arith.constant 1 : index
    %c1_22 = arith.constant 1 : index
    %c0_23 = arith.constant 0 : index
    %9 = vector.load %arg5[%c0_20, %c1_21, %c1_22, %c0_23] : memref<1x18x18x128xbf16, #tpu.memory_space<vmem>>, vector<1x16x16x128xbf16>
    tpu.vector_store %arg5[%c0_20, %c1_21, %c1_22, %c0_23], %0 {strides = array<i32>} : memref<1x18x18x128xbf16, #tpu.memory_space<vmem>>, vector<1x16x16x128xbf16>,
    %cst_24 = arith.constant 0.000000e+00 : f32
    %10 = vector.broadcast %cst_24 : f32 to vector<256x128xf32>
    %c0_25 = arith.constant 0 : index
    %c0_26 = arith.constant 0 : index
    %c0_27 = arith.constant 0 : index
    %c0_28 = arith.constant 0 : index
    %11 = vector.load %arg5[%c0_25, %c0_26, %c0_27, %c0_28] : memref<1x18x18x128xbf16, #tpu.memory_space<vmem>>, vector<1x16x16x128xbf16>
    %12 = vector.shape_cast %11 : vector<1x16x16x128xbf16> to vector<256x128xbf16>
    %c0_29 = arith.constant 0 : index
    %c0_30 = arith.constant 0 : index
    %c0_31 = arith.constant 0 : index
    %13 = vector.load %arg2[%c0_29, %c0_30, %c0_31] : memref<9x128x128xbf16, #tpu.memory_space<vmem>>, vector<1x128x128xbf16>
    %14 = vector.shape_cast %13 : vector<1x128x128xbf16> to vector<128x128xbf16>
    %cst_32 = arith.constant dense<0.000000e+00> : vector<256x128xf32>
    %15 = tpu.matmul %12, %14, %cst_32 {dimension_numbers = #tpu.dot_dimension_numbers<[1], [0], [0], [1], [0, 0, 1, 1], [], []>} : vector<256x128xbf16>, vector<128x128xbf16>, vector<256x128xf32> -> vector<256x128xf32>
    %16 = arith.addf %10, %15 : vector<256x128xf32>
    %c0_33 = arith.constant 0 : index
    %c0_34 = arith.constant 0 : index
    %c1_35 = arith.constant 1 : index
    %c0_36 = arith.constant 0 : index
    %17 = vector.load %arg5[%c0_33, %c0_34, %c1_35, %c0_36] : memref<1x18x18x128xbf16, #tpu.memory_space<vmem>>, vector<1x16x16x128xbf16>
    %18 = vector.shape_cast %17 : vector<1x16x16x128xbf16> to vector<256x128xbf16>
    %c1_37 = arith.constant 1 : index
    %c0_38 = arith.constant 0 : index
    %c0_39 = arith.constant 0 : index
    %19 = vector.load %arg2[%c1_37, %c0_38, %c0_39] : memref<9x128x128xbf16, #tpu.memory_space<vmem>>, vector<1x128x128xbf16>
    %20 = vector.shape_cast %19 : vector<1x128x128xbf16> to vector<128x128xbf16>
    %cst_40 = arith.constant dense<0.000000e+00> : vector<256x128xf32>
    %21 = tpu.matmul %18, %20, %cst_40 {dimension_numbers = #tpu.dot_dimension_numbers<[1], [0], [0], [1], [0, 0, 1, 1], [], []>} : vector<256x128xbf16>, vector<128x128xbf16>, vector<256x128xf32> -> vector<256x128xf32>
    %22 = arith.addf %16, %21 : vector<256x128xf32>
    %c0_41 = arith.constant 0 : index
    %c0_42 = arith.constant 0 : index
    %c2 = arith.constant 2 : index
    %c0_43 = arith.constant 0 : index
    %23 = vector.load %arg5[%c0_41, %c0_42, %c2, %c0_43] : memref<1x18x18x128xbf16, #tpu.memory_space<vmem>>, vector<1x16x16x128xbf16>
    %24 = vector.shape_cast %23 : vector<1x16x16x128xbf16> to vector<256x128xbf16>
    %c2_44 = arith.constant 2 : index
    %c0_45 = arith.constant 0 : index
    %c0_46 = arith.constant 0 : index
    %25 = vector.load %arg2[%c2_44, %c0_45, %c0_46] : memref<9x128x128xbf16, #tpu.memory_space<vmem>>, vector<1x128x128xbf16>
    %26 = vector.shape_cast %25 : vector<1x128x128xbf16> to vector<128x128xbf16>
    %cst_47 = arith.constant dense<0.000000e+00> : vector<256x128xf32>
    %27 = tpu.matmul %24, %26, %cst_47 {dimension_numbers = #tpu.dot_dimension_numbers<[1], [0], [0], [1], [0, 0, 1, 1], [], []>} : vector<256x128xbf16>, vector<128x128xbf16>, vector<256x128xf32> -> vector<256x128xf32>
    %28 = arith.addf %22, %27 : vector<256x128xf32>
    %c0_48 = arith.constant 0 : index
    %c1_49 = arith.constant 1 : index
    %c0_50 = arith.constant 0 : index
    %c0_51 = arith.constant 0 : index
    %29 = vector.load %arg5[%c0_48, %c1_49, %c0_50, %c0_51] : memref<1x18x18x128xbf16, #tpu.memory_space<vmem>>, vector<1x16x16x128xbf16>
    %30 = vector.shape_cast %29 : vector<1x16x16x128xbf16> to vector<256x128xbf16>
    %c3 = arith.constant 3 : index
    %c0_52 = arith.constant 0 : index
    %c0_53 = arith.constant 0 : index
    %31 = vector.load %arg2[%c3, %c0_52, %c0_53] : memref<9x128x128xbf16, #tpu.memory_space<vmem>>, vector<1x128x128xbf16>
    %32 = vector.shape_cast %31 : vector<1x128x128xbf16> to vector<128x128xbf16>
    %cst_54 = arith.constant dense<0.000000e+00> : vector<256x128xf32>
    %33 = tpu.matmul %30, %32, %cst_54 {dimension_numbers = #tpu.dot_dimension_numbers<[1], [0], [0], [1], [0, 0, 1, 1], [], []>} : vector<256x128xbf16>, vector<128x128xbf16>, vector<256x128xf32> -> vector<256x128xf32>
    %34 = arith.addf %28, %33 : vector<256x128xf32>
    %c0_55 = arith.constant 0 : index
    %c1_56 = arith.constant 1 : index
    %c1_57 = arith.constant 1 : index
    %c0_58 = arith.constant 0 : index
    %35 = vector.load %arg5[%c0_55, %c1_56, %c1_57, %c0_58] : memref<1x18x18x128xbf16, #tpu.memory_space<vmem>>, vector<1x16x16x128xbf16>
    %36 = vector.shape_cast %35 : vector<1x16x16x128xbf16> to vector<256x128xbf16>
    %c4 = arith.constant 4 : index
    %c0_59 = arith.constant 0 : index
    %c0_60 = arith.constant 0 : index
    %37 = vector.load %arg2[%c4, %c0_59, %c0_60] : memref<9x128x128xbf16, #tpu.memory_space<vmem>>, vector<1x128x128xbf16>
    %38 = vector.shape_cast %37 : vector<1x128x128xbf16> to vector<128x128xbf16>
    %cst_61 = arith.constant dense<0.000000e+00> : vector<256x128xf32>
    %39 = tpu.matmul %36, %38, %cst_61 {dimension_numbers = #tpu.dot_dimension_numbers<[1], [0], [0], [1], [0, 0, 1, 1], [], []>} : vector<256x128xbf16>, vector<128x128xbf16>, vector<256x128xf32> -> vector<256x128xf32>
    %40 = arith.addf %34, %39 : vector<256x128xf32>
    %c0_62 = arith.constant 0 : index
    %c1_63 = arith.constant 1 : index
    %c2_64 = arith.constant 2 : index
    %c0_65 = arith.constant 0 : index
    %41 = vector.load %arg5[%c0_62, %c1_63, %c2_64, %c0_65] : memref<1x18x18x128xbf16, #tpu.memory_space<vmem>>, vector<1x16x16x128xbf16>
    %42 = vector.shape_cast %41 : vector<1x16x16x128xbf16> to vector<256x128xbf16>
    %c5 = arith.constant 5 : index
    %c0_66 = arith.constant 0 : index
    %c0_67 = arith.constant 0 : index
    %43 = vector.load %arg2[%c5, %c0_66, %c0_67] : memref<9x128x128xbf16, #tpu.memory_space<vmem>>, vector<1x128x128xbf16>
    %44 = vector.shape_cast %43 : vector<1x128x128xbf16> to vector<128x128xbf16>
    %cst_68 = arith.constant dense<0.000000e+00> : vector<256x128xf32>
    %45 = tpu.matmul %42, %44, %cst_68 {dimension_numbers = #tpu.dot_dimension_numbers<[1], [0], [0], [1], [0, 0, 1, 1], [], []>} : vector<256x128xbf16>, vector<128x128xbf16>, vector<256x128xf32> -> vector<256x128xf32>
    %46 = arith.addf %40, %45 : vector<256x128xf32>
    %c0_69 = arith.constant 0 : index
    %c2_70 = arith.constant 2 : index
    %c0_71 = arith.constant 0 : index
    %c0_72 = arith.constant 0 : index
    %47 = vector.load %arg5[%c0_69, %c2_70, %c0_71, %c0_72] : memref<1x18x18x128xbf16, #tpu.memory_space<vmem>>, vector<1x16x16x128xbf16>
    %48 = vector.shape_cast %47 : vector<1x16x16x128xbf16> to vector<256x128xbf16>
    %c6 = arith.constant 6 : index
    %c0_73 = arith.constant 0 : index
    %c0_74 = arith.constant 0 : index
    %49 = vector.load %arg2[%c6, %c0_73, %c0_74] : memref<9x128x128xbf16, #tpu.memory_space<vmem>>, vector<1x128x128xbf16>
    %50 = vector.shape_cast %49 : vector<1x128x128xbf16> to vector<128x128xbf16>
    %cst_75 = arith.constant dense<0.000000e+00> : vector<256x128xf32>
    %51 = tpu.matmul %48, %50, %cst_75 {dimension_numbers = #tpu.dot_dimension_numbers<[1], [0], [0], [1], [0, 0, 1, 1], [], []>} : vector<256x128xbf16>, vector<128x128xbf16>, vector<256x128xf32> -> vector<256x128xf32>
    %52 = arith.addf %46, %51 : vector<256x128xf32>
    %c0_76 = arith.constant 0 : index
    %c2_77 = arith.constant 2 : index
    %c1_78 = arith.constant 1 : index
    %c0_79 = arith.constant 0 : index
    %53 = vector.load %arg5[%c0_76, %c2_77, %c1_78, %c0_79] : memref<1x18x18x128xbf16, #tpu.memory_space<vmem>>, vector<1x16x16x128xbf16>
    %54 = vector.shape_cast %53 : vector<1x16x16x128xbf16> to vector<256x128xbf16>
    %c7 = arith.constant 7 : index
    %c0_80 = arith.constant 0 : index
    %c0_81 = arith.constant 0 : index
    %55 = vector.load %arg2[%c7, %c0_80, %c0_81] : memref<9x128x128xbf16, #tpu.memory_space<vmem>>, vector<1x128x128xbf16>
    %56 = vector.shape_cast %55 : vector<1x128x128xbf16> to vector<128x128xbf16>
    %cst_82 = arith.constant dense<0.000000e+00> : vector<256x128xf32>
    %57 = tpu.matmul %54, %56, %cst_82 {dimension_numbers = #tpu.dot_dimension_numbers<[1], [0], [0], [1], [0, 0, 1, 1], [], []>} : vector<256x128xbf16>, vector<128x128xbf16>, vector<256x128xf32> -> vector<256x128xf32>
    %58 = arith.addf %52, %57 : vector<256x128xf32>
    %c0_83 = arith.constant 0 : index
    %c2_84 = arith.constant 2 : index
    %c2_85 = arith.constant 2 : index
    %c0_86 = arith.constant 0 : index
    %59 = vector.load %arg5[%c0_83, %c2_84, %c2_85, %c0_86] : memref<1x18x18x128xbf16, #tpu.memory_space<vmem>>, vector<1x16x16x128xbf16>
    %60 = vector.shape_cast %59 : vector<1x16x16x128xbf16> to vector<256x128xbf16>
    %c8 = arith.constant 8 : index
    %c0_87 = arith.constant 0 : index
    %c0_88 = arith.constant 0 : index
    %61 = vector.load %arg2[%c8, %c0_87, %c0_88] : memref<9x128x128xbf16, #tpu.memory_space<vmem>>, vector<1x128x128xbf16>
    %62 = vector.shape_cast %61 : vector<1x128x128xbf16> to vector<128x128xbf16>
    %cst_89 = arith.constant dense<0.000000e+00> : vector<256x128xf32>
    %63 = tpu.matmul %60, %62, %cst_89 {dimension_numbers = #tpu.dot_dimension_numbers<[1], [0], [0], [1], [0, 0, 1, 1], [], []>} : vector<256x128xbf16>, vector<128x128xbf16>, vector<256x128xf32> -> vector<256x128xf32>
    %64 = arith.addf %58, %63 : vector<256x128xf32>
    %65 = vector.shape_cast %64 : vector<256x128xf32> to vector<1x16x16x128xf32>
    %c0_90 = arith.constant 0 : index
    %c0_91 = arith.constant 0 : index
    %c0_92 = arith.constant 0 : index
    %c0_93 = arith.constant 0 : index
    %66 = vector.load %arg3[%c0_90, %c0_91, %c0_92, %c0_93] : memref<1x16x16x128xf32, #tpu.memory_space<vmem>>, vector<1x16x16x128xf32>
    tpu.vector_store %arg3[%c0_90, %c0_91, %c0_92, %c0_93], %65 {strides = array<i32>} : memref<1x16x16x128xf32, #tpu.memory_space<vmem>>, vector<1x16x16x128xf32>,
    %cst_94 = arith.constant dense<0.000000e+00> : vector<128xf32>
    %67 = vector.multi_reduction <add>, %64, %cst_94 [0] : vector<256x128xf32> to vector<128xf32>
    %68 = vector.shape_cast %67 : vector<128xf32> to vector<1x128xf32>
    %69 = vector.shape_cast %68 : vector<1x128xf32> to vector<1x1x128xf32>
    %c0_95 = arith.constant 0 : index
    %c0_96 = arith.constant 0 : index
    %c0_97 = arith.constant 0 : index
    %70 = vector.load %arg4[%c0_95, %c0_96, %c0_97] : memref<1x2x128xf32, #tpu.memory_space<vmem>>, vector<1x1x128xf32>
    tpu.vector_store %arg4[%c0_95, %c0_96, %c0_97], %69 {strides = array<i32>} : memref<1x2x128xf32, #tpu.memory_space<vmem>>, vector<1x1x128xf32>,
    %71 = arith.mulf %64, %64 : vector<256x128xf32>
    %cst_98 = arith.constant dense<0.000000e+00> : vector<128xf32>
    %72 = vector.multi_reduction <add>, %71, %cst_98 [0] : vector<256x128xf32> to vector<128xf32>
    %73 = vector.shape_cast %72 : vector<128xf32> to vector<1x128xf32>
    %74 = vector.shape_cast %73 : vector<1x128xf32> to vector<1x1x128xf32>
    %c0_99 = arith.constant 0 : index
    %c1_100 = arith.constant 1 : index
    %c0_101 = arith.constant 0 : index
    %75 = vector.load %arg4[%c0_99, %c1_100, %c0_101] : memref<1x2x128xf32, #tpu.memory_space<vmem>>, vector<1x1x128xf32>
    tpu.vector_store %arg4[%c0_99, %c1_100, %c0_101], %74 {strides = array<i32>} : memref<1x2x128xf32, #tpu.memory_space<vmem>>, vector<1x1x128xf32>,
    return
  }
  func.func @transform_0(%arg0: i32) -> (i32, i32, i32, i32) {
    %c0_i32 = arith.constant 0 : i32
    %c0_i32_0 = arith.constant 0 : i32
    %c0_i32_1 = arith.constant 0 : i32
    %c0_i32_2 = arith.constant 0 : i32
    return %arg0, %c0_i32, %c0_i32_0, %c0_i32_1 : i32, i32, i32, i32
  }
  func.func @transform_1(%arg0: i32) -> (i32, i32, i32) {
    %c0_i32 = arith.constant 0 : i32
    %c0_i32_0 = arith.constant 0 : i32
    %c0_i32_1 = arith.constant 0 : i32
    %c0_i32_2 = arith.constant 0 : i32
    return %c0_i32, %c0_i32_0, %c0_i32_1 : i32, i32, i32
  }
  func.func @transform_2(%arg0: i32) -> (i32, i32, i32, i32) {
    %c0_i32 = arith.constant 0 : i32
    %c0_i32_0 = arith.constant 0 : i32
    %c0_i32_1 = arith.constant 0 : i32
    %c0_i32_2 = arith.constant 0 : i32
    return %arg0, %c0_i32, %c0_i32_0, %c0_i32_1 : i32, i32, i32, i32
  }
  func.func @transform_3(%arg0: i32) -> (i32, i32, i32) {
    %c0_i32 = arith.constant 0 : i32
    %c0_i32_0 = arith.constant 0 : i32
    %c0_i32_1 = arith.constant 0 : i32
    return %arg0, %c0_i32, %c0_i32_0 : i32, i32, i32
  }
}

</mosaic_0001>

<bundles_post_ra>
// kernel: tpu_custom_call.1
= control target key start
LH: loop header
LB: loop body
LE: loop exit
PB: predicated region body
PF: predicated region fallthrough
CT: control target
= control target key end

     0   :  { %9 = vsyncpa [#allocation4], 0  ;;  %s9936_s0 = inlined_call_operand.hbm [shape: bf16[2,16,16,128], index: 0, kind: input, shape index: {}]   ;;  %s9937_s1 = inlined_call_operand.hbm [shape: bf16[9,128,128], index: 1, kind: input, shape index: {}]   ;;  %s9938_s2 = inlined_call_operand.hbm [shape: f32[2,16,16,128], index: 2, kind: output, shape index: {0}]   ;;  %s9939_s3 = inlined_call_operand.hbm [shape: f32[2,2,128], index: 3, kind: output, shape index: {1}]  }
   0x1   :  { %11 = vsyncpa [#allocation4 + $0x1], 0 }
   0x2   :  { %12 = vsyncpa [#allocation7], 0 }
   0x3   :  { %13 = vsyncpa [#allocation5], 0 }
   0x4   :  { %15 = vsyncpa [#allocation5 + $0x1], 0 }
   0x5   :  { %16 = vsyncpa [#allocation10], 0 }
   0x6   :  { %18 = vsyncpa [#allocation10 + $0x1], 0  ;;  %s7234_s12 = smov 0   ;;  %s7236_s13 = smov 0  }
   0x7   :  { %s7238_s14 = smov 0   ;;  %s7240_s15 = smov 0  }
   0x8 LB: > { %s7255_s16 = sadd.s32 4294967295, %s7203_s15   ;;  %s5888_s17 = sadd.s32 4294967294, %s7203_s15   ;;  %s7203_s15 = sphi %s7240_s15, %s10267_s15   ;;  %s7199_s14 = sphi %s7238_s14, %s10266_s14   ;;  %s7195_s13 = sphi %s7236_s13, %s10265_s13   ;;  %s7191_s12 = sphi %s7234_s12, %s10264_s12  }
   0x9   : > { %p44_p0 = scmp.ne.s32.totalorder %s7195_s13, %s7191_s12  ;;  %p9940_p1 = scmp.eq.s32.totalorder %s7255_s16, 0 }
   0xa   : > { %p95_p3 = scmp.eq.s32.totalorder %s5888_s17, 1  ;;  %p5889_p5 = scmp.ge.s32.totalorder %s7203_s15, 1 }
   0xb   : > { %p7264_p4 = por %p9940_p1, %p44_p0  ;;  %p128_p7 = scmp.lt.s32.totalorder %s7203_s15, 3 }
   0xc   : > { %p7269_p6 = por %p95_p3, %p44_p0  ;;  %s7205_s21 = smov [#allocation6]  }
   0xd   : > { %s9977_s18 = scalar_select %p7264_p4, 1, 0 }
   0xe   : > { %s9978_s19 = scalar_select %p7269_p6, 1, 0 }
   0xf   : > { %p7274_p8 = pnand %p5889_p5, %p128_p7  ;;  %s140_s22 = sshll.u32 %s7205_s21, 4  ;;  %s141_s22 = int_to_ptr.vmem [resolvable:$true] %s140_s22 }
  0x10   : > { %s7288_s24 = sadd.s32 1, %s7203_s15   ;;  %s31_s25 = sadd.s32 1, %s7199_s14 }
  0x11   : > { %s9979_s20 = scalar_select %p7274_p8, 1, 0 }
  0x12   : > { %p6847_p9 = pneg %p7274_p8  ;;  %s28_s26 = ssub.s32 %s7203_s15, %s7288_s24 }
  0x13   : > { %s7062_s27 = scalar_lea.vmem %s141_s22, 9216  ;;  %p7070_p5 = scmp.lt.s32.totalorder %s141_s22, %s141_s22 }
  0x14   : > { %p7283_p11 = pnand %p6847_p9, %p9940_p1  ;;  %p7063_p13 = scmp.ne.s32.totalorder %s141_s22, %s7062_s27 }
  0x15   : > { %p7071_p7 = scmp.lt.s32.totalorder %s7062_s27, %s7062_s27 }
  0x16   : > { %p7053_p12 = pneg %p7283_p11 }
  0x17   : > { %p7072_p10 = por %p7071_p7, %p7070_p5 }
  0x18   : > { %p7065_p0 = pnand %p7063_p13, %p7053_p12 }
  0x1a   : > { %p7066_p3 = pneg %p7065_p0 }
  0x1c   : > { %p7073_p2 = pnand %p7072_p10, %p7066_p3 }
  0x1e   : > { %7076 = shalt.err (!%p7073_p2)
}
  0x1f   : > { %s7206_s28 = smov 64   ;;  %s7207_s29 = smov 4  }
  0x20   : > { %6850 = dma.hbm_to_vmem [thread:$0]  (!%p7283_p11), %s9937_s1, 9216, %s141_s22, [#allocation7], %s7206_s28, %s7206_s28, %s7207_s29  }
  0x21   : > { %p29_p2 = scmp.eq.s32.totalorder %s28_s26, 0  ;;  %p38_p9 = scmp.ne.s32.totalorder %s7199_s14, %s7195_s13 }
  0x22   : > { %p39_p10 = scmp.eq.s32.totalorder %s7203_s15, 0  ;;  %p6863_p12 = scmp.lt.s32.totalorder %s7203_s15, 2 }
  0x23   : > { %s7308_s5 = scalar_select %p29_p2, %s7199_s14, %s31_s25  }
  0x24   : > { %p40_p13 = por %p39_p10, %p38_p9  ;;  %p9981_p0 = scmp.eq.s32.totalorder %s7255_s16, 1 }
  0x25   : > { %s154_s7 = sand.u32 1, %s7199_s14   ;;  %s6171_s8 = sshll.u32 %s7203_s15, 11 }
  0x26   : > { %p7312_p3 = por %p9981_p0, %p38_p9  ;;  %s5892_s9 = sshll.u32 %s154_s7, 7 }
  0x27   : > { %s7321_s17 = scalar_lea.hbm %s9936_s0, %s6171_s8  ;;  %s158_s21 = scalar_lea.vmem [#allocation3], %s5892_s9 }
  0x28   : > { %s9982_s6 = scalar_select %p7312_p3, 1, 0 }
  0x29   : > { %s165_s22 = sshll.u32 %s158_s21, 4  ;;  %p7323_p11 = pnand %p6863_p12, %p40_p13  ;;  %s7327_s22 = int_to_ptr.vmem [resolvable:$true] %s165_s22 }
  0x2a   : > { %s7329_s25 = scalar_lea.sflag [#allocation4], %s154_s7  ;;  %s7077_s26 = scalar_lea.hbm %s7321_s17, 2048 }
  0x2b   : > { %p7078_p5 = scmp.ne.s32.totalorder %s7321_s17, %s7077_s26  ;;  %p7079_p7 = pneg %p7323_p11 }
  0x2c   : > { %s7082_s4 = scalar_lea.hbm %s9936_s0, 4096  ;;  %p7083_p10 = scmp.lt.s32.totalorder %s7321_s17, %s9936_s0 }
  0x2d   : > { %p7080_p2 = pnand %p7079_p7, %p7078_p5  ;;  %p7084_p12 = scmp.lt.s32.totalorder %s7082_s4, %s7077_s26 }
  0x2f   : > { %p7081_p9 = pneg %p7080_p2  ;;  %p7085_p13 = por %p7084_p12, %p7083_p10 }
  0x31   : > { %p7086_p0 = pnand %p7085_p13, %p7081_p9 }
  0x33   : > { %7089 = shalt.err (!%p7086_p0)
}
  0x34   : > { %s7090_s7 = scalar_lea.vmem %s7327_s22, 2048  ;;  %s7208_s10 = smov [#allocation3]  }
  0x35   : > { %p7091_p1 = scmp.ne.s32.totalorder %s7327_s22, %s7090_s7  ;;  %s7095_s11 = sshll.u32 %s7208_s10, 4  ;;  %s7096_s11 = int_to_ptr.vmem [resolvable:$false] %s7095_s11 }
  0x36   : > { %s7097_s21 = scalar_lea.vmem %s7096_s11, 4096  ;;  %p7098_p2 = scmp.lt.s32.totalorder %s7327_s22, %s7096_s11 }
  0x37   : > { %p7093_p6 = pnand %p7091_p1, %p7079_p7  ;;  %p7099_p3 = scmp.lt.s32.totalorder %s7097_s21, %s7090_s7 }
  0x39   : > { %p7094_p5 = pneg %p7093_p6  ;;  %p7100_p4 = por %p7099_p3, %p7098_p2 }
  0x3b   : > { %p7101_p8 = pnand %p7100_p4, %p7094_p5 }
  0x3d   : > { %7104 = shalt.err (!%p7101_p8)
}
  0x3e   : > { %6854 = dma.hbm_to_vmem [thread:$0]  (!%p7323_p11), %s7321_s17, 2048, %s7327_s22, %s7329_s25, %s7206_s28, %s7206_s28, %s7207_s29  }
  0x3f   : > { %p9984_p1 = scmp.ne.s32.totalorder %s9979_s20, 0 }
  0x41   : > { %177 = sbr.rel (%p9984_p1) target bundleno = 740 (0x2e4), region = 28 }
  0x46   : > { %s7356_s26 = sand.u32 1, %s7195_s13   ;;  %p9985_p4 = scmp.ne.s32.totalorder %s9977_s18, 0 }
  0x47   : > { %s5896_s27 = sshll.u32 %s7356_s26, 7  ;;  %s180_s30 = scalar_lea.sflag [#allocation4], %s7356_s26 }
  0x48   : > { %s7360_s4 = scalar_lea.vmem [#allocation3], %s5896_s27 }
  0x49   : > { %7174 = dma.done.wait (%p9985_p4), %s180_s30, 2048  }
  0x4a   : > { %7176 = vsyncadd (%p9985_p4), %s180_s30, 4294965248  ;;  %p9986_p6 = scmp.eq.s32.totalorder %s7255_s16, 0 }
  0x4c   : > { %7178 = dma.done.wait (%p9986_p6), [#allocation7], 9216   ;;  %p9987_p8 = pmov %p9986_p6 }
  0x4d   : > { %v7209_v0 = vmov 0   ;;  %v6904_v1 = vld [vmem:[#allocation6 + $0x78] sm:$0xff]   ;;  %v6905_v2 = vld [vmem:[#allocation6 + $0x70] sm:$0xff]   ;;  %vm256_vm0 = vcmask 1040384   ;;  %vm857_vm1 = vsmask.f32 3328 }
  0x4e   : > { %7180 = vsyncadd (%p9987_p8), [#allocation7], 4294958080  ;;  %248 = vst [vmem:[#allocation2] sm:$0xf] %v7209_v0  ;;  %6389 = vmatprep.subr.bf16.mxu0 %v6904_v1  ;;  %6821 = vmatprep.subr.bf16.mxu1 %v6904_v1  ;;  %vm858_vm2 = vsmask.f32 7440 }
  0x4f   : > { %249 = vst [vmem:[#allocation2 + $0x4] sm:$0xf] %v7209_v0  ;;  %250 = vst [vmem:[#allocation2 + $0x8] sm:$0x1] %v7209_v0  ;;  %6390 = vmatpush3.bf16.msra.mxu0 %v6904_v1  ;;  %6829 = vmatpush3.bf16.msra.mxu1 %v6904_v1  ;;  %vm257_vm3 = vsmask.f32 256 }
  0x50   : > { %252 = vst [vmem:[#allocation2 + $0xcc] sm:$0xf] %v7209_v0  ;;  %253 = vst [vmem:[#allocation2 + $0xd0] sm:$0xf] %v7209_v0  ;;  %6391 = vmatprep.subr.bf16.mxu0 %v6905_v2  ;;  %6822 = vmatprep.subr.bf16.mxu1 %v6905_v2  ;;  %v6906_v3 = vld [vmem:[#allocation6 + $0x68] sm:$0xff]   ;;  %v9988_v4 = vmov 0 }
  0x51   : > { %254 = vst [vmem:[#allocation2 + $0xd4] sm:$0x1] %v7209_v0  ;;  %vm307_vm4 = vsmask.f32 7938  ;;  %vm7372_vm5 = vmand %vm256_vm0, %vm257_vm3  ;;  %vm357_vm6 = vsmask.f32 4368 }
  0x52   : > { %v9989_v4 = vsel %vm7372_vm5, 4294967295, %v9988_v4  ;;  %v6907_v5 = vld [vmem:[#allocation6 + $0x60] sm:$0xff]   ;;  %vm679_vm7 = vcmask 1043456   ;;  %v230_v13 = vld [vmem:[%s7360_s4 + $0x38] sm:$0xf]  ;;  %vm7381_vm8 = vmand %vm256_vm0, %vm307_vm4  ;;  %v9991_v14 = vmov 0 }
  0x53   : > { %9990 = vst [vmem:[#allocation15_spill] sm:$0xff] %v9989_v4  ;;  %6392 = vmatpush3.bf16.msra.mxu0 %v6905_v2  ;;  %6830 = vmatpush3.bf16.msra.mxu1 %v6905_v2  ;;  %v9992_v14 = vsel %vm7381_vm8, 4294967295, %v9991_v14  ;;  %v6908_v15 = vld [vmem:[#allocation6 + $0x58] sm:$0xff]   ;;  %v280_v18 = vld [vmem:[#allocation2 + $0x60] sm:$0x1]  ;;  %v479_v27 = vshrl.u32 %v230_v13, 16  ;;  %vm7395_vm9 = vmor %vm857_vm1, %vm858_vm2 }
  0x54   : > { %6393 = vmatprep.subr.bf16.mxu0 %v6906_v3  ;;  %6823 = vmatprep.subr.bf16.mxu1 %v6906_v3  ;;  %9993 = vst [vmem:[#allocation16_spill] sm:$0xff] %v9992_v14  ;;  %v231_v17 = vld [vmem:[%s7360_s4 + $0x3c] sm:$0xf]  ;;  %v330_v23 = vld [vmem:[#allocation2 + $0x68] sm:$0x1]  ;;  %v281_v25 = vsel %vm7372_vm5, 0, %v280_v18  ;;  %vm7406_vm10 = vmor %vm257_vm3, %vm357_vm6 }
  0x55   : > { %v793_v6 = vld [vmem:[#allocation2] sm:$0xf]  ;;  %v331_v26 = vsel %vm7381_vm8, 0, %v330_v23  ;;  %v216_v28 = vld [vmem:[%s7360_s4] sm:$0xf]  ;;  %v482_v31 = vshll.u32 %v230_v13, 16  ;;  %vm7417_vm11 = vmand %vm679_vm7, %vm307_vm4 }
  0x56   : > { %v794_v7 = vld [vmem:[#allocation2 + $0x4] sm:$0xf]  ;;  %v7376_v8 = vld [vmem:[#allocation2 + $0x8] sm:$0x1]  ;;  %v861_v9 = vshrl.u32 %v793_v6, 16  ;;  %v864_v10 = vshll.u32 %v793_v6, 16 }
  0x57   : > { %v870_v11 = vshll.u32 %v794_v7, 16  ;;  %v874_v12 = vshrl.u32 %v794_v7, 16  ;;  %v880_v16 = vshll.u32 %v7376_v8, 16  ;;  %6394 = vmatpush3.bf16.msra.mxu0 %v6906_v3  ;;  %6831 = vmatpush3.bf16.msra.mxu1 %v6906_v3  ;;  %282 = vst [vmem:[#allocation2 + $0x60] sm:$0x1] %v281_v25  ;;  %v487_v32 = vshrl.u32 %v231_v17, 16 }
  0x58   : > { %v863_v19 = vrot.slane %v861_v9, 4  ;;  %v866_v20 = vrot.slane %v864_v10, 5  ;;  %6395 = vmatprep.subr.bf16.mxu0 %v6907_v5  ;;  %6824 = vmatprep.subr.bf16.mxu1 %v6907_v5  ;;  %332 = vst [vmem:[#allocation2 + $0x68] sm:$0x1] %v331_v26  ;;  %v217_v33 = vld [vmem:[%s7360_s4 + $0x4] sm:$0xf] }
  0x59   : > { %v872_v21 = vrot.slane %v870_v11, 5  ;;  %v876_v22 = vrot.slane %v874_v12, 4  ;;  %v882_v24 = vrot.slane %v880_v16, 5  ;;  %v259_v34 = vld [vmem:[#allocation2 + $0xc] sm:$0x1]  ;;  %v481_v36 = vrot.slane %v479_v27, 7 }
  0x5a   : > { %v867_v29 = vor.u32 %v866_v20, %v863_v19  ;;  %v490_v37 = vshll.u32 %v231_v17, 16  ;;  %v260_v38 = vsel %vm7372_vm5, 0, %v259_v34  ;;  %v309_v39 = vld [vmem:[#allocation2 + $0x14] sm:$0x1]  ;;  %v360_v40 = vshrl.u32 %v216_v28, 16  ;;  %v6909_v46 = vld [vmem:[#allocation6 + $0x50] sm:$0xff]  }
  0x5b   : > { %v877_v30 = vor.u32 %v876_v22, %v872_v21  ;;  %6396 = vmatpush3.bf16.msra.mxu0 %v6907_v5  ;;  %6832 = vmatpush3.bf16.msra.mxu1 %v6907_v5  ;;  %v489_v43 = vrot.slane %v487_v32, 7  ;;  %261 = vst [vmem:[#allocation2 + $0xc] sm:$0x1] %v260_v38  ;;  %v310_v44 = vsel %vm7381_vm8, 0, %v309_v39  ;;  %v232_v45 = vld [vmem:[%s7360_s4 + $0x40] sm:$0xf]  ;;  %v484_v48 = vor.u32 %v482_v31, %v481_v36 }
  0x5c   : > { %v868_v41 = vrot.slane %v867_v29, 4  ;;  %6397 = vmatprep.subr.bf16.mxu0 %v6908_v15  ;;  %6825 = vmatprep.subr.bf16.mxu1 %v6908_v15  ;;  %v9996_v47 = vmov 0  ;;  %v485_v49 = vrot.slane %v481_v36, 4  ;;  %311 = vst [vmem:[#allocation2 + $0x14] sm:$0x1] %v310_v44  ;;  %v362_v50 = vrot.slane %v360_v40, 7 }
  0x5d   : > { %v878_v42 = vrot.slane %v877_v30, 4  ;;  %v9997_v47 = vsel %vm7406_vm10, 4294967295, %v9996_v47  ;;  %v363_v51 = vshll.u32 %v216_v28, 16  ;;  %v233_v52 = vld [vmem:[%s7360_s4 + $0x44] sm:$0xf]  ;;  %v492_v55 = vor.u32 %v490_v37, %v489_v43  ;;  %v6910_v0 = vld [vmem:[#allocation6 + $0x48] sm:$0xff]  }
  0x5e   : > { %9998 = vst [vmem:[#allocation17_spill] sm:$0xff] %v9997_v47  ;;  %v873_v53 = vsel %vm7395_vm9, %v868_v41, %v872_v21  ;;  %v494_v56 = vrot.slane %v489_v43, 4  ;;  %v283_v57 = vld [vmem:[#allocation2 + $0x6c] sm:$0x1]  ;;  %v333_v58 = vld [vmem:[#allocation2 + $0x74] sm:$0x1] }
  0x5f   : > { %v883_v54 = vsel %vm7395_vm9, %v878_v42, %v882_v24  ;;  %v9999_v60 = vmov 0  ;;  %v365_v61 = vor.u32 %v363_v51, %v362_v50  ;;  %v366_v62 = vrot.slane %v362_v50, 4  ;;  %6398 = vmatpush3.bf16.msra.mxu0 %v6908_v15  ;;  %6833 = vmatpush3.bf16.msra.mxu1 %v6908_v15  ;;  %v730_v6 = vld [vmem:[#allocation2 + $0x60] sm:$0xf]  ;;  %v734_v7 = vld [vmem:[#allocation2 + $0x68] sm:$0x1] }
  0x60   : > { %v5900_v59 = vcombine.low %v873_v53, %v883_v54  ;;  %v10000_v60 = vsel %vm7417_vm11, 4294967295, %v9999_v60  ;;  %v368_v63 = vshrl.u32 %v217_v33, 16  ;;  %v493_v1 = vsel %vm7406_vm10, %v485_v49, %v492_v55  ;;  %6399 = vmatprep.subr.bf16.mxu0 %v6909_v46  ;;  %6826 = vmatprep.subr.bf16.mxu1 %v6909_v46  ;;  %v6911_v24 = vld [vmem:[#allocation6 + $0x40] sm:$0xff]   ;;  %v7438_v31 = vld [vmem:[%s7360_s4 + $0x8] sm:$0xf]  ;;  %v7447_v44 = vld [vmem:[#allocation6 + $0x38] sm:$0xff]  }
  0x61   : > { %10001 = vst [vmem:[#allocation18_spill] sm:$0xff] %v10000_v60  ;;  %v371_v2 = vshll.u32 %v217_v33, 16  ;;  %v284_v3 = vsel %vm7372_vm5, 0, %v283_v57  ;;  %v334_v5 = vsel %vm7381_vm8, 0, %v333_v58  ;;  %733 = vst [vmem:[#allocation2 + $0x64] sm:$0xf] %v493_v1  ;;  %v731_v11 = vsel %vm7417_vm11, %v484_v48, %v730_v6 }
  0x62   : > { %v370_v9 = vrot.slane %v368_v63, 7  ;;  %285 = vst [vmem:[#allocation2 + $0x6c] sm:$0x1] %v284_v3  ;;  %335 = vst [vmem:[#allocation2 + $0x74] sm:$0x1] %v334_v5  ;;  %v496_v10 = vshrl.u32 %v232_v45, 16  ;;  %6405 = vmatprep.mubr.bf16.mxu0 %v5900_v59  ;;  %v735_v12 = vsel %vm7372_vm5, %v494_v56, %v734_v7 }
  0x63   : > { %v499_v13 = vshll.u32 %v232_v45, 16  ;;  %v504_v15 = vshrl.u32 %v233_v52, 16  ;;  %732 = vst [vmem:[#allocation2 + $0x60] sm:$0xf] %v731_v11  ;;  %736 = vst [vmem:[#allocation2 + $0x68] sm:$0x1] %v735_v12  ;;  %6400 = vmatpush3.bf16.msra.mxu0 %v6909_v46  ;;  %6834 = vmatpush3.bf16.msra.mxu1 %v6909_v46 }
  0x64   : > { %v373_v16 = vor.u32 %v371_v2, %v370_v9  ;;  %v375_v17 = vrot.slane %v370_v9, 4  ;;  %v681_v18 = vld [vmem:[#allocation2 + $0xc] sm:$0xf]  ;;  %v498_v19 = vrot.slane %v496_v10, 7  ;;  %v507_v20 = vshll.u32 %v233_v52, 16  ;;  %6401 = vmatprep.subr.bf16.mxu0 %v6910_v0  ;;  %6827 = vmatprep.subr.bf16.mxu1 %v6910_v0  ;;  %v7449_v45 = vld [vmem:[#allocation6 + $0xb8] sm:$0xff]  }
  0x65   : > { %v682_v21 = vsel %vm7417_vm11, %v365_v61, %v681_v18  ;;  %v685_v22 = vld [vmem:[#allocation2 + $0x14] sm:$0x1]  ;;  %v506_v23 = vrot.slane %v504_v15, 7  ;;  %v262_v32 = vld [vmem:[#allocation2 + $0x18] sm:$0x1]  ;;  %v377_v34 = vshrl.u32 %v7438_v31, 16 }
  0x66   : > { %v374_v25 = vsel %vm7406_vm10, %v366_v62, %v373_v16  ;;  %683 = vst [vmem:[#allocation2 + $0xc] sm:$0xf] %v682_v21  ;;  %v686_v26 = vsel %vm7372_vm5, %v375_v17, %v685_v22  ;;  %v501_v27 = vor.u32 %v499_v13, %v498_v19  ;;  %v502_v28 = vrot.slane %v498_v19, 4  ;;  %v312_v33 = vld [vmem:[#allocation2 + $0x20] sm:$0x1]  ;;  %v6951_v47 = vld [vmem:[#allocation6 + $0x110] sm:$0xff]  }
  0x67   : > { %684 = vst [vmem:[#allocation2 + $0x10] sm:$0xf] %v374_v25  ;;  %687 = vst [vmem:[#allocation2 + $0x14] sm:$0x1] %v686_v26  ;;  %v509_v29 = vor.u32 %v507_v20, %v506_v23  ;;  %v511_v30 = vrot.slane %v506_v23, 4  ;;  %6402 = vmatpush3.bf16.msra.mxu0 %v6910_v0  ;;  %6835 = vmatpush3.bf16.msra.mxu1 %v6910_v0  ;;  %v263_v49 = vsel %vm7372_vm5, 0, %v262_v32 }
  0x68   : > { %v810_v36 = vld [vmem:[#allocation2 + $0x64] sm:$0xf]  ;;  %6403 = vmatprep.subr.bf16.mxu0 %v6911_v24  ;;  %6828 = vmatprep.subr.bf16.mxu1 %v6911_v24  ;;  %v313_v50 = vsel %vm7381_vm8, 0, %v312_v33  ;;  %264 = vst [vmem:[#allocation2 + $0x18] sm:$0x1] %v263_v49  ;;  %v7458_v58 = vrot.slane %v377_v34, 7 }
  0x69   : > { %v510_v37 = vsel %vm7406_vm10, %v502_v28, %v509_v29  ;;  %v737_v38 = vld [vmem:[#allocation2 + $0x6c] sm:$0xf]  ;;  %v741_v39 = vld [vmem:[#allocation2 + $0x74] sm:$0x1]  ;;  %v1062_v40 = vshll.u32 %v810_v36, 16  ;;  %v1066_v41 = vshrl.u32 %v810_v36, 16 }
  0x6a   : > { %v738_v42 = vsel %vm7417_vm11, %v501_v27, %v737_v38  ;;  %740 = vst [vmem:[#allocation2 + $0x70] sm:$0xf] %v510_v37  ;;  %v742_v43 = vsel %vm7372_vm5, %v511_v30, %v741_v39  ;;  %v809_v46 = vld [vmem:[#allocation2 + $0x60] sm:$0xf]  ;;  %v849_v48 = vld [vmem:[#allocation2 + $0x68] sm:$0x1] }
  0x6b   : > { %739 = vst [vmem:[#allocation2 + $0x6c] sm:$0xf] %v738_v42  ;;  %743 = vst [vmem:[#allocation2 + $0x74] sm:$0x1] %v742_v43  ;;  %v1053_v51 = vshrl.u32 %v809_v46, 16  ;;  %v1056_v52 = vshll.u32 %v809_v46, 16  ;;  %6404 = vmatpush3.bf16.msra.mxu0 %v6911_v24  ;;  %6836 = vmatpush3.bf16.msra.mxu1 %v6911_v24 }
  0x6c   : > { %v1064_v53 = vrot.slane %v1062_v40, 5  ;;  %v1068_v54 = vrot.slane %v1066_v41, 4  ;;  %v7456_v55 = vld [vmem:[%s7360_s4 + $0xc] sm:$0xf]  ;;  %314 = vst [vmem:[#allocation2 + $0x20] sm:$0x1] %v313_v50  ;;  %6437 = vmatprep.subr.bf16.mxu1 %v7447_v44  ;;  %6485 = vmatprep.subr.bf16.mxu0 %v7449_v45 }
  0x6d   : > { %v1072_v56 = vshll.u32 %v849_v48, 16  ;;  %v795_v57 = vld [vmem:[#allocation2 + $0xc] sm:$0xf]  ;;  %v380_v59 = vshll.u32 %v7438_v31, 16  ;;  %v1055_v61 = vrot.slane %v1053_v51, 4  ;;  %v1058_v62 = vrot.slane %v1056_v52, 5 }
  0x6e   : > { %v1069_v63 = vor.u32 %v1068_v54, %v1064_v53  ;;  %v796_v0 = vld [vmem:[#allocation2 + $0x10] sm:$0xf]  ;;  %v842_v1 = vld [vmem:[#allocation2 + $0x14] sm:$0x1]  ;;  %v885_v3 = vshrl.u32 %v795_v57, 16  ;;  %v888_v5 = vshll.u32 %v795_v57, 16 }
  0x6f   : > { %v1074_v2 = vrot.slane %v1072_v56, 5  ;;  %v894_v6 = vshll.u32 %v796_v0, 16  ;;  %v1059_v7 = vor.u32 %v1058_v62, %v1055_v61  ;;  %v898_v10 = vshrl.u32 %v796_v0, 16  ;;  %v286_v37 = vld [vmem:[#allocation2 + $0x78] sm:$0x1]  ;;  %v6915_v49 = vld [vmem:[#allocation6 + $0xb0] sm:$0xff]  }
  0x70   : > { %v1070_v9 = vrot.slane %v1069_v63, 4  ;;  %v904_v11 = vshll.u32 %v842_v1, 16  ;;  %v887_v12 = vrot.slane %v885_v3, 4  ;;  %v890_v13 = vrot.slane %v888_v5, 5  ;;  %v688_v42 = vld [vmem:[#allocation2 + $0x18] sm:$0xf] }
  0x71   : > { %v896_v15 = vrot.slane %v894_v6, 5  ;;  %v812_v16 = vld [vmem:[#allocation2 + $0x70] sm:$0xf]  ;;  %v385_v17 = vshrl.u32 %v7456_v55, 16  ;;  %v1060_v18 = vrot.slane %v1059_v7, 4  ;;  %v900_v20 = vrot.slane %v898_v10, 4 }
  0x72   : > { %v1075_v19 = vsel %vm7395_vm9, %v1070_v9, %v1074_v2  ;;  %v906_v21 = vrot.slane %v904_v11, 5  ;;  %v811_v22 = vld [vmem:[#allocation2 + $0x6c] sm:$0xf]  ;;  %v891_v23 = vor.u32 %v890_v13, %v887_v12  ;;  %v850_v24 = vld [vmem:[#allocation2 + $0x74] sm:$0x1]  ;;  %v1086_v27 = vshll.u32 %v812_v16, 16 }
  0x73   : > { %v1077_v25 = vshrl.u32 %v811_v22, 16  ;;  %v1080_v26 = vshll.u32 %v811_v22, 16  ;;  %v1065_v28 = vsel %vm7395_vm9, %v1060_v18, %v1064_v53  ;;  %v901_v29 = vor.u32 %v900_v20, %v896_v15  ;;  %v234_v43 = vld [vmem:[%s7360_s4 + $0x48] sm:$0xf]  ;;  %v235_v52 = vld [vmem:[%s7360_s4 + $0x4c] sm:$0xf] }
  0x74   : > { %v1090_v30 = vshrl.u32 %v812_v16, 16  ;;  %v1096_v31 = vshll.u32 %v850_v24, 16  ;;  %v5908_v32 = vcombine.low %v1065_v28, %v1075_v19  ;;  %v892_v33 = vrot.slane %v891_v23, 4  ;;  %v336_v53 = vld [vmem:[#allocation2 + $0x80] sm:$0x1]  ;;  %s5898_s18 = sshll.u32 %s7356_s26, 8 }
  0x75   : > { %v1079_v34 = vrot.slane %v1077_v25, 4  ;;  %v1082_v36 = vrot.slane %v1080_v26, 5  ;;  %v902_v38 = vrot.slane %v901_v29, 4  ;;  %v1088_v39 = vrot.slane %v1086_v27, 5  ;;  %v692_v62 = vld [vmem:[#allocation2 + $0x20] sm:$0x1] }
  0x76   : > { %v1092_v40 = vrot.slane %v1090_v30, 4  ;;  %v1098_v41 = vrot.slane %v1096_v31, 5  ;;  %6421 = vmatprep.mubr.bf16.mxu1 %v5908_v32  ;;  %v897_v46 = vsel %vm7395_vm9, %v892_v33, %v896_v15  ;;  %v382_v50 = vor.u32 %v380_v59, %v7458_v58  ;;  %v265_v63 = vld [vmem:[#allocation2 + $0x24] sm:$0x1]  ;;  %v7485_v3 = vld [vmem:[%s7360_s4 + $0x14] sm:$0xf] }
  0x77   : > { %v1083_v48 = vor.u32 %v1082_v36, %v1079_v34  ;;  %v383_v51 = vrot.slane %v7458_v58, 4  ;;  %v907_v54 = vsel %vm7395_vm9, %v902_v38, %v906_v21  ;;  %v387_v57 = vrot.slane %v385_v17, 7  ;;  %v7482_v58 = vld [vmem:[%s7360_s4 + $0x10] sm:$0xf]  ;;  %v315_v5 = vld [vmem:[#allocation2 + $0x2c] sm:$0x1] }
  0x78   : > { %v1093_v56 = vor.u32 %v1092_v40, %v1088_v39  ;;  %v388_v61 = vshll.u32 %v7456_v55, 16  ;;  %v5901_v0 = vcombine.low %v897_v46, %v907_v54  ;;  %v689_v2 = vsel %vm7417_vm11, %v382_v50, %v688_v42  ;;  %v289_v15 = vld [vmem:[#allocation2 + $0x84] sm:$0x1]  ;;  %v6914_v17 = vld [vmem:[#allocation6 + $0x30] sm:$0xff]   ;;  %s9754_s20 = scalar_lea.vmem [#allocation8], %s5898_s18  ;;  %s6172_s28 = sshll.u32 %s7255_s16, 12 }
  0x79   : > { %v1084_v1 = vrot.slane %v1083_v48, 4  ;;  %v287_v59 = vsel %vm7372_vm5, 0, %v286_v37  ;;  %v392_v9 = vrot.slane %v387_v57, 4  ;;  %690 = vst [vmem:[#allocation2 + $0x18] sm:$0xf] %v689_v2  ;;  %v337_v55 = vsel %vm7381_vm8, 0, %v336_v53  ;;  %s9871_s23 = scalar_lea.hbm %s9938_s2, %s6172_s28 }
  0x7a   : > { %v1094_v6 = vrot.slane %v1093_v56, 4  ;;  %v390_v7 = vor.u32 %v388_v61, %v387_v57  ;;  %288 = vst [vmem:[#allocation2 + $0x78] sm:$0x1] %v287_v59  ;;  %6406 = vmatmul.mubr.bf16.vlgmr.msra.gmra.mxu0 %v5901_v0  ;;  %338 = vst [vmem:[#allocation2 + $0x80] sm:$0x1] %v337_v55  ;;  %v513_v11 = vshrl.u32 %v234_v43, 16 }
  0x7b   : > { %v1089_v10 = vsel %vm7395_vm9, %v1084_v1, %v1088_v39  ;;  %v516_v12 = vshll.u32 %v234_v43, 16  ;;  %v521_v13 = vshrl.u32 %v235_v52, 16  ;;  %6486 = vmatpush3.bf16.msra.mxu0 %v7449_v45  ;;  %v693_v19 = vsel %vm7372_vm5, %v392_v9, %v692_v62  ;;  %v7499_v21 = vld [vmem:[%s7360_s4 + $0x50] sm:$0xf]  ;;  %v339_v22 = vld [vmem:[#allocation2 + $0x8c] sm:$0x1] }
  0x7c   : > { %v1099_v16 = vsel %vm7395_vm9, %v1094_v6, %v1098_v41  ;;  %v391_v18 = vsel %vm7406_vm10, %v383_v51, %v390_v7  ;;  %v524_v20 = vshll.u32 %v235_v52, 16  ;;  %6487 = vmatprep.subr.bf16.mxu0 %v6915_v49  ;;  %694 = vst [vmem:[#allocation2 + $0x20] sm:$0x1] %v693_v19  ;;  %v515_v24 = vrot.slane %v513_v11, 7  ;;  %v6917_v26 = vld [vmem:[#allocation6 + $0xa8] sm:$0xff]   ;;  %v6919_v41 = vld [vmem:[#allocation6 + $0xa0] sm:$0xff]  }
  0x7d   : > { %v5909_v23 = vcombine.low %v1089_v10, %v1099_v16  ;;  %691 = vst [vmem:[#allocation2 + $0x1c] sm:$0xf] %v391_v18  ;;  %v523_v25 = vrot.slane %v521_v13, 7  ;;  %v266_v45 = vsel %vm7372_vm5, 0, %v265_v63  ;;  %v316_v27 = vsel %vm7381_vm8, 0, %v315_v5  ;;  %v6916_v40 = vld [vmem:[#allocation6 + $0x28] sm:$0xff]  }
  0x7e   : > { %267 = vst [vmem:[#allocation2 + $0x24] sm:$0x1] %v266_v45  ;;  %v394_v28 = vshrl.u32 %v7482_v58, 16  ;;  %v397_v29 = vshll.u32 %v7482_v58, 16  ;;  %v402_v30 = vshrl.u32 %v7485_v3, 16  ;;  %v518_v31 = vor.u32 %v516_v12, %v515_v24  ;;  %v6918_v63 = vld [vmem:[#allocation6 + $0x20] sm:$0xff]  }
  0x7f   : > { %6422 = vmatmul.mubr.bf16.vlgmr.msra.gmra.mxu1 %v5909_v23  ;;  %v519_v32 = vrot.slane %v515_v24, 4  ;;  %v526_v33 = vor.u32 %v524_v20, %v523_v25  ;;  %v528_v34 = vrot.slane %v523_v25, 4  ;;  %317 = vst [vmem:[#allocation2 + $0x2c] sm:$0x1] %v316_v27  ;;  %6488 = vmatpush3.bf16.msra.mxu0 %v6915_v49  ;;  %v405_v38 = vshll.u32 %v7485_v3, 16  ;;  %v6921_v9 = vld [vmem:[#allocation6 + $0x98] sm:$0xff]  }
  0x80   : > { %6438 = vmatpush3.bf16.msra.mxu1 %v7447_v44  ;;  %v396_v36 = vrot.slane %v394_v28, 7  ;;  %v404_v37 = vrot.slane %v402_v30, 7  ;;  %v290_v39 = vsel %vm7372_vm5, 0, %v289_v15  ;;  %v797_v42 = vld [vmem:[#allocation2 + $0x18] sm:$0xf]  ;;  %v340_v44 = vsel %vm7381_vm8, 0, %v339_v22  ;;  %6489 = vmatprep.subr.bf16.mxu0 %v6917_v26 }
  0x81   : > { %6439 = vmatprep.subr.bf16.mxu1 %v6914_v17  ;;  %v527_v43 = vsel %vm7406_vm10, %v519_v32, %v526_v33  ;;  %v744_v46 = vld [vmem:[#allocation2 + $0x78] sm:$0xf]  ;;  %291 = vst [vmem:[#allocation2 + $0x84] sm:$0x1] %v290_v39  ;;  %v530_v48 = vshrl.u32 %v7499_v21, 16  ;;  %v909_v49 = vshrl.u32 %v797_v42, 16 }
  0x82   : > { %v912_v50 = vshll.u32 %v797_v42, 16  ;;  %v745_v51 = vsel %vm7417_vm11, %v518_v31, %v744_v46  ;;  %747 = vst [vmem:[#allocation2 + $0x7c] sm:$0xf] %v527_v43  ;;  %v748_v52 = vld [vmem:[#allocation2 + $0x80] sm:$0x1]  ;;  %v399_v53 = vor.u32 %v397_v29, %v396_v36  ;;  %v400_v56 = vrot.slane %v396_v36, 4 }
  0x83   : > { %341 = vst [vmem:[#allocation2 + $0x8c] sm:$0x1] %v340_v44  ;;  %746 = vst [vmem:[#allocation2 + $0x78] sm:$0xf] %v745_v51  ;;  %v749_v54 = vsel %vm7372_vm5, %v528_v34, %v748_v52  ;;  %v407_v57 = vor.u32 %v405_v38, %v404_v37  ;;  %v409_v61 = vrot.slane %v404_v37, 4  ;;  %v911_v2 = vrot.slane %v909_v49, 4  ;;  %6490 = vmatpush3.bf16.msra.mxu0 %v6917_v26 }
  0x84   : > { %v237_v62 = vld [vmem:[%s7360_s4 + $0x54] sm:$0xf]  ;;  %6440 = vmatpush3.bf16.msra.mxu1 %v6914_v17  ;;  %v798_v0 = vld [vmem:[#allocation2 + $0x1c] sm:$0xf]  ;;  %v843_v1 = vld [vmem:[#allocation2 + $0x20] sm:$0x1]  ;;  %6491 = vmatprep.subr.bf16.mxu0 %v6919_v41 }
  0x85   : > { %v914_v59 = vrot.slane %v912_v50, 5  ;;  %750 = vst [vmem:[#allocation2 + $0x80] sm:$0x1] %v749_v54  ;;  %v918_v58 = vshll.u32 %v798_v0, 16  ;;  %v922_v3 = vshrl.u32 %v798_v0, 16  ;;  %v928_v5 = vshll.u32 %v843_v1, 16  ;;  %6441 = vmatprep.subr.bf16.mxu1 %v6916_v40 }
  0x86   : > { %v408_v6 = vsel %vm7406_vm10, %v400_v56, %v407_v57  ;;  %v695_v7 = vld [vmem:[#allocation2 + $0x24] sm:$0xf]  ;;  %v699_v11 = vld [vmem:[#allocation2 + $0x2c] sm:$0x1]  ;;  %v7526_v12 = vrot.slane %v530_v48, 7  ;;  %v533_v13 = vshll.u32 %v7499_v21, 16 }
  0x87   : > { %v915_v55 = vor.u32 %v914_v59, %v911_v2  ;;  %v696_v10 = vsel %vm7417_vm11, %v399_v53, %v695_v7  ;;  %698 = vst [vmem:[#allocation2 + $0x28] sm:$0xf] %v408_v6  ;;  %v268_v15 = vld [vmem:[#allocation2 + $0x30] sm:$0x1]  ;;  %v1895_v16 = vrot.slane %v7376_v8, 5  ;;  %v920_v17 = vrot.slane %v918_v58, 5  ;;  %6492 = vmatpush3.bf16.msra.mxu0 %v6919_v41 }
  0x88   : > { %v924_v18 = vrot.slane %v922_v3, 4  ;;  %697 = vst [vmem:[#allocation2 + $0x24] sm:$0xf] %v696_v10  ;;  %v700_v19 = vsel %vm7372_vm5, %v409_v61, %v699_v11  ;;  %v930_v22 = vrot.slane %v928_v5, 5  ;;  %v535_v23 = vor.u32 %v533_v13, %v7526_v12  ;;  %v751_v25 = vld [vmem:[#allocation2 + $0x84] sm:$0xf]  ;;  %6442 = vmatpush3.bf16.msra.mxu1 %v6916_v40  ;;  %6493 = vmatprep.subr.bf16.mxu0 %v6921_v9 }
  0x89   : > { %v916_v20 = vrot.slane %v915_v55, 4  ;;  %701 = vst [vmem:[#allocation2 + $0x2c] sm:$0x1] %v700_v19  ;;  %v538_v24 = vshrl.u32 %v237_v62, 16  ;;  %v6920_v45 = vld [vmem:[#allocation6 + $0x18] sm:$0xff]   ;;  %v536_v27 = vrot.slane %v7526_v12, 4  ;;  %6443 = vmatprep.subr.bf16.mxu1 %v6918_v63 }
  0x8a   : > { %v925_v21 = vor.u32 %v924_v18, %v920_v17  ;;  %v814_v26 = vld [vmem:[#allocation2 + $0x7c] sm:$0xf]  ;;  %v541_v28 = vshll.u32 %v237_v62, 16  ;;  %v269_v29 = vsel %vm7372_vm5, 0, %v268_v15  ;;  %v6923_v30 = vld [vmem:[#allocation6 + $0x90] sm:$0xff]   ;;  %v752_v41 = vsel %vm7417_vm11, %v535_v23, %v751_v25  ;;  %v6925_v56 = vld [vmem:[#allocation6 + $0x88] sm:$0xff]  }
  0x8b   : > { %v921_v31 = vsel %vm7395_vm9, %v916_v20, %v920_v17  ;;  %v813_v32 = vld [vmem:[#allocation2 + $0x78] sm:$0xf]  ;;  %v1110_v33 = vshll.u32 %v814_v26, 16  ;;  %v1114_v34 = vshrl.u32 %v814_v26, 16  ;;  %v540_v36 = vrot.slane %v538_v24, 7  ;;  %6494 = vmatpush3.bf16.msra.mxu0 %v6921_v9  ;;  %v6922_v48 = vld [vmem:[#allocation6 + $0x10] sm:$0xff]  }
  0x8c   : > { %270 = vst [vmem:[#allocation2 + $0x30] sm:$0x1] %v269_v29  ;;  %v926_v37 = vrot.slane %v925_v21, 4  ;;  %v851_v38 = vld [vmem:[#allocation2 + $0x80] sm:$0x1]  ;;  %v1101_v39 = vshrl.u32 %v813_v32, 16  ;;  %6444 = vmatpush3.bf16.msra.mxu1 %v6918_v63  ;;  %6495 = vmatprep.subr.bf16.mxu0 %v6923_v30 }
  0x8d   : > { %v1104_v40 = vshll.u32 %v813_v32, 16  ;;  %v1112_v42 = vrot.slane %v1110_v33, 5  ;;  %v1116_v43 = vrot.slane %v1114_v34, 4  ;;  %v1120_v46 = vshll.u32 %v851_v38, 16  ;;  %753 = vst [vmem:[#allocation2 + $0x84] sm:$0xf] %v752_v41  ;;  %6445 = vmatprep.subr.bf16.mxu1 %v6920_v45 }
  0x8e   : > { %v543_v44 = vor.u32 %v541_v28, %v540_v36  ;;  %v931_v49 = vsel %vm7395_vm9, %v926_v37, %v930_v22  ;;  %v1103_v50 = vrot.slane %v1101_v39, 4  ;;  %v800_v52 = vld [vmem:[#allocation2 + $0x28] sm:$0xf]  ;;  %v545_v53 = vrot.slane %v540_v36, 4  ;;  %v318_v54 = vld [vmem:[#allocation2 + $0x38] sm:$0x1] }
  0x8f   : > { %v1106_v51 = vrot.slane %v1104_v40, 5  ;;  %v5902_v57 = vcombine.low %v921_v31, %v931_v49  ;;  %v1117_v61 = vor.u32 %v1116_v43, %v1112_v42  ;;  %v1122_v62 = vrot.slane %v1120_v46, 5  ;;  %v799_v0 = vld [vmem:[#allocation2 + $0x24] sm:$0xf]  ;;  %v755_v63 = vld [vmem:[#allocation2 + $0x8c] sm:$0x1]  ;;  %6496 = vmatpush3.bf16.msra.mxu0 %v6923_v30 }
  0x90   : > { %v942_v1 = vshll.u32 %v800_v52, 16  ;;  %v844_v59 = vld [vmem:[#allocation2 + $0x2c] sm:$0x1]  ;;  %v933_v58 = vshrl.u32 %v799_v0, 16  ;;  %v936_v3 = vshll.u32 %v799_v0, 16  ;;  %v946_v5 = vshrl.u32 %v800_v52, 16  ;;  %6446 = vmatpush3.bf16.msra.mxu1 %v6920_v45  ;;  %6497 = vmatprep.subr.bf16.mxu0 %v6925_v56 }
  0x91   : > { %v1107_v2 = vor.u32 %v1106_v51, %v1103_v50  ;;  %6409 = vmatprep.mubr.bf16.mxu0 %v5902_v57  ;;  %v1118_v6 = vrot.slane %v1117_v61, 4  ;;  %v952_v9 = vshll.u32 %v844_v59, 16  ;;  %v544_v55 = vsel %vm7406_vm10, %v536_v27, %v543_v44  ;;  %v222_v10 = vld [vmem:[%s7360_s4 + $0x18] sm:$0xf]  ;;  %6447 = vmatprep.subr.bf16.mxu1 %v6922_v48  ;;  %v6924_v17 = vld [vmem:[#allocation6 + $0x8] sm:$0xff]   ;;  %v6927_v24 = vld [vmem:[#allocation6 + $0x80] sm:$0xff]  }
  0x92   : > { %v944_v7 = vrot.slane %v942_v1, 5  ;;  %v935_v12 = vrot.slane %v933_v58, 4  ;;  %v938_v13 = vrot.slane %v936_v3, 5  ;;  %v948_v15 = vrot.slane %v946_v5, 4  ;;  %754 = vst [vmem:[#allocation2 + $0x88] sm:$0xf] %v544_v55 }
  0x93   : > { %v1108_v11 = vrot.slane %v1107_v2, 4  ;;  %v1123_v18 = vsel %vm7395_vm9, %v1118_v6, %v1122_v62  ;;  %v954_v19 = vrot.slane %v952_v9, 5  ;;  %v756_v20 = vsel %vm7372_vm5, %v545_v53, %v755_v63  ;;  %v223_v22 = vld [vmem:[%s7360_s4 + $0x1c] sm:$0xf]  ;;  %v292_v28 = vld [vmem:[#allocation2 + $0x90] sm:$0x1]  ;;  %6498 = vmatpush3.bf16.msra.mxu0 %v6925_v56 }
  0x94   : > { %v319_v23 = vsel %vm7381_vm8, 0, %v318_v54  ;;  %v939_v45 = vor.u32 %v938_v13, %v935_v12  ;;  %v949_v21 = vor.u32 %v948_v15, %v944_v7  ;;  %757 = vst [vmem:[#allocation2 + $0x8c] sm:$0x1] %v756_v20  ;;  %v815_v26 = vld [vmem:[#allocation2 + $0x84] sm:$0xf]  ;;  %v411_v27 = vshrl.u32 %v222_v10, 16  ;;  %6448 = vmatpush3.bf16.msra.mxu1 %v6922_v48  ;;  %6499 = vmatprep.subr.bf16.mxu0 %v6927_v24 }
  0x95   : > { %v1113_v25 = vsel %vm7395_vm9, %v1108_v11, %v1112_v42  ;;  %320 = vst [vmem:[#allocation2 + $0x38] sm:$0x1] %v319_v23  ;;  %v6926_v29 = vld [vmem:[#allocation6] sm:$0xff]   ;;  %v1125_v31 = vshrl.u32 %v815_v26, 16  ;;  %v1128_v32 = vshll.u32 %v815_v26, 16  ;;  %v414_v33 = vshll.u32 %v222_v10, 16  ;;  %6449 = vmatprep.subr.bf16.mxu1 %v6924_v17 }
  0x96   : > { %v5910_v30 = vcombine.low %v1113_v25, %v1123_v18  ;;  %v7555_v34 = vld [vmem:[%s7360_s4 + $0x58] sm:$0xf]  ;;  %v940_v37 = vrot.slane %v939_v45, 4  ;;  %v950_v38 = vrot.slane %v949_v21, 4  ;;  %v413_v39 = vrot.slane %v411_v27, 7  ;;  %s5760_s29 = sshll.u32 %s9754_s20, 4  ;;  %s9873_s29 = int_to_ptr.vmem [resolvable:$true] %s5760_s29 }
  0x97   : > { %v7557_v36 = vld [vmem:[#allocation6 + $0x138] sm:$0xff]   ;;  %v419_v40 = vshrl.u32 %v223_v22, 16  ;;  %v342_v41 = vld [vmem:[#allocation2 + $0x98] sm:$0x1]  ;;  %v1127_v42 = vrot.slane %v1125_v31, 4  ;;  %v1130_v43 = vrot.slane %v1128_v32, 5  ;;  %6500 = vmatpush3.bf16.msra.mxu0 %v6927_v24 }
  0x98   : > { %6425 = vmatprep.mubr.bf16.mxu1 %v5910_v30  ;;  %v422_v46 = vshll.u32 %v223_v22, 16  ;;  %v702_v44 = vld [vmem:[#allocation2 + $0x30] sm:$0xf]  ;;  %v293_v49 = vsel %vm7372_vm5, 0, %v292_v28  ;;  %v945_v48 = vsel %vm7395_vm9, %v940_v37, %v944_v7  ;;  %v955_v50 = vsel %vm7395_vm9, %v950_v38, %v954_v19  ;;  %v239_v53 = vld [vmem:[%s7360_s4 + $0x5c] sm:$0xf]  ;;  %6450 = vmatpush3.bf16.msra.mxu1 %v6924_v17 }
  0x99   : > { %v416_v51 = vor.u32 %v414_v33, %v413_v39  ;;  %v417_v52 = vrot.slane %v413_v39, 4  ;;  %294 = vst [vmem:[#allocation2 + $0x90] sm:$0x1] %v293_v49  ;;  %v5903_v54 = vcombine.low %v945_v48, %v955_v50  ;;  %v816_v56 = vld [vmem:[#allocation2 + $0x88] sm:$0xf]  ;;  %v1131_v57 = vor.u32 %v1130_v43, %v1127_v42  ;;  %6451 = vmatprep.subr.bf16.mxu1 %v6926_v29  ;;  %v6930_v58 = vld [vmem:[#allocation6 + $0xf8] sm:$0xff]  }
  0x9a   : > { %v421_v61 = vrot.slane %v419_v40, 7  ;;  %v343_v62 = vsel %vm7381_vm8, 0, %v342_v41  ;;  %v1134_v0 = vshll.u32 %v816_v56, 16  ;;  %v1138_v1 = vshrl.u32 %v816_v56, 16  ;;  %v271_v59 = vld [vmem:[#allocation2 + $0x3c] sm:$0x1]  ;;  %6581 = vmatprep.subr.bf16.mxu0 %v7557_v36 }
  0x9b   : > { %v703_v63 = vsel %vm7417_vm11, %v416_v51, %v702_v44  ;;  %344 = vst [vmem:[#allocation2 + $0x98] sm:$0x1] %v343_v62  ;;  %v547_v2 = vshrl.u32 %v7555_v34, 16  ;;  %6410 = vmatmul.mubr.bf16.gmra.mxu0 %v5903_v54  ;;  %v852_v3 = vld [vmem:[#allocation2 + $0x8c] sm:$0x1]  ;;  %v1132_v5 = vrot.slane %v1131_v57, 4 }
  0x9c   : > { %v424_v6 = vor.u32 %v422_v46, %v421_v61  ;;  %v426_v7 = vrot.slane %v421_v61, 4  ;;  %704 = vst [vmem:[#allocation2 + $0x30] sm:$0xf] %v703_v63  ;;  %v706_v9 = vld [vmem:[#allocation2 + $0x38] sm:$0x1]  ;;  %v1136_v11 = vrot.slane %v1134_v0, 5  ;;  %6452 = vmatpush3.bf16.msra.mxu1 %v6926_v29 }
  0x9d   : > { %v224_v55 = vld [vmem:[%s7360_s4 + $0x20] sm:$0xf]  ;;  %v321_v10 = vld [vmem:[#allocation2 + $0x44] sm:$0x1]  ;;  %v1140_v12 = vrot.slane %v1138_v1, 4  ;;  %v1144_v13 = vshll.u32 %v852_v3, 16  ;;  %6533 = vmatprep.subr.bf16.mxu1 %v6930_v58 }
  0x9e   : > { %v549_v15 = vrot.slane %v547_v2, 7  ;;  %v225_v17 = vld [vmem:[%s7360_s4 + $0x24] sm:$0xf]  ;;  %v425_v18 = vsel %vm7406_vm10, %v417_v52, %v424_v6  ;;  %v707_v19 = vsel %vm7372_vm5, %v426_v7, %v706_v9  ;;  %v550_v20 = vshll.u32 %v7555_v34, 16  ;;  %v240_v57 = vld [vmem:[%s7360_s4 + $0x60] sm:$0xf] }
  0x9f   : > { %v555_v22 = vshrl.u32 %v239_v53, 16  ;;  %v1137_v23 = vsel %vm7395_vm9, %v1132_v5, %v1136_v11  ;;  %v1141_v24 = vor.u32 %v1140_v12, %v1136_v11  ;;  %v1146_v25 = vrot.slane %v1144_v13, 5  ;;  %705 = vst [vmem:[#allocation2 + $0x34] sm:$0xf] %v425_v18  ;;  %708 = vst [vmem:[#allocation2 + $0x38] sm:$0x1] %v707_v19 }
  0xa0   : > { %v553_v45 = vrot.slane %v549_v15, 4  ;;  %v295_v21 = vld [vmem:[#allocation2 + $0x9c] sm:$0x1]  ;;  %v552_v26 = vor.u32 %v550_v20, %v549_v15  ;;  %v558_v28 = vshll.u32 %v239_v53, 16  ;;  %v758_v30 = vld [vmem:[#allocation2 + $0x90] sm:$0xf] }
  0xa1   : > { %v557_v27 = vrot.slane %v555_v22, 7  ;;  %v272_v31 = vsel %vm7372_vm5, 0, %v271_v59  ;;  %v1142_v32 = vrot.slane %v1141_v24, 4  ;;  %v322_v29 = vsel %vm7381_vm8, 0, %v321_v10  ;;  %v345_v61 = vld [vmem:[#allocation2 + $0xa4] sm:$0x1] }
  0xa2   : > { %273 = vst [vmem:[#allocation2 + $0x3c] sm:$0x1] %v272_v31  ;;  %v428_v33 = vshrl.u32 %v224_v55, 16  ;;  %v431_v34 = vshll.u32 %v224_v55, 16  ;;  %v759_v39 = vsel %vm7417_vm11, %v552_v26, %v758_v30  ;;  %v762_v40 = vld [vmem:[#allocation2 + $0x98] sm:$0x1] }
  0xa3   : > { %v560_v37 = vor.u32 %v558_v28, %v557_v27  ;;  %v562_v38 = vrot.slane %v557_v27, 4  ;;  %323 = vst [vmem:[#allocation2 + $0x44] sm:$0x1] %v322_v29  ;;  %v436_v41 = vshrl.u32 %v225_v17, 16  ;;  %v1147_v42 = vsel %vm7395_vm9, %v1142_v32, %v1146_v25  ;;  %v7589_v43 = vld [vmem:[#allocation2 + $0x30] sm:$0xf] }
  0xa4   : > { %760 = vst [vmem:[#allocation2 + $0x90] sm:$0xf] %v759_v39  ;;  %v430_v46 = vrot.slane %v428_v33, 7  ;;  %v439_v44 = vshll.u32 %v225_v17, 16  ;;  %v296_v49 = vsel %vm7372_vm5, 0, %v295_v21  ;;  %v5911_v48 = vcombine.low %v1137_v23, %v1147_v42  ;;  %s5742_s25 = scalar_lea.sflag [#allocation5], %s7356_s26 }
  0xa5   : > { %v957_v50 = vshrl.u32 %v7589_v43, 16  ;;  %v960_v51 = vshll.u32 %v7589_v43, 16  ;;  %v561_v52 = vsel %vm7406_vm10, %v553_v45, %v560_v37  ;;  %297 = vst [vmem:[#allocation2 + $0x9c] sm:$0x1] %v296_v49  ;;  %v763_v53 = vsel %vm7372_vm5, %v562_v38, %v762_v40  ;;  %v241_v6 = vld [vmem:[%s7360_s4 + $0x64] sm:$0xf] }
  0xa6   : > { %761 = vst [vmem:[#allocation2 + $0x94] sm:$0xf] %v561_v52  ;;  %v434_v54 = vrot.slane %v430_v46, 4  ;;  %v438_v56 = vrot.slane %v436_v41, 7  ;;  %6426 = vmatmul.mubr.bf16.gmra.mxu1 %v5911_v48  ;;  %v7600_v62 = vld [vmem:[#allocation2 + $0x34] sm:$0xf]  ;;  %v433_v2 = vor.u32 %v431_v34, %v430_v46 }
  0xa7   : > { %v7602_v0 = vld [vmem:[#allocation2 + $0x38] sm:$0x1]  ;;  %v959_v1 = vrot.slane %v957_v50, 4  ;;  %v962_v63 = vrot.slane %v960_v51, 5  ;;  %764 = vst [vmem:[#allocation2 + $0x98] sm:$0x1] %v763_v53 }
  0xa8   : > { %v966_v59 = vshll.u32 %v7600_v62, 16  ;;  %v970_v58 = vshrl.u32 %v7600_v62, 16  ;;  %v976_v3 = vshll.u32 %v7602_v0, 16  ;;  %v441_v5 = vor.u32 %v439_v44, %v438_v56  ;;  %v274_v27 = vld [vmem:[#allocation2 + $0x48] sm:$0x1]  ;;  %s7105_s8 = scalar_lea.vmem %s9873_s29, 4096 }
  0xa9   : > { %v963_v7 = vor.u32 %v962_v63, %v959_v1  ;;  %v443_v9 = vrot.slane %v438_v56, 4  ;;  %v709_v55 = vld [vmem:[#allocation2 + $0x3c] sm:$0xf]  ;;  %v346_v10 = vsel %vm7381_vm8, 0, %v345_v61  ;;  %v564_v11 = vshrl.u32 %v240_v57, 16  ;;  %p7106_p3 = scmp.ne.s32.totalorder %s9873_s29, %s7105_s8  ;;  %p10261_p11 = scmp.ne.s32.totalorder %s9982_s6, 0 }
  0xaa   : > { %v968_v12 = vrot.slane %v966_v59, 5  ;;  %v972_v13 = vrot.slane %v970_v58, 4  ;;  %v978_v15 = vrot.slane %v976_v3, 5  ;;  %v442_v17 = vsel %vm7406_vm10, %v434_v54, %v441_v5  ;;  %v713_v18 = vld [vmem:[#allocation2 + $0x44] sm:$0x1]  ;;  %s7210_s9 = smov [#allocation8]  }
  0xab   : > { %347 = vst [vmem:[#allocation2 + $0xa4] sm:$0x1] %v346_v10  ;;  %v964_v19 = vrot.slane %v963_v7, 4  ;;  %v817_v20 = vld [vmem:[#allocation2 + $0x90] sm:$0xf]  ;;  %v710_v22 = vsel %vm7417_vm11, %v433_v2, %v709_v55  ;;  %v714_v23 = vsel %vm7372_vm5, %v443_v9, %v713_v18  ;;  %v566_v24 = vrot.slane %v564_v11, 7  ;;  %p7107_p7 = pnand %p7106_p3, %p10261_p11 }
  0xac   : > { %712 = vst [vmem:[#allocation2 + $0x40] sm:$0xf] %v442_v17  ;;  %v973_v25 = vor.u32 %v972_v13, %v968_v12  ;;  %v1149_v45 = vshrl.u32 %v817_v20, 16  ;;  %v1152_v21 = vshll.u32 %v817_v20, 16  ;;  %711 = vst [vmem:[#allocation2 + $0x3c] sm:$0xf] %v710_v22 }
  0xad   : > { %715 = vst [vmem:[#allocation2 + $0x44] sm:$0x1] %v714_v23  ;;  %v567_v26 = vshll.u32 %v240_v57, 16  ;;  %v969_v28 = vsel %vm7395_vm9, %v964_v19, %v968_v12  ;;  %v7618_v30 = vld [vmem:[#allocation2 + $0x94] sm:$0xf]  ;;  %v570_v31 = vrot.slane %v566_v24, 4  ;;  %p7108_p9 = pneg %p7107_p7 }
  0xae   : > { %v572_v32 = vshrl.u32 %v241_v6, 16  ;;  %v575_v29 = vshll.u32 %v241_v6, 16  ;;  %v324_v33 = vld [vmem:[#allocation2 + $0x50] sm:$0x1]  ;;  %v974_v34 = vrot.slane %v973_v25, 4  ;;  %v1151_v38 = vrot.slane %v1149_v45, 4 }
  0xaf   : > { %v7620_v37 = vld [vmem:[#allocation2 + $0x98] sm:$0x1]  ;;  %v1154_v39 = vrot.slane %v1152_v21, 5  ;;  %v1158_v40 = vshll.u32 %v7618_v30, 16  ;;  %v1162_v41 = vshrl.u32 %v7618_v30, 16  ;;  %v569_v46 = vor.u32 %v567_v26, %v566_v24  ;;  %s7109_s7 = sshll.u32 %s7210_s9, 4  ;;  %s7110_s7 = int_to_ptr.vmem [resolvable:$false] %s7109_s7 }
  0xb0   : > { %v1168_v42 = vshll.u32 %v7620_v37, 16  ;;  %v574_v44 = vrot.slane %v572_v32, 7  ;;  %v765_v49 = vld [vmem:[#allocation2 + $0x9c] sm:$0xf]  ;;  %v979_v48 = vsel %vm7395_vm9, %v974_v34, %v978_v15  ;;  %v275_v52 = vsel %vm7372_vm5, 0, %v274_v27  ;;  %s7111_s10 = scalar_lea.vmem %s7110_s7, 8192  ;;  %p7112_p10 = scmp.lt.s32.totalorder %s9873_s29, %s7110_s7 }
  0xb1   : > { %v1155_v50 = vor.u32 %v1154_v39, %v1151_v38  ;;  %v1160_v51 = vrot.slane %v1158_v40, 5  ;;  %v5904_v53 = vcombine.low %v969_v28, %v979_v48  ;;  %v1164_v54 = vrot.slane %v1162_v41, 4  ;;  %v226_v1 = vld [vmem:[%s7360_s4 + $0x28] sm:$0xf]  ;;  %276 = vst [vmem:[#allocation2 + $0x48] sm:$0x1] %v275_v52  ;;  %p7113_p12 = scmp.lt.s32.totalorder %s7111_s10, %s7105_s8 }
  0xb2   : > { %v1170_v56 = vrot.slane %v1168_v42, 5  ;;  %v577_v57 = vor.u32 %v575_v29, %v574_v44  ;;  %v769_v61 = vld [vmem:[#allocation2 + $0xa4] sm:$0x1]  ;;  %v579_v59 = vrot.slane %v574_v44, 4  ;;  %v766_v58 = vsel %vm7417_vm11, %v569_v46, %v765_v49  ;;  %v298_v23 = vld [vmem:[#allocation2 + $0xa8] sm:$0x1] }
  0xb3   : > { %v1156_v63 = vrot.slane %v1155_v50, 4  ;;  %v7630_v2 = vld [vmem:[#allocation2 + $0x40] sm:$0xf]  ;;  %v325_v3 = vsel %vm7381_vm8, 0, %v324_v33  ;;  %6413 = vmatprep.mubr.bf16.mxu0 %v5904_v53  ;;  %v1165_v5 = vor.u32 %v1164_v54, %v1160_v51  ;;  %v7636_v6 = vld [vmem:[#allocation2 + $0x3c] sm:$0xf]  ;;  %p7114_p13 = por %p7113_p12, %p7112_p10 }
  0xb4   : > { %v7638_v7 = vld [vmem:[#allocation2 + $0x44] sm:$0x1]  ;;  %v990_v9 = vshll.u32 %v7630_v2, 16  ;;  %v994_v55 = vshrl.u32 %v7630_v2, 16  ;;  %v578_v10 = vsel %vm7406_vm10, %v570_v31, %v577_v57  ;;  %767 = vst [vmem:[#allocation2 + $0x9c] sm:$0xf] %v766_v58  ;;  %v770_v22 = vsel %vm7372_vm5, %v579_v59, %v769_v61 }
  0xb5   : > { %326 = vst [vmem:[#allocation2 + $0x50] sm:$0x1] %v325_v3  ;;  %v1161_v11 = vsel %vm7395_vm9, %v1156_v63, %v1160_v51  ;;  %v981_v12 = vshrl.u32 %v7636_v6, 16  ;;  %v984_v13 = vshll.u32 %v7636_v6, 16  ;;  %v1000_v15 = vshll.u32 %v7638_v7, 16  ;;  %p7115_p0 = pnand %p7114_p13, %p7108_p9 }
  0xb6   : > { %768 = vst [vmem:[#allocation2 + $0xa0] sm:$0xf] %v578_v10  ;;  %v227_v17 = vld [vmem:[%s7360_s4 + $0x2c] sm:$0xf]  ;;  %v1166_v18 = vrot.slane %v1165_v5, 4  ;;  %v992_v19 = vrot.slane %v990_v9, 5 }
  0xb7   : > { %v996_v20 = vrot.slane %v994_v55, 4  ;;  %v983_v24 = vrot.slane %v981_v12, 4  ;;  %v986_v25 = vrot.slane %v984_v13, 5  ;;  %v1002_v45 = vrot.slane %v1000_v15, 5  ;;  %771 = vst [vmem:[#allocation2 + $0xa4] sm:$0x1] %v770_v22 }
  0xb8   : > { %v445_v21 = vshrl.u32 %v226_v1, 16  ;;  %v348_v26 = vld [vmem:[#allocation2 + $0xb0] sm:$0x1]  ;;  %v1171_v27 = vsel %vm7395_vm9, %v1166_v18, %v1170_v56  ;;  %v448_v31 = vshll.u32 %v226_v1, 16  ;;  %v453_v32 = vshrl.u32 %v227_v17, 16 }
  0xb9   : > { %v997_v28 = vor.u32 %v996_v20, %v992_v19  ;;  %v5912_v29 = vcombine.low %v1161_v11, %v1171_v27  ;;  %v987_v33 = vor.u32 %v986_v25, %v983_v24  ;;  %v456_v38 = vshll.u32 %v227_v17, 16  ;;  %v716_v41 = vld [vmem:[#allocation2 + $0x48] sm:$0xf]  ;;  %v242_v52 = vld [vmem:[%s7360_s4 + $0x68] sm:$0xf] }
  0xba   : > { %v447_v34 = vrot.slane %v445_v21, 7  ;;  %v455_v40 = vrot.slane %v453_v32, 7  ;;  %v299_v42 = vsel %vm7372_vm5, 0, %v298_v23  ;;  %v349_v46 = vsel %vm7381_vm8, 0, %v348_v26  ;;  %v243_v63 = vld [vmem:[%s7360_s4 + $0x6c] sm:$0xf] }
  0xbb   : > { %v998_v39 = vrot.slane %v997_v28, 4  ;;  %6429 = vmatprep.mubr.bf16.mxu1 %v5912_v29  ;;  %v988_v44 = vrot.slane %v987_v33, 4  ;;  %v7658_v49 = vld [vmem:[#allocation2 + $0x9c] sm:$0xf]  ;;  %300 = vst [vmem:[#allocation2 + $0xa8] sm:$0x1] %v299_v42 }
  0xbc   : > { %v450_v48 = vor.u32 %v448_v31, %v447_v34  ;;  %v451_v50 = vrot.slane %v447_v34, 4  ;;  %v720_v51 = vld [vmem:[#allocation2 + $0x50] sm:$0x1]  ;;  %350 = vst [vmem:[#allocation2 + $0xb0] sm:$0x1] %v349_v46  ;;  %v1173_v57 = vshrl.u32 %v7658_v49, 16  ;;  %v458_v1 = vor.u32 %v456_v38, %v455_v40 }
  0xbd   : > { %v1003_v54 = vsel %vm7395_vm9, %v998_v39, %v1002_v45  ;;  %v7665_v56 = vld [vmem:[#allocation2 + $0xa0] sm:$0xf]  ;;  %v1176_v61 = vshll.u32 %v7658_v49, 16  ;;  %v993_v59 = vsel %vm7395_vm9, %v988_v44, %v992_v19  ;;  %v460_v5 = vrot.slane %v455_v40, 4  ;;  %v228_v19 = vld [vmem:[%s7360_s4 + $0x30] sm:$0xf] }
  0xbe   : > { %v1182_v58 = vshll.u32 %v7665_v56, 16  ;;  %v1186_v3 = vshrl.u32 %v7665_v56, 16  ;;  %v5905_v9 = vcombine.low %v993_v59, %v1003_v54  ;;  %v7674_v55 = vld [vmem:[#allocation2 + $0xa4] sm:$0x1]  ;;  %v1175_v10 = vrot.slane %v1173_v57, 4 }
  0xbf   : > { %v1178_v11 = vrot.slane %v1176_v61, 5  ;;  %v459_v12 = vsel %vm7406_vm10, %v451_v50, %v458_v1  ;;  %v1192_v17 = vshll.u32 %v7674_v55, 16  ;;  %v717_v18 = vsel %vm7417_vm11, %v450_v48, %v716_v41  ;;  %v277_v25 = vld [vmem:[#allocation2 + $0x54] sm:$0x1]  ;;  %v327_v45 = vld [vmem:[#allocation2 + $0x5c] sm:$0x1] }
  0xc0   : > { %v1184_v13 = vrot.slane %v1182_v58, 5  ;;  %v1188_v15 = vrot.slane %v1186_v3, 4  ;;  %719 = vst [vmem:[#allocation2 + $0x4c] sm:$0xf] %v459_v12  ;;  %6414 = vmatmul.mubr.bf16.gmra.mxu0 %v5905_v9  ;;  %718 = vst [vmem:[#allocation2 + $0x48] sm:$0xf] %v717_v18  ;;  %v721_v22 = vsel %vm7372_vm5, %v460_v5, %v720_v51 }
  0xc1   : > { %v1179_v20 = vor.u32 %v1178_v11, %v1175_v10  ;;  %v581_v23 = vshrl.u32 %v242_v52, 16  ;;  %v584_v24 = vshll.u32 %v242_v52, 16  ;;  %v1194_v26 = vrot.slane %v1192_v17, 5  ;;  %722 = vst [vmem:[#allocation2 + $0x50] sm:$0x1] %v721_v22 }
  0xc2   : > { %v1189_v21 = vor.u32 %v1188_v15, %v1184_v13  ;;  %v589_v27 = vshrl.u32 %v243_v63, 16  ;;  %v592_v28 = vshll.u32 %v243_v63, 16  ;;  %v229_v31 = vld [vmem:[%s7360_s4 + $0x34] sm:$0xf]  ;;  %v772_v33 = vld [vmem:[#allocation2 + $0xa8] sm:$0xf] }
  0xc3   : > { %v1180_v32 = vrot.slane %v1179_v20, 4  ;;  %v583_v29 = vrot.slane %v581_v23, 7  ;;  %v776_v34 = vld [vmem:[#allocation2 + $0xb0] sm:$0x1]  ;;  %v278_v41 = vsel %vm7372_vm5, 0, %v277_v25  ;;  %v328_v42 = vsel %vm7381_vm8, 0, %v327_v45 }
  0xc4   : > { %v1190_v39 = vrot.slane %v1189_v21, 4  ;;  %v591_v40 = vrot.slane %v589_v27, 7  ;;  %279 = vst [vmem:[#allocation2 + $0x54] sm:$0x1] %v278_v41  ;;  %329 = vst [vmem:[#allocation2 + $0x5c] sm:$0x1] %v328_v42 }
  0xc5   : > { %v1185_v46 = vsel %vm7395_vm9, %v1180_v32, %v1184_v13  ;;  %v586_v44 = vor.u32 %v584_v24, %v583_v29  ;;  %v587_v48 = vrot.slane %v583_v29, 4  ;;  %v462_v50 = vshrl.u32 %v228_v19, 16  ;;  %v301_v61 = vld [vmem:[#allocation2 + $0xb4] sm:$0x1]  ;;  %v351_v13 = vld [vmem:[#allocation2 + $0xbc] sm:$0x1] }
  0xc6   : > { %v1195_v51 = vsel %vm7395_vm9, %v1190_v39, %v1194_v26  ;;  %v594_v52 = vor.u32 %v592_v28, %v591_v40  ;;  %v596_v54 = vrot.slane %v591_v40, 4  ;;  %v465_v57 = vshll.u32 %v228_v19, 16  ;;  %v244_v22 = vld [vmem:[%s7360_s4 + $0x70] sm:$0xf]  ;;  %v245_v21 = vld [vmem:[%s7360_s4 + $0x74] sm:$0xf] }
  0xc7   : > { %v5913_v1 = vcombine.low %v1185_v46, %v1195_v51  ;;  %v7695_v63 = vld [vmem:[#allocation2 + $0x4c] sm:$0xf]  ;;  %v773_v59 = vsel %vm7417_vm11, %v586_v44, %v772_v33  ;;  %v464_v58 = vrot.slane %v462_v50, 7  ;;  %v470_v3 = vshrl.u32 %v229_v31, 16  ;;  %v7699_v5 = vld [vmem:[#allocation2 + $0x48] sm:$0xf] }
  0xc8   : > { %v1014_v9 = vshll.u32 %v7695_v63, 16  ;;  %v1018_v10 = vshrl.u32 %v7695_v63, 16  ;;  %v595_v11 = vsel %vm7406_vm10, %v587_v48, %v594_v52  ;;  %774 = vst [vmem:[#allocation2 + $0xa8] sm:$0xf] %v773_v59  ;;  %v777_v12 = vsel %vm7372_vm5, %v596_v54, %v776_v34  ;;  %v7707_v15 = vld [vmem:[#allocation2 + $0x50] sm:$0x1] }
  0xc9   : > { %6430 = vmatmul.mubr.bf16.gmra.mxu1 %v5913_v1  ;;  %v1005_v17 = vshrl.u32 %v7699_v5, 16  ;;  %v1008_v18 = vshll.u32 %v7699_v5, 16  ;;  %775 = vst [vmem:[#allocation2 + $0xac] sm:$0xf] %v595_v11  ;;  %778 = vst [vmem:[#allocation2 + $0xb0] sm:$0x1] %v777_v12  ;;  %v467_v19 = vor.u32 %v465_v57, %v464_v58 }
  0xca   : > { %v468_v20 = vrot.slane %v464_v58, 4  ;;  %v1016_v23 = vrot.slane %v1014_v9, 5  ;;  %v1020_v24 = vrot.slane %v1018_v10, 4  ;;  %v1024_v25 = vshll.u32 %v7707_v15, 16  ;;  %v1851_v14 = vld [vmem:[#allocation2 + $0x90] sm:$0xe] }
  0xcb   : > { %v472_v45 = vrot.slane %v470_v3, 7  ;;  %v1007_v26 = vrot.slane %v1005_v17, 4  ;;  %v1010_v27 = vrot.slane %v1008_v18, 5  ;;  %v473_v28 = vshll.u32 %v229_v31, 16  ;;  %v723_v39 = vld [vmem:[#allocation2 + $0x54] sm:$0xf] }
  0xcc   : > { %v302_v32 = vsel %vm7372_vm5, 0, %v301_v61  ;;  %v1021_v29 = vor.u32 %v1020_v24, %v1016_v23  ;;  %v1026_v33 = vrot.slane %v1024_v25, 5  ;;  %v727_v40 = vld [vmem:[#allocation2 + $0x5c] sm:$0x1]  ;;  %v724_v46 = vsel %vm7417_vm11, %v467_v19, %v723_v39  ;;  %v2716_v4 = vld [vmem:[#allocation2 + $0x24] sm:$0xf] }
  0xcd   : > { %v477_v34 = vrot.slane %v472_v45, 4  ;;  %303 = vst [vmem:[#allocation2 + $0xb4] sm:$0x1] %v302_v32  ;;  %v1011_v41 = vor.u32 %v1010_v27, %v1007_v26  ;;  %v475_v42 = vor.u32 %v473_v28, %v472_v45  ;;  %v352_v44 = vsel %vm7381_vm8, 0, %v351_v13  ;;  %725 = vst [vmem:[#allocation2 + $0x54] sm:$0xf] %v724_v46 }
  0xce   : > { %v1022_v48 = vrot.slane %v1021_v29, 4  ;;  %353 = vst [vmem:[#allocation2 + $0xbc] sm:$0x1] %v352_v44  ;;  %v598_v50 = vshrl.u32 %v244_v22, 16  ;;  %v601_v51 = vshll.u32 %v244_v22, 16  ;;  %v606_v61 = vshrl.u32 %v245_v21, 16 }
  0xcf   : > { %v728_v31 = vsel %vm7372_vm5, %v477_v34, %v727_v40  ;;  %v1012_v52 = vrot.slane %v1011_v41, 4  ;;  %v7722_v54 = vld [vmem:[#allocation2 + $0xa8] sm:$0xf]  ;;  %v476_v57 = vsel %vm7406_vm10, %v468_v20, %v475_v42  ;;  %v609_v1 = vshll.u32 %v245_v21, 16 }
  0xd0   : > { %729 = vst [vmem:[#allocation2 + $0x5c] sm:$0x1] %v728_v31  ;;  %v1027_v59 = vsel %vm7395_vm9, %v1022_v48, %v1026_v33  ;;  %v7728_v58 = vld [vmem:[#allocation2 + $0xac] sm:$0xf]  ;;  %v7730_v3 = vld [vmem:[#allocation2 + $0xb0] sm:$0x1] }
  0xd1   : > { %v1197_v9 = vshrl.u32 %v7722_v54, 16  ;;  %v1200_v10 = vshll.u32 %v7722_v54, 16  ;;  %726 = vst [vmem:[#allocation2 + $0x58] sm:$0xf] %v476_v57  ;;  %v1017_v11 = vsel %vm7395_vm9, %v1012_v52, %v1016_v23  ;;  %v1206_v12 = vshll.u32 %v7728_v58, 16 }
  0xd2   : > { %v1210_v13 = vshrl.u32 %v7728_v58, 16  ;;  %v1216_v17 = vshll.u32 %v7730_v3, 16  ;;  %v5906_v18 = vcombine.low %v1017_v11, %v1027_v59  ;;  %v600_v22 = vrot.slane %v598_v50, 7  ;;  %v1839_v23 = vld [vmem:[#allocation2] sm:$0xe] }
  0xd3   : > { %v1199_v19 = vrot.slane %v1197_v9, 4  ;;  %v1202_v20 = vrot.slane %v1200_v10, 5  ;;  %v1208_v24 = vrot.slane %v1206_v12, 5  ;;  %v608_v21 = vrot.slane %v606_v61, 7  ;;  %v1840_v61 = vld [vmem:[#allocation2 + $0xc] sm:$0xe] }
  0xd4   : > { %v1212_v25 = vrot.slane %v1210_v13, 4  ;;  %v1218_v45 = vrot.slane %v1216_v17, 5  ;;  %v779_v26 = vld [vmem:[#allocation2 + $0xb4] sm:$0xf]  ;;  %6417 = vmatprep.mubr.bf16.mxu0 %v5906_v18  ;;  %v603_v28 = vor.u32 %v601_v51, %v600_v22  ;;  %v604_v32 = vrot.slane %v600_v22, 4 }
  0xd5   : > { %v1203_v27 = vor.u32 %v1202_v20, %v1199_v19  ;;  %vm1887_vm12 = vcmask 1042432   ;;  %v7739_v33 = vld [vmem:[#allocation2 + $0x54] sm:$0xf]  ;;  %v611_v34 = vor.u32 %v609_v1, %v608_v21  ;;  %v613_v39 = vrot.slane %v608_v21, 4  ;;  %v783_v40 = vld [vmem:[#allocation2 + $0xbc] sm:$0x1] }
  0xd6   : > { %v1213_v29 = vor.u32 %v1212_v25, %v1208_v24  ;;  %vm1888_vm13 = vcmask 1046532   ;;  %v1029_v46 = vshrl.u32 %v7739_v33, 16  ;;  %v1032_v44 = vshll.u32 %v7739_v33, 16  ;;  %v1841_v17 = vld [vmem:[#allocation2 + $0x18] sm:$0xe] }
  0xd7   : > { %v1204_v41 = vrot.slane %v1203_v27, 4  ;;  %v7741_v42 = vld [vmem:[#allocation2 + $0x5c] sm:$0x1]  ;;  %v780_v48 = vsel %vm7417_vm11, %v603_v28, %v779_v26  ;;  %v612_v52 = vsel %vm7406_vm10, %v604_v32, %v611_v34  ;;  %v784_v57 = vsel %vm7372_vm5, %v613_v39, %v783_v40  ;;  %v7760_v22 = vld [vmem:[#allocation2 + $0x4] sm:$0xf]  ;;  %vm7765_vm14 = vmor %vm1887_vm12, %vm1888_vm13 }
  0xd8   : > { %v1214_v31 = vrot.slane %v1213_v29, 4  ;;  %v7747_v50 = vld [vmem:[#allocation2 + $0x58] sm:$0xf]  ;;  %v1048_v51 = vshll.u32 %v7741_v42, 16  ;;  %781 = vst [vmem:[#allocation2 + $0xb4] sm:$0xf] %v780_v48 }
  0xd9   : > { %v1209_v1 = vsel %vm7395_vm9, %v1204_v41, %v1208_v24  ;;  %v1031_v59 = vrot.slane %v1029_v46, 4  ;;  %v1034_v9 = vrot.slane %v1032_v44, 5  ;;  %v1038_v10 = vshll.u32 %v7747_v50, 16  ;;  %782 = vst [vmem:[#allocation2 + $0xb8] sm:$0xf] %v612_v52 }
  0xda   : > { %785 = vst [vmem:[#allocation2 + $0xbc] sm:$0x1] %v784_v57  ;;  %v1219_v11 = vsel %vm7395_vm9, %v1214_v31, %v1218_v45  ;;  %v1042_v12 = vshrl.u32 %v7747_v50, 16  ;;  %v5948_v13 = vrot.slane %v1839_v23, 9  ;;  %v1892_v24 = vrot.slane %v7760_v22, 5 }
  0xdb   : > { %v5914_v18 = vcombine.low %v1209_v1, %v1219_v11  ;;  %v1035_v19 = vor.u32 %v1034_v9, %v1031_v59  ;;  %v1040_v20 = vrot.slane %v1038_v10, 5  ;;  %v7025_v25 = vld [vmem:[#allocation2 + $0x14] sm:$0x1]  ;;  %v1050_v27 = vrot.slane %v1048_v51, 5  ;;  %v7769_v45 = vld [vmem:[#allocation2 + $0x10] sm:$0xf] }
  0xdc   : > { %v1902_v21 = vrot.slane %v7025_v25, 5  ;;  %v1044_v26 = vrot.slane %v1042_v12, 4  ;;  %v10002_v28 = vmov 0  ;;  %v1899_v32 = vrot.slane %v7769_v45, 5  ;;  %v7772_v39 = vld [vmem:[#allocation2 + $0x1c] sm:$0xf] }
  0xdd   : > { %v10003_v28 = vsel %vm7765_vm14, 4294967295, %v10002_v28  ;;  %6433 = vmatprep.mubr.bf16.mxu1 %v5914_v18  ;;  %v1036_v23 = vrot.slane %v1035_v19, 4  ;;  %v1894_v29 = vrot.slane %v1892_v24, 4  ;;  %v5949_v34 = vrot.slane %v1840_v61, 9  ;;  %v7028_v57 = vld [vmem:[#allocation2 + $0x20] sm:$0x1] }
  0xde   : > { %10004 = vst [vmem:[#allocation19_spill] sm:$0xff] %v10003_v28  ;;  %v1906_v40 = vrot.slane %v7772_v39, 5  ;;  %v1045_v41 = vor.u32 %v1044_v26, %v1040_v20  ;;  %v1901_v46 = vrot.slane %v1899_v32, 4  ;;  %v5950_v44 = vrot.slane %v1841_v17, 9 }
  0xdf   : > { %v7775_v48 = vld [vmem:[#allocation2 + $0xb4] sm:$0xf]  ;;  %v1893_v31 = vsel %vm7765_vm14, %v5948_v13, %v1892_v24  ;;  %v1896_v51 = vsel %vm7765_vm14, %v1894_v29, %v1895_v16  ;;  %v1909_v61 = vrot.slane %v7028_v57, 5  ;;  %v1041_v1 = vsel %vm7395_vm9, %v1036_v23, %v1040_v20  ;;  %v1843_v20 = vld [vmem:[#allocation2 + $0x30] sm:$0xe] }
  0xe0   : > { %10005 = vst [vmem:[#allocation20_spill] sm:$0xff] %v7775_v48  ;;  %v1908_v52 = vrot.slane %v1906_v40, 4  ;;  %v1046_v59 = vrot.slane %v1045_v41, 4  ;;  %v7785_v9 = vld [vmem:[#allocation2 + $0xb8] sm:$0xf]  ;;  %v1221_v11 = vshrl.u32 %v7775_v48, 16  ;;  %v5964_v19 = vcombine.low %v1893_v31, %v1896_v51 }
  0xe1   : > { %10006 = vst [vmem:[#allocation21_spill] sm:$0xff] %v7785_v9  ;;  %v7787_v10 = vld [vmem:[#allocation2 + $0xbc] sm:$0x1]  ;;  %v1224_v12 = vshll.u32 %v7775_v48, 16  ;;  %v1230_v8 = vshll.u32 %v7785_v9, 16  ;;  %v1234_v13 = vshrl.u32 %v7785_v9, 16  ;;  %v1900_v29 = vsel %vm7765_vm14, %v5949_v34, %v1899_v32 }
  0xe2   : > { %v1240_v16 = vshll.u32 %v7787_v10, 16  ;;  %v1051_v17 = vsel %vm7395_vm9, %v1046_v59, %v1050_v27  ;;  %v1223_v18 = vrot.slane %v1221_v11, 4  ;;  %v1903_v41 = vsel %vm7765_vm14, %v1901_v46, %v1902_v21  ;;  %v1842_v59 = vld [vmem:[#allocation2 + $0x24] sm:$0xe]  ;;  %v7804_v11 = vld [vmem:[#allocation2 + $0x28] sm:$0xf] }
  0xe3   : > { %v5907_v24 = vcombine.low %v1041_v1, %v1051_v17  ;;  %v1226_v25 = vrot.slane %v1224_v12, 5  ;;  %v1232_v26 = vrot.slane %v1230_v8, 5  ;;  %v1236_v23 = vrot.slane %v1234_v13, 4 }
  0xe4   : > { %v1907_v57 = vsel %vm7765_vm14, %v5950_v44, %v1906_v40  ;;  %v1910_v38 = vsel %vm7765_vm14, %v1908_v52, %v1909_v61  ;;  %v1242_v51 = vrot.slane %v1240_v16, 5  ;;  %v5952_v1 = vrot.slane %v1843_v20, 9  ;;  %v7030_v44 = vld [vmem:[#allocation2] sm:$0xf] }
  0xe5   : > { %6418 = vmatmul.mubr.bf16.gmra.mxu0 %v5907_v24  ;;  %v1227_v27 = vor.u32 %v1226_v25, %v1223_v18  ;;  %v1237_v31 = vor.u32 %v1236_v23, %v1232_v26  ;;  %v1913_v32 = vrot.slane %v7804_v11, 5  ;;  %v1920_v34 = vrot.slane %v7600_v62, 5  ;;  %v6935_v23 = vld [vmem:[#allocation6 + $0x130] sm:$0xff]  }
  0xe6   : > { %6501 = vmatprep.mubr.bf16.mxu0 %v5964_v19  ;;  %v1923_v21 = vrot.slane %v7602_v0, 5  ;;  %v5924_v52 = vcombine.low %v7030_v44, %v7760_v22  ;;  %v5965_v61 = vcombine.low %v1900_v29, %v1903_v41  ;;  %v5966_v12 = vcombine.low %v1907_v57, %v1910_v38  ;;  %v7031_v0 = vld [vmem:[#allocation2 + $0x2c] sm:$0x1]  ;;  %v1844_v38 = vld [vmem:[#allocation2 + $0x3c] sm:$0xe] }
  0xe7   : > { %v1228_v46 = vrot.slane %v1227_v27, 4  ;;  %v1238_v40 = vrot.slane %v1237_v31, 4  ;;  %v7812_v8 = vsel %vm7765_vm14, %v5952_v1, %v1920_v34  ;;  %v1922_v13 = vrot.slane %v1920_v34, 4  ;;  %v7826_v41 = vld [vmem:[#allocation2 + $0x68] sm:$0x1] }
  0xe8   : > { %v5951_v18 = vrot.slane %v1842_v59, 9  ;;  %v1916_v19 = vrot.slane %v7031_v0, 5  ;;  %v1915_v24 = vrot.slane %v1913_v32, 4  ;;  %v1927_v25 = vrot.slane %v7630_v2, 5  ;;  %v1845_v27 = vld [vmem:[#allocation2 + $0x48] sm:$0xe] }
  0xe9   : > { %v1233_v16 = vsel %vm7395_vm9, %v1228_v46, %v1232_v26  ;;  %v1243_v17 = vsel %vm7395_vm9, %v1238_v40, %v1242_v51  ;;  %v7820_v22 = vsel %vm7765_vm14, %v1922_v13, %v1923_v21  ;;  %v1934_v26 = vrot.slane %v7695_v63, 5  ;;  %v7033_v51 = vld [vmem:[#allocation2 + $0xc] sm:$0xf]  ;;  %v1846_v34 = vld [vmem:[#allocation2 + $0x54] sm:$0xe] }
  0xea   : > { %v5915_v20 = vcombine.low %v1233_v16, %v1243_v17  ;;  %v1941_v31 = vrot.slane %v7747_v50, 5  ;;  %v5925_v1 = vcombine.low %v7033_v51, %v7769_v45  ;;  %v1914_v59 = vsel %vm7765_vm14, %v5951_v18, %v1913_v32  ;;  %v7034_v13 = vld [vmem:[#allocation2 + $0x18] sm:$0xf]  ;;  %v6939_v45 = vld [vmem:[#allocation6 + $0x128] sm:$0xff]   ;;  %v1852_v57 = vld [vmem:[#allocation2 + $0x9c] sm:$0xe] }
  0xeb   : > { %v1917_v21 = vsel %vm7765_vm14, %v1915_v24, %v1916_v19  ;;  %v5953_v46 = vrot.slane %v1844_v38, 9  ;;  %v1929_v40 = vrot.slane %v1927_v25, 4  ;;  %v1930_v44 = vrot.slane %v7638_v7, 5  ;;  %v1847_v17 = vld [vmem:[#allocation2 + $0x60] sm:$0xe] }
  0xec   : > { %6434 = vmatmul.mubr.bf16.gmra.mxu1 %v5915_v20  ;;  %v1936_v16 = vrot.slane %v1934_v26, 4  ;;  %v1937_v32 = vrot.slane %v7707_v15, 5  ;;  %v7839_v18 = vld [vmem:[#allocation2 + $0x24] sm:$0xf]  ;;  %v1943_v0 = vrot.slane %v1941_v31, 4  ;;  %v1944_v19 = vrot.slane %v7741_v42, 5 }
  0xed   : > { %6453 = vmatprep.mubr.bf16.mxu1 %v5924_v52  ;;  %6502 = vmatmul.mubr.bf16.vlgmr.msra.gmra.mxu0 %v5965_v61  ;;  %v5926_v52 = vcombine.low %v7034_v13, %v7772_v39  ;;  %v5954_v61 = vrot.slane %v1845_v27, 9  ;;  %v5967_v7 = vcombine.low %v1914_v59, %v1917_v21  ;;  %v6934_v20 = vld [vmem:[#allocation6 + $0xf0] sm:$0xff]   ;;  %v7844_v24 = vld [vmem:[#allocation2 + $0x64] sm:$0xf]  ;;  %v7846_v39 = vld [vmem:[#allocation2 + $0x60] sm:$0xf]  ;;  %v7864_v21 = vsel %vm7765_vm14, %v5953_v46, %v1927_v25 }
  0xee   : > { %6582 = vmatpush3.bf16.msra.mxu0 %v7557_v36  ;;  %6505 = vmatprep.mubr.bf16.mxu0 %v5966_v12  ;;  %v5955_v12 = vrot.slane %v1846_v34, 9  ;;  %v7850_v15 = vld [vmem:[#allocation2 + $0x70] sm:$0xf]  ;;  %v7852_v27 = vld [vmem:[#allocation2 + $0x6c] sm:$0xf]  ;;  %v7868_v38 = vsel %vm7765_vm14, %v1929_v40, %v1930_v44  ;;  %v5956_v53 = vrot.slane %v1847_v17, 9  ;;  %v7881_v25 = vsel %vm7765_vm14, %v1936_v16, %v1937_v32 }
  0xef   : > { %6583 = vmatprep.subr.bf16.mxu0 %v6935_v23  ;;  %v1848_v34 = vld [vmem:[#allocation2 + $0x6c] sm:$0xe]  ;;  %v7856_v13 = vld [vmem:[#allocation2 + $0x7c] sm:$0xf]  ;;  %v7858_v42 = vld [vmem:[#allocation2 + $0x78] sm:$0xf]  ;;  %v7890_v17 = vsel %vm7765_vm14, %v1943_v0, %v1944_v19 }
  0xf0   : > { %v1948_v51 = vrot.slane %v7844_v24, 5  ;;  %v7871_v36 = vld [vmem:[#allocation2 + $0x78] sm:$0xe]  ;;  %v1955_v46 = vrot.slane %v7850_v15, 5  ;;  %v1853_v40 = vld [vmem:[#allocation2 + $0xa8] sm:$0xe]  ;;  %v7886_v44 = vsel %vm7765_vm14, %v5955_v12, %v1941_v31  ;;  %v5969_v31 = vcombine.low %v7864_v21, %v7868_v38 }
  0xf1   : > { %v6943_v59 = vld [vmem:[#allocation6 + $0x120] sm:$0xff]   ;;  %v5957_v29 = vrot.slane %v1848_v34, 9  ;;  %v7044_v32 = vld [vmem:[#allocation6 + $0xf8] sm:$0xff]   ;;  %v5958_v19 = vrot.slane %v7871_v36, 9  ;;  %v6938_v34 = vld [vmem:[#allocation6 + $0xe8] sm:$0xff]   ;;  %v10007_v21 = vcombine.low %v7812_v8, %v7820_v22  ;;  %v1986_v38 = vrot.slane %v7674_v55, 5 }
  0xf2   : > { %6584 = vmatpush3.bf16.msra.mxu0 %v6935_v23  ;;  %v7877_v23 = vsel %vm7765_vm14, %v5954_v61, %v1934_v26  ;;  %v7892_v26 = vld [vmem:[#allocation2 + $0x84] sm:$0xf]  ;;  %v7894_v61 = vld [vmem:[#allocation2 + $0x88] sm:$0xf]  ;;  %v7045_v12 = vld [vmem:[#allocation2 + $0x74] sm:$0x1] }
  0xf3   : > { %6585 = vmatprep.subr.bf16.mxu0 %v6939_v45  ;;  %v1958_v0 = vrot.slane %v7045_v12, 5  ;;  %v5970_v60 = vcombine.low %v7877_v23, %v7881_v25  ;;  %v1962_v12 = vrot.slane %v7856_v13, 5  ;;  %v7917_v23 = vld [vmem:[#allocation2 + $0x84] sm:$0xe]  ;;  %v5961_v25 = vrot.slane %v1852_v57, 9 }
  0xf4   : > { %6454 = vmatmul.mubr.bf16.vlgmr.msra.gmra.mxu1 %v5925_v1  ;;  %v5962_v22 = vrot.slane %v1853_v40, 9  ;;  %v1993_v16 = vrot.slane %v7730_v3, 5  ;;  %v6942_v1 = vld [vmem:[#allocation6 + $0xe0] sm:$0xff]   ;;  %v10008_v55 = vrot.slane %v7826_v41, 5  ;;  %v2710_v36 = vld [vmem:[#allocation2 + $0xc] sm:$0xf] }
  0xf5   : > { %6534 = vmatpush3.bf16.msra.mxu1 %v7044_v32  ;;  %6457 = vmatprep.mubr.bf16.mxu1 %v5926_v52  ;;  %v7907_v32 = vsel %vm7765_vm14, %v5956_v53, %v1948_v51  ;;  %v1950_v52 = vrot.slane %v1948_v51, 4  ;;  %v6947_v53 = vld [vmem:[#allocation6 + $0x118] sm:$0xff]   ;;  %v1983_v51 = vrot.slane %v7665_v56, 5  ;;  %v5959_v3 = vrot.slane %v7917_v23, 9 }
  0xf6   : > { %6506 = vmatmul.mubr.bf16.gmra.mxu0 %v5967_v7  ;;  %6535 = vmatprep.subr.bf16.mxu1 %v6934_v20  ;;  %v1957_v7 = vrot.slane %v1955_v46, 4  ;;  %v1969_v57 = vrot.slane %v7894_v61, 5  ;;  %v1964_v23 = vrot.slane %v1962_v12, 4 }
  0xf7   : > { %6509 = vmatprep.mubr.bf16.mxu0 %v10007_v21  ;;  %6586 = vmatpush3.bf16.msra.mxu0 %v6939_v45  ;;  %v7925_v45 = vsel %vm7765_vm14, %v5957_v29, %v1955_v46  ;;  %v1990_v21 = vrot.slane %v7728_v58, 5  ;;  %v7935_v8 = vsel %vm7765_vm14, %v1950_v52, %v10008_v55  ;;  %v7939_v29 = vsel %vm7765_vm14, %v5961_v25, %v1983_v51 }
  0xf8   : > { %6587 = vmatprep.subr.bf16.mxu0 %v6943_v59  ;;  %v1985_v46 = vrot.slane %v1983_v51, 4  ;;  %v10009_v55 = vcombine.low %v7839_v18, %v7804_v11  ;;  %v7952_v25 = vsel %vm7765_vm14, %v1957_v7, %v1958_v0  ;;  %v1976_v51 = vrot.slane %v7618_v30, 5  ;;  %v6955_v11 = vld [vmem:[#allocation6 + $0x108] sm:$0xff]  }
  0xf9   : > { %6536 = vmatpush3.bf16.msra.mxu1 %v6934_v20  ;;  %v7046_v20 = vld [vmem:[#allocation2 + $0x80] sm:$0x1]  ;;  %v7945_v41 = vsel %vm7765_vm14, %v5962_v22, %v1990_v21  ;;  %v1992_v52 = vrot.slane %v1990_v21, 4  ;;  %v7959_v22 = vld [vmem:[#allocation2 + $0x10] sm:$0xf]  ;;  %v10011_v21 = vcombine.low %v7589_v43, %v7600_v62  ;;  %v2759_v0 = vshrl.u32 %v2710_v36, 16 }
  0xfa   : > { %6537 = vmatprep.subr.bf16.mxu1 %v6938_v34  ;;  %v1965_v40 = vrot.slane %v7046_v20, 5  ;;  %v7957_v20 = vsel %vm7765_vm14, %v1985_v46, %v1986_v38  ;;  %10010 = vst [vmem:[#allocation22_spill] sm:$0xff] %v7959_v22  ;;  %v2762_v30 = vshll.u32 %v2710_v36, 16  ;;  %v7974_v7 = vsel %vm7765_vm14, %v5958_v19, %v1962_v12  ;;  %v2713_v62 = vld [vmem:[#allocation2 + $0x18] sm:$0xf]  ;;  %v6950_v19 = vld [vmem:[#allocation6 + $0xd0] sm:$0xff]  }
  0xfb   : > { %6588 = vmatpush3.bf16.msra.mxu0 %v6943_v59  ;;  %v6946_v59 = vld [vmem:[#allocation6 + $0xd8] sm:$0xff]   ;;  %v7968_v18 = vsel %vm7765_vm14, %v1992_v52, %v1993_v16  ;;  %v1971_v16 = vrot.slane %v1969_v57, 4  ;;  %v7047_v46 = vld [vmem:[#allocation2 + $0x8c] sm:$0x1]  ;;  %v2772_v52 = vshrl.u32 %v7959_v22, 16  ;;  %v5960_v12 = vrot.slane %v1851_v14, 9 }
  0xfc   : > { %6458 = vmatmul.mubr.bf16.gmra.mxu1 %v10009_v55  ;;  %6589 = vmatprep.subr.bf16.mxu0 %v6947_v53  ;;  %v1972_v36 = vrot.slane %v7047_v46, 5  ;;  %v1979_v43 = vrot.slane %v7620_v37, 5  ;;  %v1854_v38 = vld [vmem:[#allocation2 + $0xb4] sm:$0xe]  ;;  %v7993_v46 = vld [vmem:[#allocation2 + $0x14] sm:$0x1] }
  0xfd   : > { %6461 = vmatprep.mubr.bf16.mxu1 %v10011_v21  ;;  %6538 = vmatpush3.bf16.msra.mxu1 %v6938_v34  ;;  %v7978_v34 = vld [vmem:[#allocation2 + $0x1c] sm:$0xf]  ;;  %v1978_v21 = vrot.slane %v1976_v51, 4  ;;  %v2761_v55 = vrot.slane %v2759_v0, 4  ;;  %v2783_v14 = vshrl.u32 %v2713_v62, 16  ;;  %v2786_v48 = vshll.u32 %v2713_v62, 16 }
  0xfe   : > { %6510 = vmatmul.mubr.bf16.gmra.mxu0 %v5969_v31  ;;  %6539 = vmatprep.subr.bf16.mxu1 %v6942_v1  ;;  %10012 = vst [vmem:[#allocation23_spill] sm:$0xff] %v7978_v34  ;;  %v2768_v31 = vshll.u32 %v7959_v22, 16  ;;  %v2764_v22 = vrot.slane %v2762_v30, 5  ;;  %v2792_v37 = vshll.u32 %v7978_v34, 16  ;;  %v2774_v30 = vrot.slane %v2772_v52, 4 }
  0xff   : > { %6513 = vmatprep.mubr.bf16.mxu0 %v5970_v60  ;;  %6590 = vmatpush3.bf16.msra.mxu0 %v6947_v53  ;;  %v7987_v60 = vsel %vm7765_vm14, %v1964_v23, %v1965_v40  ;;  %v7991_v53 = vsel %vm7765_vm14, %v5959_v3, %v1969_v57  ;;  %v7999_v40 = vsel %vm7765_vm14, %v1971_v16, %v1972_v36  ;;  %v8001_v23 = vld [vmem:[#allocation2 + $0x90] sm:$0xf]  ;;  %v8003_v57 = vld [vmem:[#allocation2 + $0x94] sm:$0xf]  ;;  %v5963_v16 = vrot.slane %v1854_v38, 9  ;;  %v6959_v3 = vld [vmem:[#allocation6 + $0x100] sm:$0xff]  }
 0x100   : > { %6591 = vmatprep.subr.bf16.mxu0 %v6951_v47  ;;  %v8007_v0 = vrot.slane %v2768_v31, 5  ;;  %v10013_v62 = vcombine.low %v7636_v6, %v7630_v2  ;;  %v1997_v36 = vrot.slane %v7785_v9, 5  ;;  %v10014_v31 = vcombine.low %v7699_v5, %v7695_v63  ;;  %v6954_v2 = vld [vmem:[#allocation6 + $0xc8] sm:$0xff]  }
 0x101   : > { %6540 = vmatpush3.bf16.msra.mxu1 %v6942_v1  ;;  %v2796_v1 = vshrl.u32 %v7978_v34, 16  ;;  %v8014_v34 = vsel %vm7765_vm14, %v5960_v12, %v1976_v51  ;;  %v2765_v6 = vor.u32 %v2764_v22, %v2761_v55  ;;  %v2778_v52 = vshll.u32 %v7993_v46, 16  ;;  %v8025_v51 = vld [vmem:[#allocation2 + $0x20] sm:$0x1]  ;;  %v8027_v12 = vld [vmem:[#allocation2 + $0x28] sm:$0xf] }
 0x102   : > { %6541 = vmatprep.subr.bf16.mxu1 %v6946_v59  ;;  %10015 = vst [vmem:[#allocation24_spill] sm:$0xff] %v8027_v12  ;;  %v10016_v38 = vcombine.low %v7886_v44, %v7890_v17  ;;  %v2788_v9 = vrot.slane %v2786_v48, 5  ;;  %v8032_v63 = vrot.slane %v2792_v37, 5  ;;  %v2718_v22 = vld [vmem:[#allocation2 + $0x2c] sm:$0x1]  ;;  %v2775_v48 = vor.u32 %v2774_v30, %v8007_v0  ;;  %v6958_v30 = vld [vmem:[#allocation6 + $0xc0] sm:$0xff]  }
 0x103   : > { %6592 = vmatpush3.bf16.msra.mxu0 %v6951_v47  ;;  %v8018_v47 = vsel %vm7765_vm14, %v1978_v21, %v1979_v43  ;;  %v2807_v43 = vshrl.u32 %v2716_v4, 16  ;;  %v2810_v21 = vshll.u32 %v2716_v4, 16  ;;  %v2798_v5 = vrot.slane %v2796_v1, 4  ;;  %v2719_v55 = vld [vmem:[#allocation2 + $0x30] sm:$0xf] }
 0x104   : > { %6462 = vmatmul.mubr.bf16.gmra.mxu1 %v10013_v62  ;;  %6593 = vmatprep.subr.bf16.mxu0 %v6955_v11  ;;  %v2785_v62 = vrot.slane %v2783_v14, 4  ;;  %v5974_v4 = vcombine.low %v7974_v7, %v7987_v60  ;;  %v8044_v17 = vld [vmem:[#allocation2 + $0x34] sm:$0xf]  ;;  %v8050_v37 = vsel %vm7765_vm14, %v5963_v16, %v1997_v36  ;;  %v8053_v7 = vrot.slane %v2765_v6, 4  ;;  %v8063_v44 = vld [vmem:[#allocation2 + $0x40] sm:$0xf] }
 0x105   : > { %6465 = vmatprep.mubr.bf16.mxu1 %v10014_v31  ;;  %6542 = vmatpush3.bf16.msra.mxu1 %v6946_v59  ;;  %v8034_v59 = vld [vmem:[#allocation6 + $0x1b8] sm:$0xff]   ;;  %v10017_v31 = vcombine.low %v7907_v32, %v7935_v8  ;;  %10018 = vst [vmem:[#allocation25_spill] sm:$0xff] %v8044_v17  ;;  %v1999_v32 = vrot.slane %v1997_v36, 4  ;;  %v2000_v8 = vrot.slane %v7787_v10, 5  ;;  %v8055_v60 = vrot.slane %v2778_v52, 5  ;;  %10019 = vst [vmem:[#allocation26_spill] sm:$0xff] %v8063_v44 }
 0x106   : > { %6514 = vmatmul.mubr.bf16.gmra.mxu0 %v10016_v38  ;;  %6543 = vmatprep.subr.bf16.mxu1 %v6950_v19  ;;  %v2812_v1 = vrot.slane %v2810_v21, 5  ;;  %v2789_v38 = vor.u32 %v2788_v9, %v2785_v62  ;;  %v2802_v14 = vshll.u32 %v8025_v51, 16  ;;  %v2816_v16 = vshll.u32 %v8027_v12, 16  ;;  %v2722_v36 = vld [vmem:[#allocation2 + $0x3c] sm:$0xf]  ;;  %v8072_v21 = vld [vmem:[#allocation6 + $0x178] sm:$0xff]  }
 0x107   : > { %6517 = vmatprep.mubr.bf16.mxu0 %v10017_v31  ;;  %6594 = vmatpush3.bf16.msra.mxu0 %v6955_v11  ;;  %v2809_v11 = vrot.slane %v2807_v43, 4  ;;  %v2799_v31 = vor.u32 %v2798_v5, %v8032_v63  ;;  %v8060_v10 = vrot.slane %v2775_v48, 4  ;;  %v2826_v6 = vshll.u32 %v2718_v22, 16 }
 0x108   : > { %6595 = vmatprep.subr.bf16.mxu0 %v6959_v3  ;;  %v2831_v52 = vshrl.u32 %v2719_v55, 16  ;;  %v10020_v43 = vcombine.low %v7739_v33, %v7747_v50  ;;  %v8070_v9 = vsel %vm7765_vm14, %v1999_v32, %v2000_v8  ;;  %v2840_v62 = vshll.u32 %v8044_v17, 16  ;;  %v2725_v8 = vld [vmem:[#allocation2 + $0x48] sm:$0xf]  ;;  %v8110_v33 = vld [vmem:[#allocation2 + $0x58] sm:$0xf] }
 0x109   : > { %6544 = vmatpush3.bf16.msra.mxu1 %v6950_v19  ;;  %v2820_v19 = vshrl.u32 %v8027_v12, 16  ;;  %v2844_v5 = vshrl.u32 %v8044_v17, 16  ;;  %v10021_v22 = vcombine.low %v7846_v39, %v7844_v24  ;;  %v2813_v50 = vor.u32 %v2812_v1, %v2809_v11 }
 0x10a   : > { %6545 = vmatprep.subr.bf16.mxu1 %v6954_v2  ;;  %v2855_v48 = vshrl.u32 %v2722_v36, 16  ;;  %v2858_v32 = vshll.u32 %v2722_v36, 16  ;;  %v8089_v12 = vrot.slane %v2799_v31, 4  ;;  %v8091_v24 = vrot.slane %v2802_v14, 5  ;;  %v8107_v36 = vld [vmem:[#allocation2 + $0x44] sm:$0x1] }
 0x10b   : > { %6596 = vmatpush3.bf16.msra.mxu0 %v6959_v3  ;;  %v2834_v3 = vshll.u32 %v2719_v55, 16  ;;  %v10022_v55 = vcombine.low %v7925_v45, %v7952_v25  ;;  %v8093_v39 = vrot.slane %v2816_v16, 5  ;;  %v2822_v25 = vrot.slane %v2820_v19, 4  ;;  %10025 = vst [vmem:[#allocation29_spill] sm:$0xff] %v8107_v36 }
 0x10c   : > { %6466 = vmatmul.mubr.bf16.gmra.mxu1 %v10020_v43  ;;  %6677 = vmatprep.subr.bf16.mxu0 %v8034_v59  ;;  %v8087_v43 = vrot.slane %v2789_v38, 4  ;;  %v8103_v11 = vrot.slane %v2826_v6, 5  ;;  %v2833_v1 = vrot.slane %v2831_v52, 4  ;;  %v2728_v38 = vld [vmem:[#allocation2 + $0x54] sm:$0xf]  ;;  %v8105_v14 = vrot.slane %v2840_v62, 5 }
 0x10d   : > { %6469 = vmatprep.mubr.bf16.mxu1 %v10021_v22  ;;  %6546 = vmatpush3.bf16.msra.mxu1 %v6954_v2  ;;  %v8095_v2 = vld [vmem:[#allocation2 + $0x38] sm:$0x1]  ;;  %v8097_v22 = vld [vmem:[#allocation2 + $0x4c] sm:$0xf]  ;;  %v2836_v31 = vrot.slane %v2834_v3, 5  ;;  %v2846_v16 = vrot.slane %v2844_v5, 4  ;;  %v2805_v52 = vsel %vm7395_vm9, %v8089_v12, %v8091_v24  ;;  %v2823_v62 = vor.u32 %v2822_v25, %v8093_v39 }
 0x10e   : > { %6518 = vmatmul.mubr.bf16.gmra.mxu0 %v10022_v55  ;;  %6547 = vmatprep.subr.bf16.mxu1 %v6958_v30  ;;  %10023 = vst [vmem:[#allocation27_spill] sm:$0xff] %v8095_v2  ;;  %10024 = vst [vmem:[#allocation28_spill] sm:$0xff] %v8097_v22  ;;  %v2864_v55 = vshll.u32 %v8063_v44, 16  ;;  %v2857_v28 = vrot.slane %v2855_v48, 4  ;;  %v2860_v45 = vrot.slane %v2858_v32, 5  ;;  %v2868_v19 = vshrl.u32 %v8063_v44, 16 }
 0x10f   : > { %6521 = vmatprep.mubr.bf16.mxu0 %v5974_v4  ;;  %v8112_v4 = vrot.slane %v2813_v50, 4  ;;  %v2795_v6 = vsel %vm7395_vm9, %v8087_v43, %v8032_v63  ;;  %v2879_v3 = vshrl.u32 %v2725_v8, 16  ;;  %v2850_v5 = vshll.u32 %v8095_v2, 16  ;;  %v8138_v2 = vld [vmem:[#allocation2 + $0x50] sm:$0x1] }
 0x110   : > { %v2888_v50 = vshll.u32 %v8097_v22, 16  ;;  %v2892_v48 = vshrl.u32 %v8097_v22, 16  ;;  %v10026_v63 = vcombine.low %v7852_v27, %v7850_v15  ;;  %v2837_v32 = vor.u32 %v2836_v31, %v2833_v1  ;;  %v2731_v15 = vld [vmem:[#allocation2 + $0x60] sm:$0xf] }
 0x111   : > { %6548 = vmatpush3.bf16.msra.mxu1 %v6958_v30  ;;  %v2882_v30 = vshll.u32 %v2725_v8, 16  ;;  %v2847_v43 = vor.u32 %v2846_v16, %v8105_v14  ;;  %v8132_v12 = vrot.slane %v2864_v55, 5  ;;  %v2903_v24 = vshrl.u32 %v2728_v38, 16  ;;  %v8144_v55 = vld [vmem:[#allocation2 + $0x5c] sm:$0x1] }
 0x112   : > { %6629 = vmatprep.subr.bf16.mxu1 %v8072_v21  ;;  %v10027_v8 = vcombine.low %v7858_v42, %v7856_v13  ;;  %v2870_v25 = vrot.slane %v2868_v19, 4  ;;  %v2874_v44 = vshll.u32 %v8107_v36, 16  ;;  %v2906_v22 = vshll.u32 %v2728_v38, 16 }
 0x113   : > { %v2912_v17 = vshll.u32 %v8110_v33, 16  ;;  %v10028_v27 = vcombine.low %v7991_v53, %v7999_v40  ;;  %v2861_v1 = vor.u32 %v2860_v45, %v2857_v28  ;;  %v2881_v31 = vrot.slane %v2879_v3, 4 }
 0x114   : > { %6470 = vmatmul.mubr.bf16.gmra.mxu1 %v10026_v63  ;;  %v2884_v16 = vrot.slane %v2882_v30, 5  ;;  %v2916_v13 = vshrl.u32 %v8110_v33, 16  ;;  %v10029_v42 = vcombine.low %v8014_v34, %v8018_v47  ;;  %v8150_v19 = vrot.slane %v2888_v50, 5 }
 0x115   : > { %6473 = vmatprep.mubr.bf16.mxu1 %v10027_v8  ;;  %v2894_v38 = vrot.slane %v2892_v48, 4  ;;  %v2905_v63 = vrot.slane %v2903_v24, 4  ;;  %v2908_v8 = vrot.slane %v2906_v22, 5  ;;  %v8152_v36 = vrot.slane %v2823_v62, 4  ;;  %v8166_v62 = vld [vmem:[#allocation2 + $0x64] sm:$0xf] }
 0x116   : > { %6522 = vmatmul.mubr.bf16.gmra.mxu0 %v10028_v27  ;;  %v8154_v53 = vrot.slane %v2912_v17, 5  ;;  %v2918_v28 = vrot.slane %v2916_v13, 4  ;;  %v2927_v40 = vshrl.u32 %v2731_v15, 16  ;;  %v8156_v45 = vrot.slane %v2837_v32, 4  ;;  %v8172_v24 = vld [vmem:[#allocation2 + $0x68] sm:$0x1] }
 0x117   : > { %6525 = vmatprep.mubr.bf16.mxu0 %v10029_v42  ;;  %v8158_v3 = vrot.slane %v2850_v5, 5  ;;  %v2871_v30 = vor.u32 %v2870_v25, %v8132_v12  ;;  %v2930_v27 = vshll.u32 %v2731_v15, 16  ;;  %v8161_v34 = vrot.slane %v2847_v43, 4  ;;  %v2734_v25 = vld [vmem:[#allocation2 + $0x6c] sm:$0xf] }
 0x118   : > { %v8163_v47 = vrot.slane %v2874_v44, 5  ;;  %v2885_v50 = vor.u32 %v2884_v16, %v2881_v31  ;;  %v2898_v22 = vshll.u32 %v8138_v2, 16  ;;  %v8168_v17 = vrot.slane %v2861_v1, 4  ;;  %v8180_v16 = vld [vmem:[#allocation2 + $0x70] sm:$0xf] }
 0x119   : > { %v2895_v48 = vor.u32 %v2894_v38, %v8150_v19  ;;  %v2909_v32 = vor.u32 %v2908_v8, %v2905_v63  ;;  %v2922_v5 = vshll.u32 %v8144_v55, 16  ;;  %v10030_v43 = vcombine.low %v7892_v26, %v7894_v61  ;;  %10031 = vst [vmem:[#allocation30_spill] sm:$0xff] %v8180_v16  ;;  %v8226_v8 = vld [vmem:[#allocation2 + $0x7c] sm:$0xf] }
 0x11a   : > { %v5979_v44 = vcombine.low %v8050_v37, %v8070_v9  ;;  %v2919_v15 = vor.u32 %v2918_v28, %v8154_v53  ;;  %v2929_v31 = vrot.slane %v2927_v40, 4  ;;  %v2932_v1 = vrot.slane %v2930_v27, 5  ;;  %10037 = vst [vmem:[#allocation31_spill] sm:$0xff] %v8226_v8 }
 0x11b   : > { %v10032_v13 = vcombine.low %v8001_v23, %v8003_v57  ;;  %v10033_v42 = vsel %vm7395_vm9, %v8060_v10, %v8055_v60  ;;  %v10034_v26 = vsel %vm7395_vm9, %v8053_v7, %v8007_v0  ;;  %v8195_v37 = vcombine.low %v2795_v6, %v2805_v52  ;;  %v2737_v10 = vld [vmem:[#allocation2 + $0x78] sm:$0xf] }
 0x11c   : > { %6474 = vmatmul.mubr.bf16.gmra.mxu1 %v10030_v43  ;;  %v6012_v61 = vcombine.low %v10034_v26, %v10033_v42  ;;  %v2872_v9 = vrot.slane %v2871_v30, 4  ;;  %v2936_v38 = vshll.u32 %v8166_v62, 16  ;;  %v10035_v23 = vcombine.low %v7939_v29, %v7957_v20 }
 0x11d   : > { %6477 = vmatprep.mubr.bf16.mxu1 %v10032_v13  ;;  %v2819_v57 = vsel %vm7395_vm9, %v8112_v4, %v8093_v39  ;;  %v2829_v0 = vsel %vm7395_vm9, %v8152_v36, %v8103_v11  ;;  %v8209_v7 = vrot.slane %v2885_v50, 4  ;;  %v8211_v60 = vrot.slane %v2898_v22, 5 }
 0x11e   : > { %6526 = vmatmul.mubr.bf16.gmra.mxu0 %v10035_v23  ;;  %v10036_v6 = vcombine.low %v7945_v41, %v7968_v18  ;;  %v8216_v29 = vrot.slane %v2895_v48, 4  ;;  %v8218_v20 = vrot.slane %v2909_v32, 4  ;;  %v8220_v52 = vrot.slane %v2922_v5, 5  ;;  %v2740_v48 = vld [vmem:[#allocation2 + $0x84] sm:$0xf] }
 0x11f   : > { %v2940_v39 = vshrl.u32 %v8166_v62, 16  ;;  %v8223_v4 = vrot.slane %v2919_v15, 4  ;;  %v2933_v11 = vor.u32 %v2932_v1, %v2929_v31  ;;  %v2946_v36 = vshll.u32 %v8172_v24, 16  ;;  %v8257_v15 = vld [vmem:[#allocation2 + $0x74] sm:$0x1] }
 0x120   : > { %6529 = vmatprep.mubr.bf16.mxu0 %v10036_v6  ;;  %v2951_v63 = vshrl.u32 %v2734_v25, 16  ;;  %v8228_v28 = vrot.slane %v2936_v38, 5  ;;  %v2954_v41 = vshll.u32 %v2734_v25, 16  ;;  %v2960_v18 = vshll.u32 %v8180_v16, 16  ;;  %10040 = vst [vmem:[#allocation33_spill] sm:$0xff] %v8257_v15  ;;  %v6960_v38 = vld [vmem:[#allocation2 + $0xc] sm:$0xff]  }
 0x121   : > { %v2964_v40 = vshrl.u32 %v8180_v16, 16  ;;  %v2843_v30 = vsel %vm7395_vm9, %v8156_v45, %v8105_v14  ;;  %v2853_v27 = vsel %vm7395_vm9, %v8161_v34, %v8158_v3  ;;  %v2975_v50 = vshrl.u32 %v2737_v10, 16  ;;  %v8248_v45 = vld [vmem:[#allocation2 + $0x88] sm:$0xf] }
 0x122   : > { %v2978_v22 = vshll.u32 %v2737_v10, 16  ;;  %v2867_v32 = vsel %vm7395_vm9, %v8168_v17, %v8132_v12  ;;  %v2877_v5 = vsel %vm7395_vm9, %v2872_v9, %v8163_v47  ;;  %v2942_v25 = vrot.slane %v2940_v39, 4  ;;  %10038 = vst [vmem:[#allocation32_spill] sm:$0xff] %v8248_v45  ;;  %v8272_v39 = vld [vmem:[#allocation2 + $0x8c] sm:$0x1] }
 0x123   : > { %v2984_v14 = vshll.u32 %v8226_v8, 16  ;;  %v10039_v3 = vcombine.low %v7658_v49, %v7665_v56  ;;  %v8253_v34 = vrot.slane %v2933_v11, 4  ;;  %v8255_v43 = vrot.slane %v2946_v36, 5  ;;  %10043 = vst [vmem:[#allocation35_spill] sm:$0xff] %v8272_v39  ;;  %v2743_v11 = vld [vmem:[#allocation2 + $0x90] sm:$0xf] }
 0x124   : > { %v2953_v12 = vrot.slane %v2951_v63, 4  ;;  %v2988_v17 = vshrl.u32 %v8226_v8, 16  ;;  %v10041_v47 = vcombine.low %v7722_v54, %v7728_v58  ;;  %v2956_v31 = vrot.slane %v2954_v41, 5  ;;  %v8268_v54 = vld [vmem:[#allocation2 + $0x80] sm:$0x1] }
 0x125   : > { %6478 = vmatmul.mubr.bf16.gmra.mxu1 %v10039_v3  ;;  %v8263_v1 = vrot.slane %v2960_v18, 5  ;;  %v2966_v13 = vrot.slane %v2964_v40, 4  ;;  %v2999_v42 = vshrl.u32 %v2740_v48, 16  ;;  %v2977_v49 = vrot.slane %v2975_v50, 4  ;;  %10042 = vst [vmem:[#allocation34_spill] sm:$0xff] %v8268_v54  ;;  %v10046_v3 = vld [vmem:[#allocation21_spill] sm:$0xff] }
 0x126   : > { %6481 = vmatprep.mubr.bf16.mxu1 %v10041_v47  ;;  %6530 = vmatmul.mubr.bf16.gmra.mxu0 %v5979_v44  ;;  %v2980_v56 = vrot.slane %v2978_v22, 5  ;;  %v3002_v26 = vshll.u32 %v2740_v48, 16  ;;  %v3008_v9 = vshll.u32 %v8248_v45, 16  ;;  %v6014_v23 = vcombine.low %v2819_v57, %v2829_v0  ;;  %v354_v16 = vld [vmem:[#allocation2 + $0xc8] sm:$0x1] }
 0x127   : > { %6597 = vmatprep.mubr.bf16.mxu0 %v6012_v61  ;;  %v2943_v10 = vor.u32 %v2942_v25, %v8228_v28  ;;  %v2970_v6 = vshll.u32 %v8257_v15, 16  ;;  %v8270_v58 = vrot.slane %v2984_v14, 5  ;;  %v8274_v44 = vcombine.low %v2843_v30, %v2853_v27  ;;  %v8279_v61 = vld [vmem:[#allocation2 + $0x94] sm:$0xf] }
 0x128   : > { %v8276_v36 = vcombine.low %v2867_v32, %v2877_v5  ;;  %v2990_v63 = vrot.slane %v2988_v17, 4  ;;  %v3012_v41 = vshrl.u32 %v8248_v45, 16  ;;  %10044 = vst [vmem:[#allocation36_spill] sm:$0xff] %v8279_v61  ;;  %v2957_v57 = vor.u32 %v2956_v31, %v2953_v12  ;;  %v10045_v5 = vld [vmem:[#allocation20_spill] sm:$0xff] }
 0x129   : > { %v2967_v0 = vor.u32 %v2966_v13, %v8263_v1  ;;  %v3001_v18 = vrot.slane %v2999_v42, 4  ;;  %v3004_v40 = vrot.slane %v3002_v26, 5  ;;  %v2981_v50 = vor.u32 %v2980_v56, %v2977_v49  ;;  %v6967_v12 = vld [vmem:[#allocation6 + $0x1b0] sm:$0xff]   ;;  %v8296_v49 = vld [vmem:[#allocation2 + $0x98] sm:$0x1] }
 0x12a   : > { %v8282_v22 = vrot.slane %v3008_v9, 5  ;;  %v3014_v48 = vrot.slane %v3012_v41, 4  ;;  %v3023_v25 = vshrl.u32 %v2743_v11, 16  ;;  %v8284_v14 = vrot.slane %v2943_v10, 4  ;;  %10048 = vst [vmem:[#allocation20_spill] sm:$0xff] %v8296_v49 }
 0x12b   : > { %v3026_v30 = vshll.u32 %v2743_v11, 16  ;;  %v3032_v27 = vshll.u32 %v8279_v61, 16  ;;  %v3036_v32 = vshrl.u32 %v8279_v61, 16  ;;  %v10047_v17 = vcombine.low %v10045_v5, %v10046_v3  ;;  %v6961_v11 = vld [vmem:[#allocation2 + $0x18] sm:$0xff]   ;;  %v6966_v3 = vld [vmem:[#allocation6 + $0x170] sm:$0xff]  }
 0x12c   : > { %v8291_v47 = vrot.slane %v2970_v6, 5  ;;  %v2991_v31 = vor.u32 %v2990_v63, %v8270_v58  ;;  %v2994_v13 = vshll.u32 %v8268_v54, 16  ;;  %v3018_v42 = vshll.u32 %v8272_v39, 16  ;;  %v2746_v6 = vld [vmem:[#allocation2 + $0x9c] sm:$0xf] }
 0x12d   : > { %6482 = vmatmul.mubr.bf16.gmra.mxu1 %v10047_v17  ;;  %v2891_v56 = vsel %vm7395_vm9, %v8209_v7, %v8150_v19  ;;  %v8302_v26 = vrot.slane %v2957_v57, 4  ;;  %v8304_v9 = vrot.slane %v2967_v0, 4  ;;  %v3005_v10 = vor.u32 %v3004_v40, %v3001_v18  ;;  %v8314_v19 = vld [vmem:[#allocation2 + $0xa0] sm:$0xf]  ;;  %v6964_v7 = vld [vmem:[#allocation2 + $0x24] sm:$0xff]   ;;  %v8338_v17 = vld [vmem:[#allocation6 + $0x1a0] sm:$0xff]  }
 0x12e   : > { %6549 = vmatprep.mubr.bf16.mxu1 %v6960_v38  ;;  %6598 = vmatmul.mubr.bf16.vlgmr.msra.gmra.mxu0 %v8195_v37  ;;  %v2901_v63 = vsel %vm7395_vm9, %v8216_v29, %v8211_v60  ;;  %v8311_v38 = vrot.slane %v2981_v50, 4  ;;  %v3015_v41 = vor.u32 %v3014_v48, %v8282_v22  ;;  %v3025_v5 = vrot.slane %v3023_v25, 4  ;;  %10049 = vst [vmem:[#allocation21_spill] sm:$0xff] %v8314_v19  ;;  %v2749_v40 = vld [vmem:[#allocation2 + $0xa8] sm:$0xf]  ;;  %v6971_v60 = vld [vmem:[#allocation6 + $0x1a8] sm:$0xff]  }
 0x12f   : > { %6678 = vmatpush3.bf16.msra.mxu0 %v8034_v59  ;;  %6601 = vmatprep.mubr.bf16.mxu0 %v6014_v23  ;;  %v3028_v57 = vrot.slane %v3026_v30, 5  ;;  %v8317_v0 = vrot.slane %v3032_v27, 5  ;;  %v3038_v37 = vrot.slane %v3036_v32, 4  ;;  %v3042_v18 = vshll.u32 %v8296_v49, 16  ;;  %v8336_v32 = vld [vmem:[#allocation2 + $0xac] sm:$0xf] }
 0x130   : > { %6679 = vmatprep.subr.bf16.mxu0 %v6967_v12  ;;  %v8320_v29 = vrot.slane %v2991_v31, 4  ;;  %v8322_v50 = vrot.slane %v2994_v13, 5  ;;  %v8324_v48 = vrot.slane %v3018_v42, 5  ;;  %v3047_v25 = vshrl.u32 %v2746_v6, 16  ;;  %10050 = vst [vmem:[#allocation37_spill] sm:$0xff] %v8336_v32 }
 0x131   : > { %v2915_v59 = vsel %vm7395_vm9, %v8218_v20, %v8154_v53  ;;  %v2925_v23 = vsel %vm7395_vm9, %v8223_v4, %v8220_v52  ;;  %v8334_v30 = vrot.slane %v3005_v10, 4  ;;  %v3050_v27 = vshll.u32 %v2746_v6, 16  ;;  %v8349_v10 = vld [vmem:[#allocation6 + $0x168] sm:$0xff]  }
 0x132   : > { %v8340_v31 = vrot.slane %v3015_v41, 4  ;;  %v3056_v13 = vshll.u32 %v8314_v19, 16  ;;  %v3060_v42 = vshrl.u32 %v8314_v19, 16  ;;  %v3071_v49 = vshrl.u32 %v2749_v40, 16  ;;  %v8353_v41 = vld [vmem:[#allocation2 + $0xa4] sm:$0x1] }
 0x133   : > { %6680 = vmatpush3.bf16.msra.mxu0 %v6967_v12  ;;  %v3029_v53 = vor.u32 %v3028_v57, %v3025_v5  ;;  %v3039_v20 = vor.u32 %v3038_v37, %v8317_v0  ;;  %v8345_v61 = vrot.slane %v3042_v18, 5  ;;  %v3074_v52 = vshll.u32 %v2749_v40, 16  ;;  %10051 = vst [vmem:[#allocation38_spill] sm:$0xff] %v8353_v41  ;;  %v8369_v5 = vld [vmem:[#allocation2 + $0xb0] sm:$0x1]  ;;  %v6974_v19 = vld [vmem:[#allocation6 + $0x160] sm:$0xff]  }
 0x134   : > { %v8347_v4 = vcombine.low %v2891_v56, %v2901_v63  ;;  %6681 = vmatprep.subr.bf16.mxu0 %v6971_v60  ;;  %v8351_v6 = vcombine.low %v2915_v59, %v2925_v23  ;;  %v8355_v39 = vrot.slane %v3047_v25, 4  ;;  %v3080_v12 = vshll.u32 %v8336_v32, 16  ;;  %10052 = vst [vmem:[#allocation39_spill] sm:$0xff] %v8369_v5  ;;  %v2752_v37 = vld [vmem:[#allocation2 + $0xb4] sm:$0xf] }
 0x135   : > { %6550 = vmatmul.mubr.bf16.vlgmr.msra.gmra.mxu1 %v6961_v11  ;;  %v8367_v63 = vrot.slane %v3050_v27, 5  ;;  %v3084_v57 = vshrl.u32 %v8336_v32, 16  ;;  %v6965_v18 = vld [vmem:[#allocation2 + $0x30] sm:$0xff]   ;;  %v3062_v40 = vrot.slane %v3060_v42, 4  ;;  %v3073_v25 = vrot.slane %v3071_v49, 4  ;;  %v6968_v27 = vld [vmem:[#allocation2 + $0x3c] sm:$0xff]  }
 0x136   : > { %6630 = vmatpush3.bf16.msra.mxu1 %v8072_v21  ;;  %6553 = vmatprep.mubr.bf16.mxu1 %v6964_v7  ;;  %v8373_v21 = vld [vmem:[#allocation6 + $0x198] sm:$0xff]   ;;  %v8375_v7 = vrot.slane %v3056_v13, 5  ;;  %v3076_v59 = vrot.slane %v3074_v52, 5  ;;  %v8377_v23 = vld [vmem:[#allocation2 + $0xb8] sm:$0xf]  ;;  %v8380_v56 = vrot.slane %v3029_v53, 4 }
 0x137   : > { %6602 = vmatmul.mubr.bf16.gmra.mxu0 %v8274_v44  ;;  %6631 = vmatprep.subr.bf16.mxu1 %v6966_v3  ;;  %10053 = vst [vmem:[#allocation40_spill] sm:$0xff] %v8377_v23  ;;  %v8382_v11 = vrot.slane %v3039_v20, 4  ;;  %v8384_v44 = vld [vmem:[#allocation2 + $0xbc] sm:$0x1]  ;;  %v3095_v32 = vshrl.u32 %v2752_v37, 16  ;;  %v3098_v13 = vshll.u32 %v2752_v37, 16  ;;  %v3053_v20 = vor.u32 %v8367_v63, %v8355_v39 }
 0x138   : > { %6605 = vmatprep.mubr.bf16.mxu0 %v8276_v36  ;;  %6682 = vmatpush3.bf16.msra.mxu0 %v6971_v60  ;;  %v8387_v49 = vrot.slane %v3080_v12, 5  ;;  %v3086_v42 = vrot.slane %v3084_v57, 4  ;;  %v3104_v52 = vshll.u32 %v8377_v23, 16  ;;  %v3108_v36 = vshrl.u32 %v8377_v23, 16  ;;  %v246_v60 = vld [vmem:[%s7360_s4 + $0x78] sm:$0xf] }
 0x139   : > { %6683 = vmatprep.subr.bf16.mxu0 %v8338_v17  ;;  %v3066_v37 = vshll.u32 %v8353_v41, 16  ;;  %v3097_v45 = vrot.slane %v3095_v32, 4  ;;  %v247_v12 = vld [vmem:[%s7360_s4 + $0x7c] sm:$0xf]  ;;  %v304_v54 = vld [vmem:[#allocation2 + $0xc0] sm:$0x1]  ;;  %v3063_v23 = vor.u32 %v3062_v40, %v8375_v7  ;;  %v3077_v8 = vor.u32 %v3076_v59, %v3073_v25 }
 0x13a   : > { %6632 = vmatpush3.bf16.msra.mxu1 %v6966_v3  ;;  %v6983_v57 = vld [vmem:[#allocation6 + $0x190] sm:$0xff]   ;;  %v3090_v3 = vshll.u32 %v8369_v5, 16  ;;  %v3100_v15 = vrot.slane %v3098_v13, 5  ;;  %v8404_v53 = vrot.slane %v3104_v52, 5  ;;  %v3110_v39 = vrot.slane %v3108_v36, 4  ;;  %v6978_v13 = vld [vmem:[#allocation6 + $0x158] sm:$0xff]  }
 0x13b   : > { %6633 = vmatprep.subr.bf16.mxu1 %v8349_v10  ;;  %v305_v32 = vsel %vm7372_vm5, 0, %v304_v54  ;;  %v615_v41 = vshrl.u32 %v246_v60, 16  ;;  %v2973_v40 = vsel %vm7395_vm9, %v8304_v9, %v8291_v47  ;;  %v3087_v25 = vor.u32 %v3086_v42, %v8387_v49  ;;  %v6969_v5 = vld [vmem:[#allocation2 + $0x48] sm:$0xff]  }
 0x13c   : > { %6684 = vmatpush3.bf16.msra.mxu0 %v8338_v17  ;;  %v3114_v59 = vshll.u32 %v8384_v44, 16  ;;  %306 = vst [vmem:[#allocation2 + $0xc0] sm:$0x1] %v305_v32  ;;  %v618_v17 = vshll.u32 %v246_v60, 16  ;;  %v3101_v54 = vor.u32 %v3100_v15, %v3097_v45  ;;  %v626_v36 = vshll.u32 %v247_v12, 16  ;;  %v6987_v32 = vld [vmem:[#allocation6 + $0x188] sm:$0xff]  }
 0x13d   : > { %6554 = vmatmul.mubr.bf16.gmra.mxu1 %v6965_v18  ;;  %6685 = vmatprep.subr.bf16.mxu0 %v8373_v21  ;;  %v617_v52 = vrot.slane %v615_v41, 7  ;;  %v623_v18 = vshrl.u32 %v247_v12, 16  ;;  %v8417_v47 = vrot.slane %v3053_v20, 4  ;;  %v8419_v9 = vrot.slane %v3063_v23, 4  ;;  %v6982_v23 = vld [vmem:[#allocation6 + $0x150] sm:$0xff]  }
 0x13e   : > { %6557 = vmatprep.mubr.bf16.mxu1 %v6968_v27  ;;  %6634 = vmatpush3.bf16.msra.mxu1 %v8349_v10  ;;  %v8421_v42 = vrot.slane %v3066_v37, 5  ;;  %v355_v27 = vsel %vm7381_vm8, 0, %v354_v16  ;;  %v6972_v10 = vld [vmem:[#allocation2 + $0x54] sm:$0xff]   ;;  %v8427_v45 = vrot.slane %v3077_v8, 4  ;;  %v8429_v15 = vrot.slane %v3090_v3, 5 }
 0x13f   : > { %6606 = vmatmul.mubr.bf16.gmra.mxu0 %v8347_v4  ;;  %6635 = vmatprep.subr.bf16.mxu1 %v6974_v19  ;;  %v621_v4 = vrot.slane %v617_v52, 4  ;;  %v625_v41 = vrot.slane %v623_v18, 7  ;;  %356 = vst [vmem:[#allocation2 + $0xc8] sm:$0x1] %v355_v27  ;;  %v8431_v20 = vrot.slane %v3087_v25, 4  ;;  %v3111_v37 = vor.u32 %v3110_v39, %v8404_v53 }
 0x140   : > { %6609 = vmatprep.mubr.bf16.mxu0 %v8351_v6  ;;  %6686 = vmatpush3.bf16.msra.mxu0 %v8373_v21  ;;  %v8434_v12 = vrot.slane %v3114_v59, 5  ;;  %v620_v16 = vor.u32 %v618_v17, %v617_v52  ;;  %v8436_v60 = vld [vmem:[#allocation2 + $0xc] sm:$0xe]  ;;  %v8438_v6 = vrot.slane %v3101_v54, 4  ;;  %v10056_v21 = vld [vmem:[#allocation22_spill] sm:$0xff]  ;;  %v10057_v18 = vsel %vm7395_vm9, %v8284_v14, %v8255_v43 }
 0x141   : > { %6687 = vmatprep.subr.bf16.mxu0 %v6983_v57  ;;  %v628_v8 = vor.u32 %v626_v36, %v625_v41  ;;  %v3530_v3 = vrot.slane %v10056_v21, 5  ;;  %v10058_v39 = vsel %vm7395_vm9, %v8253_v34, %v8228_v28  ;;  %v630_v59 = vrot.slane %v625_v41, 4  ;;  %v8451_v17 = vld [vmem:[#allocation2 + $0x18] sm:$0xe]  ;;  %v6986_v41 = vld [vmem:[#allocation6 + $0x148] sm:$0xff]  }
 0x142   : > { %6636 = vmatpush3.bf16.msra.mxu1 %v6974_v19  ;;  %v6019_v25 = vcombine.low %v10058_v39, %v10057_v18  ;;  %v10059_v19 = vld [vmem:[#allocation23_spill] sm:$0xff]  ;;  %v10060_v52 = vsel %vm7395_vm9, %v8302_v26, %v8263_v1  ;;  %v2987_v43 = vsel %vm7395_vm9, %v8311_v38, %v8270_v58  ;;  %v2997_v28 = vsel %vm7395_vm9, %v8320_v29, %v8322_v50  ;;  %v10063_v39 = vld [vmem:[#allocation25_spill] sm:$0xff] }
 0x143   : > { %6637 = vmatprep.subr.bf16.mxu1 %v6978_v13  ;;  %v3537_v54 = vrot.slane %v10059_v19, 5  ;;  %v6020_v36 = vcombine.low %v10060_v52, %v2973_v40  ;;  %v629_v14 = vsel %vm7406_vm10, %v621_v4, %v628_v8  ;;  %v786_v27 = vld [vmem:[#allocation2 + $0xc0] sm:$0xf]  ;;  %v8469_v1 = vrot.slane %v3111_v37, 4  ;;  %v6991_v58 = vld [vmem:[#allocation6 + $0x180] sm:$0xff]  }
 0x144   : > { %6688 = vmatpush3.bf16.msra.mxu0 %v6983_v57  ;;  %v787_v40 = vsel %vm7417_vm11, %v620_v16, %v786_v27  ;;  %789 = vst [vmem:[#allocation2 + $0xc4] sm:$0xf] %v629_v14  ;;  %v6036_v38 = vrot.slane %v8436_v60, 9  ;;  %v3533_v18 = vrot.slane %v7993_v46, 5  ;;  %v8477_v29 = vrot.slane %v3530_v3, 4  ;;  %v6973_v4 = vld [vmem:[#allocation2 + $0x60] sm:$0xff]  }
 0x145   : > { %6558 = vmatmul.mubr.bf16.gmra.mxu1 %v6969_v5  ;;  %6689 = vmatprep.subr.bf16.mxu0 %v6987_v32  ;;  %788 = vst [vmem:[#allocation2 + $0xc0] sm:$0xf] %v787_v40  ;;  %v6037_v50 = vrot.slane %v8451_v17, 9  ;;  %v8482_v5 = vrot.slane %v3537_v54, 4  ;;  %v8493_v16 = vld [vmem:[#allocation6 + $0x238] sm:$0xff]   ;;  %v3551_v52 = vrot.slane %v10063_v39, 5  ;;  %v6021_v26 = vcombine.low %v2987_v43, %v2997_v28 }
 0x146   : > { %6561 = vmatprep.mubr.bf16.mxu1 %v6972_v10  ;;  %6638 = vmatpush3.bf16.msra.mxu1 %v6978_v13  ;;  %v3011_v13 = vsel %vm7395_vm9, %v8334_v30, %v8282_v22  ;;  %v3021_v10 = vsel %vm7395_vm9, %v8340_v31, %v8324_v48  ;;  %v790_v37 = vld [vmem:[#allocation2 + $0xc8] sm:$0x1]  ;;  %v3467_v8 = vld [vmem:[#allocation2 + $0x30] sm:$0xe]  ;;  %v10064_v34 = vld [vmem:[#allocation27_spill] sm:$0xff]  ;;  %v3035_v48 = vsel %vm7395_vm9, %v8380_v56, %v8317_v0 }
 0x147   : > { %6610 = vmatmul.mubr.bf16.gmra.mxu0 %v6019_v25  ;;  %6639 = vmatprep.subr.bf16.mxu1 %v6982_v23  ;;  %v3554_v14 = vrot.slane %v10064_v34, 5  ;;  %v6976_v25 = vld [vmem:[#allocation2 + $0x6c] sm:$0xff]   ;;  %v791_v22 = vsel %vm7372_vm5, %v630_v59, %v790_v37  ;;  %v8499_v30 = vld [vmem:[#allocation2 + $0x24] sm:$0xe]  ;;  %v3045_v31 = vsel %vm7395_vm9, %v8382_v11, %v8345_v61  ;;  %v6990_v27 = vld [vmem:[#allocation6 + $0x140] sm:$0xff]   ;;  %v6022_v63 = vcombine.low %v3011_v13, %v3021_v10 }
 0x148   : > { %6613 = vmatprep.mubr.bf16.mxu0 %v6020_v36  ;;  %6690 = vmatpush3.bf16.msra.mxu0 %v6987_v32  ;;  %792 = vst [vmem:[#allocation2 + $0xc8] sm:$0x1] %v791_v22  ;;  %v6039_v36 = vrot.slane %v3467_v8, 9  ;;  %v3553_v32 = vrot.slane %v3551_v52, 4  ;;  %v3468_v59 = vld [vmem:[#allocation2 + $0x3c] sm:$0xe]  ;;  %v8518_v11 = vcombine.low %v3035_v48, %v3045_v31  ;;  %v3059_v39 = vsel %vm7395_vm9, %v8417_v47, %v8375_v7 }
 0x149   : > { %6691 = vmatprep.subr.bf16.mxu0 %v6991_v58  ;;  %v6040_v61 = vrot.slane %v3468_v59, 9  ;;  %v10066_v43 = vld [vmem:[#allocation24_spill] sm:$0xff]  ;;  %v10067_v13 = vld [vmem:[#allocation26_spill] sm:$0xff] }
 0x14a   : > { %6640 = vmatpush3.bf16.msra.mxu1 %v6982_v23  ;;  %v8512_v0 = vsel %vm7765_vm14, %v6039_v36, %v3551_v52  ;;  %v8516_v56 = vsel %vm7765_vm14, %v3553_v32, %v3554_v14  ;;  %v3544_v23 = vrot.slane %v10066_v43, 5  ;;  %v3558_v10 = vrot.slane %v10067_v13, 5  ;;  %v10068_v14 = vld [vmem:[#allocation29_spill] sm:$0xff]  ;;  %v3469_v47 = vld [vmem:[#allocation2 + $0x48] sm:$0xe] }
 0x14b   : > { %6641 = vmatprep.subr.bf16.mxu1 %v6986_v41  ;;  %v8520_v8 = vld [vmem:[#allocation2 + $0xc4] sm:$0xf]  ;;  %v3069_v52 = vsel %vm7395_vm9, %v8419_v9, %v8421_v42  ;;  %v3561_v22 = vrot.slane %v10068_v14, 5  ;;  %v8538_v36 = vld [vmem:[#allocation6 + $0x1f8] sm:$0xff]   ;;  %v6977_v9 = vld [vmem:[#allocation2 + $0x78] sm:$0xff]   ;;  %v6041_v59 = vrot.slane %v3469_v47, 9 }
 0x14c   : > { %6692 = vmatpush3.bf16.msra.mxu0 %v6991_v58  ;;  %v2755_v34 = vld [vmem:[#allocation2 + $0xc0] sm:$0xf]  ;;  %v3128_v58 = vshll.u32 %v8520_v8, 16  ;;  %v3132_v31 = vshrl.u32 %v8520_v8, 16  ;;  %v8542_v7 = vsel %vm7765_vm14, %v6040_v61, %v3558_v10  ;;  %v3560_v32 = vrot.slane %v3558_v10, 4  ;;  %v6980_v13 = vld [vmem:[#allocation2 + $0x84] sm:$0xff]  }
 0x14d   : > { %6562 = vmatmul.mubr.bf16.gmra.mxu1 %v6973_v4  ;;  %6773 = vmatprep.subr.bf16.mxu0 %v8493_v16  ;;  %v3119_v4 = vshrl.u32 %v2755_v34, 16  ;;  %v3122_v48 = vshll.u32 %v2755_v34, 16  ;;  %v3568_v61 = vrot.slane %v8138_v2, 5  ;;  %v6024_v47 = vcombine.low %v3059_v39, %v3069_v52  ;;  %v8563_v2 = vld [vmem:[#allocation2 + $0x2c] sm:$0x1] }
 0x14e   : > { %6565 = vmatprep.mubr.bf16.mxu1 %v6976_v25  ;;  %6642 = vmatpush3.bf16.msra.mxu1 %v6986_v41  ;;  %v8544_v42 = vrot.slane %v3128_v58, 5  ;;  %v10069_v25 = vld [vmem:[#allocation28_spill] sm:$0xff]  ;;  %v3134_v40 = vrot.slane %v3132_v31, 4  ;;  %v3470_v31 = vld [vmem:[#allocation2 + $0x54] sm:$0xe]  ;;  %v3572_v39 = vrot.slane %v8110_v33, 5  ;;  %v3083_v33 = vsel %vm7395_vm9, %v8427_v45, %v8387_v49 }
 0x14f   : > { %6614 = vmatmul.mubr.bf16.gmra.mxu0 %v6021_v26  ;;  %6643 = vmatprep.subr.bf16.mxu1 %v6990_v27  ;;  %v3565_v41 = vrot.slane %v10069_v25, 5  ;;  %v8547_v34 = vld [vmem:[#allocation2 + $0xc8] sm:$0x1]  ;;  %v3121_v14 = vrot.slane %v3119_v4, 4  ;;  %v3124_v28 = vrot.slane %v3122_v48, 5  ;;  %v8553_v26 = vsel %vm7765_vm14, %v3560_v32, %v3561_v22  ;;  %v10081_v4 = vld [vmem:[#allocation39_spill] sm:$0xff] }
 0x150   : > { %6617 = vmatprep.mubr.bf16.mxu0 %v6022_v63  ;;  %v3138_v57 = vshll.u32 %v8547_v34, 16  ;;  %v3135_v25 = vor.u32 %v3134_v40, %v8544_v42  ;;  %v3547_v22 = vrot.slane %v8563_v2, 5  ;;  %v6042_v32 = vrot.slane %v3470_v31, 9  ;;  %v10071_v31 = vld [vmem:[#allocation33_spill] sm:$0xff]  ;;  %v3478_v60 = vld [vmem:[#allocation2 + $0xb4] sm:$0xe] }
 0x151   : > { %v8557_v10 = vsel %vm7765_vm14, %v6041_v59, %v3565_v41  ;;  %v3567_v58 = vrot.slane %v3565_v41, 4  ;;  %v3125_v63 = vor.u32 %v3124_v28, %v3121_v14  ;;  %v3575_v28 = vrot.slane %v8144_v55, 5  ;;  %v3471_v41 = vld [vmem:[#allocation2 + $0x60] sm:$0xe]  ;;  %v4349_v19 = vld [vmem:[#allocation2 + $0x18] sm:$0xf] }
 0x152   : > { %6644 = vmatpush3.bf16.msra.mxu1 %v6990_v27  ;;  %v8574_v27 = vrot.slane %v3138_v57, 5  ;;  %v3574_v59 = vrot.slane %v3572_v39, 4  ;;  %v3579_v14 = vrot.slane %v8166_v62, 5  ;;  %v3136_v55 = vrot.slane %v3135_v25, 4  ;;  %v8757_v43 = vld [vmem:[#allocation2 + $0x28] sm:$0xf] }
 0x153   : > { %6725 = vmatprep.subr.bf16.mxu1 %v8538_v36  ;;  %v8568_v48 = vsel %vm7765_vm14, %v3567_v58, %v3568_v61  ;;  %v8572_v40 = vrot.slane %v3125_v63, 4  ;;  %v8585_v57 = vsel %vm7765_vm14, %v6042_v32, %v3572_v39  ;;  %v6043_v61 = vrot.slane %v3471_v41, 9  ;;  %v6981_v58 = vld [vmem:[#allocation2 + $0x90] sm:$0xff]   ;;  %v3472_v63 = vld [vmem:[#allocation2 + $0x6c] sm:$0xe] }
 0x154   : > { %v3093_v62 = vsel %vm7395_vm9, %v8431_v20, %v8429_v15  ;;  %v3582_v49 = vrot.slane %v8172_v24, 5  ;;  %v3107_v45 = vsel %vm7395_vm9, %v8438_v6, %v8404_v53  ;;  %v6984_v24 = vld [vmem:[#allocation2 + $0x9c] sm:$0xff]   ;;  %v6044_v25 = vrot.slane %v3472_v63, 9  ;;  %v10070_v53 = vld [vmem:[#allocation30_spill] sm:$0xff] }
 0x155   : > { %6566 = vmatmul.mubr.bf16.gmra.mxu1 %v6977_v9  ;;  %v8594_v9 = vsel %vm7765_vm14, %v3574_v59, %v3575_v28  ;;  %v8609_v20 = vsel %vm7765_vm14, %v6043_v61, %v3579_v14  ;;  %v3586_v6 = vrot.slane %v10070_v53, 5  ;;  %v3589_v39 = vrot.slane %v10071_v31, 5  ;;  %v10072_v28 = vld [vmem:[#allocation31_spill] sm:$0xff]  ;;  %v10073_v59 = vld [vmem:[#allocation34_spill] sm:$0xff]  ;;  %v10074_v53 = vld [vmem:[#allocation32_spill] sm:$0xff] }
 0x156   : > { %6569 = vmatprep.mubr.bf16.mxu1 %v6980_v13  ;;  %v3581_v13 = vrot.slane %v3579_v14, 4  ;;  %v3593_v32 = vrot.slane %v10072_v28, 5  ;;  %v3596_v41 = vrot.slane %v10073_v59, 5  ;;  %v6025_v14 = vcombine.low %v3083_v33, %v3093_v62  ;;  %v3474_v62 = vld [vmem:[#allocation2 + $0x84] sm:$0xe] }
 0x157   : > { %6618 = vmatmul.mubr.bf16.gmra.mxu0 %v8518_v11  ;;  %v3117_v11 = vsel %vm7395_vm9, %v8469_v1, %v8434_v12  ;;  %v3473_v1 = vld [vmem:[#allocation2 + $0x78] sm:$0xe]  ;;  %v8623_v61 = vsel %vm7765_vm14, %v6044_v25, %v3586_v6  ;;  %v3600_v52 = vrot.slane %v10074_v53, 5  ;;  %v3131_v31 = vsel %vm7395_vm9, %v8572_v40, %v8544_v42  ;;  %v6985_v42 = vld [vmem:[#allocation2 + $0xa8] sm:$0xff]  }
 0x158   : > { %6621 = vmatprep.mubr.bf16.mxu0 %v6024_v47  ;;  %v8613_v47 = vsel %vm7765_vm14, %v3581_v13, %v3582_v49  ;;  %v3588_v13 = vrot.slane %v3586_v6, 4  ;;  %v6045_v49 = vrot.slane %v3473_v1, 9  ;;  %v6026_v63 = vcombine.low %v3107_v45, %v3117_v11  ;;  %v10075_v6 = vld [vmem:[#allocation35_spill] sm:$0xff]  ;;  %v3475_v1 = vld [vmem:[#allocation2 + $0x90] sm:$0xe]  ;;  %v10079_v40 = vld [vmem:[#allocation38_spill] sm:$0xff] }
 0x159   : > { %v3595_v15 = vrot.slane %v3593_v32, 4  ;;  %v6046_v11 = vrot.slane %v3474_v62, 9  ;;  %v3602_v25 = vrot.slane %v3600_v52, 4  ;;  %v10078_v53 = vld [vmem:[#allocation21_spill] sm:$0xff]  ;;  %v6992_v45 = vld [vmem:[#allocation2 + $0x18] sm:$0xff]   ;;  %v3638_v46 = vrot.slane %v8547_v34, 5 }
 0x15a   : > { %v8632_v28 = vsel %vm7765_vm14, %v3588_v13, %v3589_v39  ;;  %v8636_v33 = vsel %vm7765_vm14, %v6045_v49, %v3593_v32  ;;  %v3603_v39 = vrot.slane %v10075_v6, 5  ;;  %v10076_v32 = vld [vmem:[#allocation36_spill] sm:$0xff]  ;;  %v6988_v49 = vld [vmem:[#allocation2 + $0xb4] sm:$0xff]   ;;  %v3614_v62 = vrot.slane %v10078_v53, 5  ;;  %v10080_v53 = vld [vmem:[#allocation37_spill] sm:$0xff] }
 0x15b   : > { %v3607_v59 = vrot.slane %v10076_v32, 5  ;;  %v3621_v12 = vrot.slane %v10080_v53, 5  ;;  %v6996_v53 = vld [vmem:[#allocation2 + $0x30] sm:$0xff]  }
 0x15c   : > { %v8659_v6 = vsel %vm7765_vm14, %v3602_v25, %v3603_v39  ;;  %v3616_v25 = vrot.slane %v3614_v62, 4 }
 0x15d   : > { %6570 = vmatmul.mubr.bf16.gmra.mxu1 %v6981_v58  ;;  %v8642_v58 = vsel %vm7765_vm14, %v3595_v15, %v3596_v41  ;;  %v3141_v15 = vsel %vm7395_vm9, %v3136_v55, %v8574_v27  ;;  %v8654_v41 = vsel %vm7765_vm14, %v6046_v11, %v3600_v52  ;;  %v3609_v32 = vrot.slane %v3607_v59, 4  ;;  %v3476_v52 = vld [vmem:[#allocation2 + $0x9c] sm:$0xe] }
 0x15e   : > { %6573 = vmatprep.mubr.bf16.mxu1 %v6984_v24  ;;  %v10077_v24 = vld [vmem:[#allocation20_spill] sm:$0xff]  ;;  %v6027_v55 = vcombine.low %v3131_v31, %v3141_v15 }
 0x15f   : > { %6622 = vmatmul.mubr.bf16.gmra.mxu0 %v6025_v14  ;;  %v3610_v13 = vrot.slane %v10077_v24, 5  ;;  %v6047_v14 = vrot.slane %v3475_v1, 9  ;;  %v3617_v24 = vrot.slane %v10079_v40, 5  ;;  %v6048_v1 = vrot.slane %v3476_v52, 9  ;;  %v3477_v40 = vld [vmem:[#allocation2 + $0xa8] sm:$0xe] }
 0x160   : > { %6625 = vmatprep.mubr.bf16.mxu0 %v6026_v63  ;;  %v3624_v63 = vrot.slane %v10081_v4, 5  ;;  %v10082_v15 = vld [vmem:[#allocation40_spill] sm:$0xff]  ;;  %v3531_v4 = vsel %vm7765_vm14, %v6036_v38, %v3530_v3  ;;  %v3635_v3 = vrot.slane %v8520_v8, 5 }
 0x161   : > { %v8666_v27 = vsel %vm7765_vm14, %v6047_v14, %v3607_v59  ;;  %v8670_v11 = vsel %vm7765_vm14, %v3609_v32, %v3610_v13  ;;  %v8678_v59 = vsel %vm7765_vm14, %v6048_v1, %v3614_v62  ;;  %v8682_v31 = vsel %vm7765_vm14, %v3616_v25, %v3617_v24  ;;  %v6989_v52 = vld [vmem:[#allocation2 + $0xc0] sm:$0xff]  }
 0x162   : > { %v6049_v13 = vrot.slane %v3477_v40, 9  ;;  %v3628_v14 = vrot.slane %v10082_v15, 5  ;;  %v3623_v62 = vrot.slane %v3621_v12, 4  ;;  %v3631_v32 = vrot.slane %v8384_v44, 5  ;;  %v6999_v15 = vld [vmem:[#allocation6 + $0x230] sm:$0xff]  }
 0x163   : > { %v6050_v44 = vrot.slane %v3478_v60, 9  ;;  %v3637_v1 = vrot.slane %v3635_v3, 4 }
 0x164   : > { %v8701_v21 = vsel %vm7765_vm14, %v6049_v13, %v3621_v12  ;;  %v3630_v24 = vrot.slane %v3628_v14, 4  ;;  %v8706_v38 = vsel %vm7765_vm14, %v3623_v62, %v3624_v63  ;;  %v3479_v12 = vld [vmem:[#allocation2 + $0xc0] sm:$0xe]  ;;  %v10083_v62 = vrot.slane %v8025_v51, 5  ;;  %v4352_v51 = vld [vmem:[#allocation2 + $0x24] sm:$0xf] }
 0x165   : > { %6574 = vmatmul.mubr.bf16.gmra.mxu1 %v6985_v42  ;;  %v8719_v63 = vsel %vm7765_vm14, %v6050_v44, %v3628_v14  ;;  %v6051_v34 = vrot.slane %v3479_v12, 9  ;;  %v8725_v40 = vsel %vm7765_vm14, %v3637_v1, %v3638_v46  ;;  %v3538_v14 = vsel %vm7765_vm14, %v6037_v50, %v3537_v54  ;;  %v8754_v54 = vld [vmem:[#allocation2 + $0x1c] sm:$0xf]  ;;  %v6998_v44 = vld [vmem:[#allocation6 + $0x1f0] sm:$0xff]  }
 0x166   : > { %6577 = vmatprep.mubr.bf16.mxu1 %v6988_v49  ;;  %v3534_v49 = vsel %vm7765_vm14, %v8477_v29, %v3533_v18  ;;  %v8713_v29 = vsel %vm7765_vm14, %v3630_v24, %v3631_v32  ;;  %v3541_v32 = vsel %vm7765_vm14, %v8482_v5, %v10083_v62  ;;  %v4401_v24 = vshll.u32 %v4349_v19, 16  ;;  %v7007_v1 = vld [vmem:[#allocation6 + $0x220] sm:$0xff]   ;;  %v8844_v42 = vld [vmem:[#allocation2 + $0x4c] sm:$0xf] }
 0x167   : > { %6626 = vmatmul.mubr.bf16.gmra.mxu0 %v6027_v55  ;;  %v6993_v55 = vld [vmem:[#allocation2 + $0x24] sm:$0xff]   ;;  %v6052_v8 = vcombine.low %v3531_v4, %v3534_v49  ;;  %v8729_v13 = vsel %vm7765_vm14, %v6051_v34, %v3635_v3  ;;  %v10084_v49 = vrot.slane %v8499_v30, 9  ;;  %v6053_v50 = vcombine.low %v3538_v14, %v3541_v32  ;;  %v6997_v3 = vld [vmem:[#allocation2 + $0x3c] sm:$0xff]   ;;  %v8765_v34 = vpop.f32.mrf.mxu0  ;;  %v5103_v32 = vld [vmem:[#allocation2 + $0x18] sm:$0xe] }
 0x168   : > { %6693 = vmatprep.mubr.bf16.mxu0 %v6992_v45  ;;  %v3546_v45 = vrot.slane %v3544_v23, 4  ;;  %v7003_v30 = vld [vmem:[#allocation6 + $0x228] sm:$0xff]   ;;  %v4407_v2 = vshll.u32 %v8754_v54, 16  ;;  %v4422_v46 = vshrl.u32 %v4352_v51, 16  ;;  %v4435_v12 = vshrl.u32 %v8757_v43, 16  ;;  %10085 = vst [vmem:[#allocation15_spill] sm:$0xff] %v8765_v34 }
 0x169   : > { %v3545_v60 = vsel %vm7765_vm14, %v10084_v49, %v3544_v23  ;;  %v4398_v23 = vshrl.u32 %v4349_v19, 16  ;;  %v4403_v14 = vrot.slane %v4401_v24, 5  ;;  %v7002_v49 = vld [vmem:[#allocation6 + $0x1e8] sm:$0xff]  }
 0x16a   : > { %v3548_v17 = vsel %vm7765_vm14, %v3546_v45, %v3547_v22  ;;  %v4411_v22 = vshrl.u32 %v8754_v54, 16  ;;  %v5169_v45 = vrot.slane %v8754_v54, 5  ;;  %v8767_v62 = vrot.slane %v4407_v2, 5  ;;  %v5104_v4 = vld [vmem:[#allocation2 + $0x24] sm:$0xe] }
 0x16b   : > { %v6054_v5 = vcombine.low %v3545_v60, %v3548_v17  ;;  %v4424_v60 = vrot.slane %v4422_v46, 4  ;;  %v4437_v54 = vrot.slane %v4435_v12, 4  ;;  %v4355_v46 = vld [vmem:[#allocation2 + $0x30] sm:$0xf]  ;;  %v7004_v12 = vld [vmem:[#allocation2 + $0x60] sm:$0xff]  }
 0x16d   : > { %6578 = vmatmul.mubr.bf16.gmra.mxu1 %v6989_v52  ;;  %v4425_v52 = vshll.u32 %v4352_v51, 16 }
 0x16e   : > { %6645 = vmatprep.mubr.bf16.mxu1 %v6052_v8  ;;  %v4351_v8 = vld [vmem:[#allocation2 + $0x20] sm:$0x1] }
 0x16f   : > { %6694 = vmatmul.mubr.bf16.vlgmr.msra.gmra.mxu0 %v6993_v55  ;;  %v4431_v55 = vshll.u32 %v8757_v43, 16  ;;  %v4427_v17 = vrot.slane %v4425_v52, 5  ;;  %v4417_v51 = vshll.u32 %v4351_v8, 16  ;;  %v7001_v52 = vld [vmem:[#allocation2 + $0x54] sm:$0xff]  }
 0x170   : > { %6774 = vmatpush3.bf16.msra.mxu0 %v8493_v16  ;;  %6697 = vmatprep.mubr.bf16.mxu0 %v6996_v53  ;;  %v7000_v16 = vld [vmem:[#allocation2 + $0x48] sm:$0xff]   ;;  %v4400_v53 = vrot.slane %v4398_v23, 4  ;;  %v8773_v23 = vpop.f32.mrf.mxu0 }
 0x171   : > { %6775 = vmatprep.subr.bf16.mxu0 %v6999_v15  ;;  %v8769_v19 = vrot.slane %v4431_v55, 5  ;;  %10086 = vst [vmem:[#allocation16_spill] sm:$0xff] %v8773_v23  ;;  %v5176_v55 = vrot.slane %v8757_v43, 5  ;;  %v10089_v43 = vcombine.low %v8542_v7, %v8553_v26  ;;  %v7010_v7 = vld [vmem:[#allocation6 + $0x1d8] sm:$0xff]  }
 0x172   : > { %v4404_v24 = vor.u32 %v4403_v14, %v4400_v53  ;;  %v10087_v53 = vcombine.low %v8512_v0, %v8516_v56  ;;  %v8782_v14 = vpop.f32.mrf.mxu1 }
 0x173   : > { %10088 = vst [vmem:[#allocation22_spill] sm:$0xff] %v8782_v14  ;;  %v10095_v14 = vcombine.low %v8585_v57, %v8594_v9  ;;  %v8870_v9 = vld [vmem:[#allocation2 + $0x44] sm:$0x1] }
 0x174   : > { %6776 = vmatpush3.bf16.msra.mxu0 %v6999_v15  ;;  %v4413_v15 = vrot.slane %v4411_v22, 4  ;;  %v5171_v22 = vrot.slane %v5169_v45, 4 }
 0x175   : > { %6646 = vmatmul.mubr.bf16.vlgmr.msra.gmra.mxu1 %v6053_v50  ;;  %6777 = vmatprep.subr.bf16.mxu0 %v7003_v30  ;;  %v6124_v50 = vrot.slane %v5103_v32, 9  ;;  %v4438_v32 = vor.u32 %v4437_v54, %v8769_v19  ;;  %v8791_v54 = vrot.slane %v4404_v24, 4  ;;  %v5178_v24 = vrot.slane %v5176_v55, 4 }
 0x176   : > { %6726 = vmatpush3.bf16.msra.mxu1 %v8538_v36  ;;  %6649 = vmatprep.mubr.bf16.mxu1 %v6054_v5  ;;  %v7011_v36 = vld [vmem:[#allocation6 + $0x218] sm:$0xff]   ;;  %v8771_v5 = vld [vmem:[#allocation2 + $0x2c] sm:$0x1]  ;;  %v4414_v2 = vor.u32 %v4413_v15, %v8767_v62  ;;  %v8784_v15 = vrot.slane %v4417_v51, 5 }
 0x177   : > { %6698 = vmatmul.mubr.bf16.gmra.mxu0 %v6997_v3  ;;  %6727 = vmatprep.subr.bf16.mxu1 %v6998_v44  ;;  %v5172_v3 = vrot.slane %v4351_v8, 5  ;;  %v7015_v8 = vld [vmem:[#allocation6 + $0x210] sm:$0xff]   ;;  %v8797_v0 = vsel %vm7765_vm14, %v6124_v50, %v5169_v45  ;;  %v8803_v51 = vld [vmem:[#allocation2 + $0x34] sm:$0xf]  ;;  %v8808_v45 = vrot.slane %v4438_v32, 4 }
 0x178   : > { %6701 = vmatprep.mubr.bf16.mxu0 %v7000_v16  ;;  %6778 = vmatpush3.bf16.msra.mxu0 %v7003_v30  ;;  %v7006_v30 = vld [vmem:[#allocation6 + $0x1e0] sm:$0xff]   ;;  %v4428_v16 = vor.u32 %v4427_v17, %v4424_v60  ;;  %v4446_v60 = vshrl.u32 %v4355_v46, 16  ;;  %v4449_v17 = vshll.u32 %v4355_v46, 16  ;;  %v8793_v25 = vrot.slane %v4414_v2, 4  ;;  %v7019_v46 = vld [vmem:[#allocation6 + $0x208] sm:$0xff]   ;;  %v7014_v32 = vld [vmem:[#allocation6 + $0x1d0] sm:$0xff]  }
 0x179   : > { %6779 = vmatprep.subr.bf16.mxu0 %v7007_v1  ;;  %v8801_v56 = vsel %vm7765_vm14, %v5171_v22, %v5172_v3  ;;  %v5179_v2 = vrot.slane %v8771_v5, 5  ;;  %v4358_v22 = vld [vmem:[#allocation2 + $0x3c] sm:$0xf]  ;;  %v8812_v3 = vpop.f32.mrf.mxu1  ;;  %v5183_v57 = vrot.slane %v8803_v51, 5 }
 0x17a   : > { %6728 = vmatpush3.bf16.msra.mxu1 %v6998_v44  ;;  %v4441_v44 = vshll.u32 %v8771_v5, 16  ;;  %v8805_v26 = vrot.slane %v4428_v16, 4  ;;  %10091 = vst [vmem:[#allocation17_spill] sm:$0xff] %v8812_v3  ;;  %v4455_v16 = vshll.u32 %v8803_v51, 16  ;;  %v7005_v5 = vld [vmem:[#allocation2 + $0x6c] sm:$0xff]   ;;  %v4473_v39 = vshll.u32 %v4358_v22, 16 }
 0x17b   : > { %6729 = vmatprep.subr.bf16.mxu1 %v7002_v49 }
 0x17c   : > { %6780 = vmatpush3.bf16.msra.mxu0 %v7007_v1  ;;  %v8789_v1 = vpop.f32.mrf.mxu0  ;;  %v8810_v50 = vrot.slane %v4441_v44, 5  ;;  %v4410_v44 = vsel %vm7395_vm9, %v8791_v54, %v8767_v62  ;;  %v8840_v62 = vsel %vm7765_vm14, %v5178_v24, %v5179_v2  ;;  %v8842_v54 = vld [vmem:[#allocation2 + $0x38] sm:$0x1]  ;;  %v8857_v2 = vrot.slane %v4455_v16, 5 }
 0x17d   : > { %6650 = vmatmul.mubr.bf16.gmra.mxu1 %v10087_v53  ;;  %6781 = vmatprep.subr.bf16.mxu0 %v7011_v36  ;;  %10090 = vst [vmem:[#allocation23_spill] sm:$0xff] %v8789_v1  ;;  %v4451_v53 = vrot.slane %v4449_v17, 5  ;;  %v4420_v17 = vsel %vm7395_vm9, %v8793_v25, %v8784_v15  ;;  %v5105_v25 = vld [vmem:[#allocation2 + $0x30] sm:$0xe]  ;;  %v4470_v15 = vshrl.u32 %v4358_v22, 16 }
 0x17e   : > { %6653 = vmatprep.mubr.bf16.mxu1 %v10089_v43  ;;  %6730 = vmatpush3.bf16.msra.mxu1 %v7002_v49  ;;  %v6125_v49 = vrot.slane %v5104_v4, 9  ;;  %v4459_v4 = vshrl.u32 %v8803_v51, 16  ;;  %v8816_v43 = vld [vmem:[#allocation2 + $0x40] sm:$0xf] }
 0x17f   : > { %6702 = vmatmul.mubr.bf16.gmra.mxu0 %v7001_v52  ;;  %6731 = vmatprep.subr.bf16.mxu1 %v7006_v30  ;;  %v4448_v52 = vrot.slane %v4446_v60, 4  ;;  %v4361_v60 = vld [vmem:[#allocation2 + $0x48] sm:$0xf]  ;;  %v4479_v3 = vshll.u32 %v8816_v43, 16 }
 0x180   : > { %6705 = vmatprep.mubr.bf16.mxu0 %v7004_v12  ;;  %6782 = vmatpush3.bf16.msra.mxu0 %v7011_v36  ;;  %v7008_v36 = vld [vmem:[#allocation2 + $0x78] sm:$0xff]   ;;  %v8818_v12 = vpop.f32.mrf.mxu0  ;;  %v8836_v18 = vsel %vm7765_vm14, %v6125_v49, %v5176_v55  ;;  %v10093_v55 = vcombine.low %v8557_v10, %v8568_v48  ;;  %v4461_v22 = vrot.slane %v4459_v4, 4  ;;  %v4494_v48 = vshrl.u32 %v4361_v60, 16 }
 0x181   : > { %6783 = vmatprep.subr.bf16.mxu0 %v7015_v8  ;;  %10092 = vst [vmem:[#allocation18_spill] sm:$0xff] %v8818_v12  ;;  %v7023_v49 = vld [vmem:[#allocation6 + $0x200] sm:$0xff]   ;;  %v4452_v24 = vor.u32 %v4451_v53, %v4448_v52  ;;  %v4507_v12 = vshrl.u32 %v8844_v42, 16  ;;  %v4465_v52 = vshll.u32 %v8842_v54, 16  ;;  %v6126_v53 = vrot.slane %v5105_v25, 9 }
 0x182   : > { %6732 = vmatpush3.bf16.msra.mxu1 %v7006_v30  ;;  %v4434_v30 = vsel %vm7395_vm9, %v8805_v26, %v8769_v19  ;;  %v4483_v19 = vshrl.u32 %v8816_v43, 16  ;;  %v8851_v26 = vpop.f32.mrf.mxu1  ;;  %v8862_v10 = vpop.f32.mrf.mxu0  ;;  %v8872_v16 = vrot.slane %v4479_v3, 5  ;;  %v4462_v51 = vor.u32 %v4461_v22, %v8857_v2 }
 0x183   : > { %6733 = vmatprep.subr.bf16.mxu1 %v7010_v7  ;;  %10094 = vst [vmem:[#allocation25_spill] sm:$0xff] %v8851_v26  ;;  %10096 = vst [vmem:[#allocation27_spill] sm:$0xff] %v8862_v10  ;;  %v4503_v26 = vshll.u32 %v8844_v42, 16  ;;  %v8880_v25 = vrot.slane %v4452_v24, 4  ;;  %v8891_v24 = vsel %vm7765_vm14, %v6126_v53, %v5183_v57  ;;  %v5186_v22 = vrot.slane %v8842_v54, 5 }
 0x184   : > { %6784 = vmatpush3.bf16.msra.mxu0 %v7015_v8  ;;  %v4444_v8 = vsel %vm7395_vm9, %v8808_v45, %v8810_v50  ;;  %v7018_v45 = vld [vmem:[#allocation6 + $0x1c8] sm:$0xff]   ;;  %v8866_v50 = vcombine.low %v4410_v44, %v4420_v17  ;;  %v4485_v4 = vrot.slane %v4483_v19, 4  ;;  %v4509_v19 = vrot.slane %v4507_v12, 4  ;;  %v8895_v17 = vld [vmem:[#allocation2 + $0x50] sm:$0x1] }
 0x185   : > { %6654 = vmatmul.mubr.bf16.gmra.mxu1 %v10093_v55  ;;  %6785 = vmatprep.subr.bf16.mxu0 %v7019_v46  ;;  %v4497_v55 = vshll.u32 %v4361_v60, 16  ;;  %v7009_v60 = vld [vmem:[#allocation2 + $0x84] sm:$0xff]   ;;  %v8876_v44 = vcombine.low %v4434_v30, %v4444_v8  ;;  %v7022_v30 = vld [vmem:[#allocation6 + $0x1c0] sm:$0xff]   ;;  %v8887_v8 = vrot.slane %v4465_v52, 5  ;;  %v10099_v53 = vcombine.low %v8609_v20, %v8613_v47 }
 0x186   : > { %6657 = vmatprep.mubr.bf16.mxu1 %v10095_v14  ;;  %6734 = vmatpush3.bf16.msra.mxu1 %v7010_v7  ;;  %v4472_v14 = vrot.slane %v4470_v15, 4  ;;  %v4475_v7 = vrot.slane %v4473_v39, 5  ;;  %v4496_v39 = vrot.slane %v4494_v48, 4  ;;  %v8885_v15 = vrot.slane %v4503_v26, 5  ;;  %v8899_v52 = vld [vmem:[#allocation2 + $0x58] sm:$0xf] }
 0x187   : > { %6706 = vmatmul.mubr.bf16.gmra.mxu0 %v7005_v5  ;;  %6735 = vmatprep.subr.bf16.mxu1 %v7014_v32  ;;  %v8874_v5 = vpop.f32.mrf.mxu1  ;;  %v4499_v3 = vrot.slane %v4497_v55, 5  ;;  %v5185_v48 = vrot.slane %v5183_v57, 4  ;;  %v4486_v12 = vor.u32 %v4485_v4, %v8872_v16  ;;  %v5106_v55 = vld [vmem:[#allocation2 + $0x3c] sm:$0xe]  ;;  %v4513_v4 = vshll.u32 %v8895_v17, 16 }
 0x188   : > { %6709 = vmatprep.mubr.bf16.mxu0 %v7008_v36  ;;  %6786 = vmatpush3.bf16.msra.mxu0 %v7019_v46  ;;  %10097 = vst [vmem:[#allocation19_spill] sm:$0xff] %v8874_v5  ;;  %v7012_v46 = vld [vmem:[#allocation2 + $0x90] sm:$0xff]   ;;  %v8883_v36 = vpop.f32.mrf.mxu0  ;;  %v4476_v26 = vor.u32 %v4475_v7, %v4472_v14  ;;  %v4510_v47 = vor.u32 %v4509_v19, %v8885_v15  ;;  %v6127_v54 = vrot.slane %v5106_v55, 9 }
 0x189   : > { %6787 = vmatprep.subr.bf16.mxu0 %v7023_v49  ;;  %10098 = vst [vmem:[#allocation24_spill] sm:$0xff] %v8883_v36  ;;  %v4364_v5 = vld [vmem:[#allocation2 + $0x54] sm:$0xf]  ;;  %v5190_v36 = vrot.slane %v8816_v43, 5  ;;  %v8904_v10 = vpop.f32.mrf.mxu1  ;;  %v10101_v43 = vcombine.low %v8623_v61, %v8632_v28  ;;  %v4500_v20 = vor.u32 %v4499_v3, %v4496_v39  ;;  %v4531_v61 = vshrl.u32 %v8899_v52, 16 }
 0x18a   : > { %6736 = vmatpush3.bf16.msra.mxu1 %v7014_v32  ;;  %v4489_v32 = vshll.u32 %v8870_v9, 16  ;;  %10100 = vst [vmem:[#allocation26_spill] sm:$0xff] %v8904_v10  ;;  %v4518_v57 = vshrl.u32 %v4364_v5, 16  ;;  %v4521_v14 = vshll.u32 %v4364_v5, 16  ;;  %v8915_v7 = vpop.f32.mrf.mxu0  ;;  %v5197_v10 = vrot.slane %v8844_v42, 5 }
 0x18b   : > { %6737 = vmatprep.subr.bf16.mxu1 %v7018_v45  ;;  %10102 = vst [vmem:[#allocation29_spill] sm:$0xff] %v8915_v7  ;;  %v4527_v5 = vshll.u32 %v8899_v52, 16  ;;  %v4477_v28 = vrot.slane %v4476_v26, 4  ;;  %v5193_v39 = vrot.slane %v8870_v9, 5  ;;  %v8923_v3 = vpop.f32.mrf.mxu1  ;;  %v5200_v7 = vrot.slane %v8895_v17, 5  ;;  %v7013_v26 = vld [vmem:[#allocation2 + $0x9c] sm:$0xff]  }
 0x18c   : > { %6788 = vmatpush3.bf16.msra.mxu0 %v7023_v49  ;;  %v8910_v49 = vrot.slane %v4462_v51, 4  ;;  %v4491_v51 = vrot.slane %v4489_v32, 5  ;;  %10103 = vst [vmem:[#allocation28_spill] sm:$0xff] %v8923_v3  ;;  %v4520_v42 = vrot.slane %v4518_v57, 4  ;;  %v8926_v1 = vpop.f32.mrf.mxu0  ;;  %v4501_v32 = vrot.slane %v4500_v20, 4 }
 0x18d   : > { %6658 = vmatmul.mubr.bf16.gmra.mxu1 %v10099_v53  ;;  %v5107_v53 = vld [vmem:[#allocation2 + $0x48] sm:$0xe]  ;;  %10104 = vst [vmem:[#allocation30_spill] sm:$0xff] %v8926_v1  ;;  %v4511_v55 = vrot.slane %v4510_v47, 4  ;;  %v4515_v23 = vrot.slane %v4513_v4, 5  ;;  %v5199_v34 = vrot.slane %v5197_v10, 4  ;;  %v4482_v20 = vsel %vm7395_vm9, %v4477_v28, %v8872_v16 }
 0x18e   : > { %6661 = vmatprep.mubr.bf16.mxu1 %v10101_v43  ;;  %6738 = vmatpush3.bf16.msra.mxu1 %v7018_v45  ;;  %v4487_v43 = vrot.slane %v4486_v12, 4  ;;  %v5192_v45 = vrot.slane %v5190_v36, 4  ;;  %v6128_v19 = vrot.slane %v5107_v53, 9  ;;  %v4468_v9 = vsel %vm7395_vm9, %v8910_v49, %v8887_v8  ;;  %v8936_v17 = vld [vmem:[#allocation2 + $0x5c] sm:$0x1]  ;;  %v8958_v53 = vpop.f32.mrf.mxu1 }
 0x18f   : > { %6710 = vmatmul.mubr.bf16.gmra.mxu0 %v7009_v60  ;;  %6739 = vmatprep.subr.bf16.mxu1 %v7022_v30  ;;  %v4523_v60 = vrot.slane %v4521_v14, 5  ;;  %v8934_v12 = vsel %vm7765_vm14, %v5185_v48, %v5186_v22  ;;  %v8938_v57 = vrot.slane %v4527_v5, 5  ;;  %v7016_v14 = vld [vmem:[#allocation2 + $0xa8] sm:$0xff]   ;;  %v8947_v8 = vsel %vm7765_vm14, %v6127_v54, %v5190_v36  ;;  %v5108_v48 = vld [vmem:[#allocation2 + $0x54] sm:$0xe]  ;;  %10106 = vst [vmem:[#allocation33_spill] sm:$0xff] %v8958_v53 }
 0x190   : > { %6713 = vmatprep.mubr.bf16.mxu0 %v7012_v46  ;;  %v4367_v46 = vld [vmem:[#allocation2 + $0x60] sm:$0xf]  ;;  %v4492_v47 = vsel %vm7395_vm9, %v4487_v43, %v4491_v51  ;;  %v8951_v22 = vsel %vm7765_vm14, %v5192_v45, %v5193_v39  ;;  %v8953_v49 = vld [vmem:[#allocation2 + $0x64] sm:$0xf]  ;;  %v10105_v4 = vcombine.low %v8636_v33, %v8642_v58  ;;  %v8962_v16 = vsel %vm7765_vm14, %v6128_v19, %v5197_v10  ;;  %v8993_v39 = vld [vmem:[#allocation2 + $0x68] sm:$0x1] }
 0x191   : > { %v4524_v51 = vor.u32 %v4523_v60, %v4520_v42  ;;  %v4542_v36 = vshrl.u32 %v4367_v46, 16  ;;  %v4545_v54 = vshll.u32 %v4367_v46, 16  ;;  %v10107_v5 = vcombine.low %v8654_v41, %v8659_v6  ;;  %v7017_v42 = vld [vmem:[#allocation2 + $0xb4] sm:$0xff]  }
 0x192   : > { %6740 = vmatpush3.bf16.msra.mxu1 %v7022_v30  ;;  %v4533_v30 = vrot.slane %v4531_v61, 4  ;;  %v8967_v61 = vpop.f32.mrf.mxu0  ;;  %v4506_v33 = vsel %vm7395_vm9, %v4501_v32, %v8885_v15  ;;  %v4516_v58 = vsel %vm7395_vm9, %v4511_v55, %v4515_v23  ;;  %v8976_v10 = vsel %vm7765_vm14, %v5199_v34, %v5200_v7  ;;  %v4370_v55 = vld [vmem:[#allocation2 + $0x6c] sm:$0xf] }
 0x193   : > { %10108 = vst [vmem:[#allocation31_spill] sm:$0xff] %v8967_v61  ;;  %v4537_v28 = vshll.u32 %v8936_v17, 16  ;;  %v6129_v41 = vrot.slane %v5108_v48, 9  ;;  %v5204_v6 = vrot.slane %v8899_v52, 5  ;;  %v4551_v45 = vshll.u32 %v8953_v49, 16  ;;  %v8996_v52 = vpop.f32.mrf.mxu1  ;;  %v7020_v48 = vld [vmem:[#allocation2 + $0xc0] sm:$0xff]  }
 0x194   : > { %v4534_v43 = vor.u32 %v4533_v30, %v8938_v57  ;;  %v10109_v23 = vsel %vm7395_vm9, %v8880_v25, %v8857_v2  ;;  %v8991_v7 = vcombine.low %v4482_v20, %v4492_v47  ;;  %v4555_v19 = vshrl.u32 %v8953_v49, 16  ;;  %10110 = vst [vmem:[#allocation34_spill] sm:$0xff] %v8996_v52  ;;  %v9002_v46 = vpop.f32.mrf.mxu0  ;;  %v9011_v20 = vld [vmem:[#allocation2 + $0x70] sm:$0xf]  ;;  %v4373_v47 = vld [vmem:[#allocation2 + $0x78] sm:$0xf] }
 0x195   : > { %6662 = vmatmul.mubr.bf16.gmra.mxu1 %v10105_v4  ;;  %v8987_v15 = vcombine.low %v10109_v23, %v4468_v9  ;;  %v9000_v32 = vrot.slane %v4524_v51, 4  ;;  %v4544_v2 = vrot.slane %v4542_v36, 4  ;;  %v4547_v25 = vrot.slane %v4545_v54, 5  ;;  %10111 = vst [vmem:[#allocation32_spill] sm:$0xff] %v9002_v46  ;;  %v4376_v52 = vld [vmem:[#allocation2 + $0x84] sm:$0xf] }
 0x196   : > { %6665 = vmatprep.mubr.bf16.mxu1 %v10107_v5  ;;  %v9008_v30 = vrot.slane %v4537_v28, 5  ;;  %v9013_v4 = vrot.slane %v4534_v43, 4  ;;  %v9017_v51 = vsel %vm7765_vm14, %v6129_v41, %v5204_v6  ;;  %v5206_v36 = vrot.slane %v5204_v6, 4  ;;  %v9021_v5 = vld [vmem:[#allocation2 + $0x7c] sm:$0xf]  ;;  %v9027_v43 = vpop.f32.mrf.mxu1 }
 0x197   : > { %6714 = vmatmul.mubr.bf16.gmra.mxu0 %v7013_v26  ;;  %v9004_v26 = vcombine.low %v4506_v33, %v4516_v58  ;;  %v9019_v54 = vrot.slane %v4551_v45, 5  ;;  %v4557_v33 = vrot.slane %v4555_v19, 4  ;;  %v4561_v58 = vshll.u32 %v8993_v39, 16  ;;  %v5109_v28 = vld [vmem:[#allocation2 + $0x60] sm:$0xe]  ;;  %10114 = vst [vmem:[#allocation36_spill] sm:$0xff] %v9027_v43 }
 0x198   : > { %6717 = vmatprep.mubr.bf16.mxu0 %v7016_v14  ;;  %v5207_v14 = vrot.slane %v8936_v17, 5  ;;  %v4566_v17 = vshrl.u32 %v4370_v55, 16  ;;  %v4569_v23 = vshll.u32 %v4370_v55, 16  ;;  %v10113_v9 = vcombine.low %v8666_v27, %v8670_v11  ;;  %v9038_v55 = vpop.f32.mrf.mxu0  ;;  %v9056_v53 = vpop.f32.mrf.mxu1  ;;  %v5110_v61 = vld [vmem:[#allocation2 + $0x6c] sm:$0xe] }
 0x199   : > { %10112 = vst [vmem:[#allocation35_spill] sm:$0xff] %v9004_v26  ;;  %v4548_v6 = vor.u32 %v4547_v25, %v4544_v2  ;;  %v4575_v45 = vshll.u32 %v9011_v20, 16  ;;  %v4579_v19 = vshrl.u32 %v9011_v20, 16  ;;  %v10115_v60 = vcombine.low %v8678_v59, %v8682_v31  ;;  %10116 = vst [vmem:[#allocation20_spill] sm:$0xff] %v9038_v55  ;;  %v7021_v55 = vld [vmem:[#allocation2 + $0xcc] sm:$0xff]  }
 0x19a   : > { %v4590_v27 = vshrl.u32 %v4373_v47, 16  ;;  %v4593_v11 = vshll.u32 %v4373_v47, 16  ;;  %v4603_v34 = vshrl.u32 %v9021_v5, 16  ;;  %v9048_v25 = vsel %vm7765_vm14, %v5206_v36, %v5207_v14  ;;  %10117 = vst [vmem:[#allocation21_spill] sm:$0xff] %v9056_v53  ;;  %v9065_v3 = vpop.f32.mrf.mxu0 }
 0x19b   : > { %v6130_v59 = vrot.slane %v5109_v28, 9  ;;  %v5211_v31 = vrot.slane %v8953_v49, 5  ;;  %v4558_v47 = vor.u32 %v4557_v33, %v9019_v54  ;;  %v9054_v41 = vrot.slane %v4561_v58, 5  ;;  %v9063_v49 = vld [vmem:[#allocation2 + $0x88] sm:$0xf]  ;;  %10118 = vst [vmem:[#allocation38_spill] sm:$0xff] %v9065_v3 }
 0x19c   : > { %v4571_v43 = vrot.slane %v4569_v23, 5  ;;  %v9058_v2 = vrot.slane %v4548_v6, 4  ;;  %v5214_v14 = vrot.slane %v8993_v39, 5  ;;  %v9061_v36 = vrot.slane %v4575_v45, 5 }
 0x19d   : > { %6666 = vmatmul.mubr.bf16.gmra.mxu1 %v10113_v9  ;;  %v4599_v9 = vshll.u32 %v9021_v5, 16  ;;  %v4581_v28 = vrot.slane %v4579_v19, 4  ;;  %v4592_v33 = vrot.slane %v4590_v27, 4  ;;  %v4595_v58 = vrot.slane %v4593_v11, 5 }
 0x19e   : > { %6669 = vmatprep.mubr.bf16.mxu1 %v10115_v60  ;;  %v9051_v60 = vld [vmem:[#allocation2 + $0x74] sm:$0x1]  ;;  %v4605_v23 = vrot.slane %v4603_v34, 4  ;;  %v9073_v6 = vsel %vm7765_vm14, %v6130_v59, %v5211_v31  ;;  %v4614_v45 = vshrl.u32 %v4376_v52, 16  ;;  %v4617_v19 = vshll.u32 %v4376_v52, 16  ;;  %v9081_v34 = vpop.f32.mrf.mxu1 }
 0x19f   : > { %6718 = vmatmul.mubr.bf16.gmra.mxu0 %v7017_v42  ;;  %v4568_v42 = vrot.slane %v4566_v17, 4  ;;  %v9069_v17 = vrot.slane %v4599_v9, 5  ;;  %v4585_v39 = vshll.u32 %v9051_v60, 16  ;;  %v5213_v53 = vrot.slane %v5211_v31, 4  ;;  %10120 = vst [vmem:[#allocation37_spill] sm:$0xff] %v9081_v34 }
 0x1a0   : > { %6721 = vmatprep.mubr.bf16.mxu0 %v7020_v48  ;;  %v9067_v48 = vld [vmem:[#allocation2 + $0x80] sm:$0x1]  ;;  %v4623_v3 = vshll.u32 %v9063_v49, 16  ;;  %v4627_v27 = vshrl.u32 %v9063_v49, 16  ;;  %v10119_v11 = vcombine.low %v8701_v21, %v8706_v38  ;;  %v9083_v9 = vrot.slane %v4558_v47, 4 }
 0x1a1   : > { %v4572_v46 = vor.u32 %v4571_v43, %v4568_v42  ;;  %v4582_v59 = vor.u32 %v4581_v28, %v9061_v36  ;;  %v5218_v1 = vrot.slane %v9011_v20, 5  ;;  %v4609_v52 = vshll.u32 %v9067_v48, 16  ;;  %v5111_v42 = vld [vmem:[#allocation2 + $0x78] sm:$0xe]  ;;  %v4379_v21 = vld [vmem:[#allocation2 + $0x90] sm:$0xf] }
 0x1a2   : > { %v10121_v43 = vcombine.low %v8719_v63, %v8713_v29  ;;  %v4596_v38 = vor.u32 %v4595_v58, %v4592_v33  ;;  %v4606_v47 = vor.u32 %v4605_v23, %v9069_v17  ;;  %v5225_v28 = vrot.slane %v9021_v5, 5  ;;  %v9107_v58 = vld [vmem:[#allocation2 + $0x8c] sm:$0x1] }
 0x1a3   : > { %v9099_v20 = vrot.slane %v4585_v39, 5  ;;  %v4616_v34 = vrot.slane %v4614_v45, 4  ;;  %v4619_v29 = vrot.slane %v4617_v19, 5  ;;  %v5221_v33 = vrot.slane %v9051_v60, 5 }
 0x1a4   : > { %v9109_v23 = vrot.slane %v4623_v3, 5  ;;  %v4629_v5 = vrot.slane %v4627_v27, 4  ;;  %v4583_v39 = vrot.slane %v4582_v59, 4  ;;  %v4611_v45 = vrot.slane %v4609_v52, 5 }
 0x1a5   : > { %6670 = vmatmul.mubr.bf16.gmra.mxu1 %v10119_v11  ;;  %v9091_v31 = vpop.f32.mrf.mxu0  ;;  %v6131_v11 = vrot.slane %v5110_v61, 9  ;;  %v5220_v61 = vrot.slane %v5218_v1, 4  ;;  %v6132_v19 = vrot.slane %v5111_v42, 9  ;;  %v4597_v26 = vrot.slane %v4596_v38, 4 }
 0x1a6   : > { %6673 = vmatprep.mubr.bf16.mxu1 %v10121_v43  ;;  %10122 = vst [vmem:[#allocation39_spill] sm:$0xff] %v9091_v31  ;;  %v10124_v43 = vcombine.low %v8797_v0, %v8801_v56  ;;  %v4573_v31 = vrot.slane %v4572_v46, 4  ;;  %v4607_v0 = vrot.slane %v4606_v47, 4  ;;  %v5227_v56 = vrot.slane %v5225_v28, 4  ;;  %v5112_v47 = vld [vmem:[#allocation2 + $0x84] sm:$0xe] }
 0x1a7   : > { %6722 = vmatmul.mubr.bf16.gmra.mxu0 %v7021_v55  ;;  %v9101_v63 = vpop.f32.mrf.mxu0  ;;  %v9111_v55 = vpop.f32.mrf.mxu1  ;;  %v5228_v46 = vrot.slane %v9067_v48, 5  ;;  %v4564_v3 = vsel %vm7395_vm9, %v9083_v9, %v9054_v41  ;;  %v9122_v60 = vsel %vm7765_vm14, %v5213_v53, %v5214_v14  ;;  %v4620_v27 = vor.u32 %v4619_v29, %v4616_v34 }
 0x1a8   : > { %10123 = vst [vmem:[#allocation40_spill] sm:$0xff] %v9101_v63  ;;  %6789 = vmatprep.mubr.bf16.mxu0 %v10124_v43  ;;  %10125 = vst [vmem:[#allocation41_spill] sm:$0xff] %v9111_v55  ;;  %v4633_v59 = vshll.u32 %v9107_v58, 16  ;;  %v4630_v38 = vor.u32 %v4629_v5, %v9109_v23  ;;  %v5232_v42 = vrot.slane %v9063_v49, 5  ;;  %v4638_v48 = vshrl.u32 %v4379_v21, 16 }
 0x1a9   : > { %v9113_v63 = vpop.f32.mrf.mxu0  ;;  %v4641_v43 = vshll.u32 %v4379_v21, 16  ;;  %v10126_v41 = vcombine.low %v8729_v13, %v8725_v40  ;;  %v4578_v53 = vsel %vm7395_vm9, %v4573_v31, %v9061_v36  ;;  %v4588_v14 = vsel %vm7395_vm9, %v4583_v39, %v9099_v20  ;;  %v9173_v39 = vld [vmem:[#allocation2 + $0x98] sm:$0x1] }
 0x1aa   : > { %v9142_v34 = vsel %vm7765_vm14, %v6131_v11, %v5218_v1  ;;  %v9146_v49 = vsel %vm7765_vm14, %v5220_v61, %v5221_v33  ;;  %v4602_v13 = vsel %vm7395_vm9, %v4597_v26, %v9069_v17  ;;  %v4612_v36 = vsel %vm7395_vm9, %v4607_v0, %v4611_v45  ;;  %v9168_v11 = vld [vmem:[#allocation2 + $0x94] sm:$0xf] }
 0x1ab   : > { %v9125_v52 = vpop.f32.mrf.mxu0  ;;  %v9156_v9 = vsel %vm7765_vm14, %v6132_v19, %v5225_v28  ;;  %v9160_v1 = vsel %vm7765_vm14, %v5227_v56, %v5228_v46  ;;  %v4621_v21 = vrot.slane %v4620_v27, 4  ;;  %v4635_v20 = vrot.slane %v4633_v59, 5  ;;  %v4382_v27 = vld [vmem:[#allocation2 + $0x9c] sm:$0xf]  ;;  %v9206_v59 = vld [vmem:[#allocation2 + $0xa0] sm:$0xf] }
 0x1ac   : > { %v9129_v55 = vpop.f32.mrf.mxu1  ;;  %v6133_v26 = vrot.slane %v5112_v47, 9  ;;  %v5235_v17 = vrot.slane %v9107_v58, 5  ;;  %v10128_v28 = vcombine.low %v8891_v24, %v8934_v12  ;;  %v4631_v33 = vrot.slane %v4630_v38, 4 }
 0x1ad   : > { %6674 = vmatmul.mubr.bf16.gmra.mxu1 %v10126_v41  ;;  %v6503_v40 = vpop.f32.mrf.mxu0  ;;  %v5234_v5 = vrot.slane %v5232_v42, 4  ;;  %v4640_v61 = vrot.slane %v4638_v48, 4  ;;  %v4643_v45 = vrot.slane %v4641_v43, 5  ;;  %v10130_v58 = vsel %vm7395_vm9, %v9000_v32, %v8938_v57 }
 0x1ae   : > { %6741 = vmatprep.mubr.bf16.mxu1 %v8866_v50  ;;  %v9162_v31 = vpop.f32.mrf.mxu1  ;;  %v10127_v50 = vcombine.low %v8836_v18, %v8840_v62  ;;  %v10129_v62 = vsel %vm7395_vm9, %v9013_v4, %v9008_v30  ;;  %v10131_v19 = vsel %vm7395_vm9, %v9058_v2, %v9019_v54  ;;  %v9200_v56 = vcombine.low %v4578_v53, %v4588_v14 }
 0x1af   : > { %v2165_v29 = vpop.f32.mrf.mxu0  ;;  %v9187_v24 = vcombine.low %v10130_v58, %v10129_v62  ;;  %v9196_v0 = vcombine.low %v10131_v19, %v4564_v3  ;;  %v4647_v32 = vshll.u32 %v9168_v11, 16  ;;  %v4651_v46 = vshrl.u32 %v9168_v11, 16  ;;  %v10132_v62 = vld [vmem:[#allocation15_spill] sm:$0xff]  ;;  %v10168_v35 = vld [vmem:[#allocation41_spill] sm:$0xff] }
 0x1b0   : > { %6790 = vmatmul.mubr.bf16.vlgmr.msra.gmra.mxu0 %v10127_v50  ;;  %v9175_v18 = vpop.f32.mrf.mxu1  ;;  %v9210_v54 = vcombine.low %v4602_v13, %v4612_v36  ;;  %v9216_v3 = vsel %vm7765_vm14, %v6133_v26, %v5232_v42  ;;  %v4657_v47 = vshll.u32 %v9173_v39, 16  ;;  %v4626_v43 = vsel %vm7395_vm9, %v4621_v21, %v9109_v23  ;;  %v5113_v13 = vld [vmem:[#allocation2 + $0x90] sm:$0xe] }
 0x1b1   : > { %6793 = vmatprep.mubr.bf16.mxu0 %v10128_v28  ;;  %v6504_v4 = vpop.f32.mrf.mxu0  ;;  %v4636_v41 = vsel %vm7395_vm9, %v4631_v33, %v4635_v20  ;;  %v9226_v53 = vsel %vm7765_vm14, %v5234_v5, %v5235_v17  ;;  %v4644_v14 = vor.u32 %v4643_v45, %v4640_v61  ;;  %v4662_v42 = vshrl.u32 %v4382_v27, 16 }
 0x1b2   : > { %v9208_v38 = vpop.f32.mrf.mxu1  ;;  %v4665_v50 = vshll.u32 %v4382_v27, 16  ;;  %v4671_v26 = vshll.u32 %v9206_v59, 16  ;;  %v4675_v28 = vshrl.u32 %v9206_v59, 16  ;;  %v9233_v21 = vrot.slane %v4647_v32, 5  ;;  %v10134_v32 = vld [vmem:[#allocation16_spill] sm:$0xff] }
 0x1b3   : > { %v2168_v48 = vpop.f32.mrf.mxu0  ;;  %v4653_v20 = vrot.slane %v4651_v46, 4  ;;  %v5239_v17 = vrot.slane %v9168_v11, 5  ;;  %v9239_v61 = vcombine.low %v4626_v43, %v4636_v41  ;;  %v9243_v58 = vrot.slane %v4657_v47, 5  ;;  %v9254_v43 = vld [vmem:[#allocation2 + $0xac] sm:$0xf] }
 0x1b4   : > { %v6455_v36 = vpop.f32.mrf.mxu1  ;;  %v6134_v19 = vrot.slane %v5113_v13, 9  ;;  %v10135_v11 = vcombine.low %v8962_v16, %v8976_v10  ;;  %v9251_v27 = vrot.slane %v4644_v14, 4  ;;  %v9256_v47 = vld [vmem:[#allocation2 + $0xa4] sm:$0x1]  ;;  %v4664_v13 = vrot.slane %v4662_v42, 4  ;;  %v10136_v16 = vld [vmem:[#allocation23_spill] sm:$0xff] }
 0x1b5   : > { %6742 = vmatmul.mubr.bf16.vlgmr.msra.gmra.mxu1 %v8876_v44  ;;  %v1721_v23 = vadd.f32 %v6455_v36, %v10132_v62  ;;  %v10133_v44 = vcombine.low %v8947_v8, %v8951_v22  ;;  %v5242_v8 = vrot.slane %v9173_v39, 5  ;;  %v4385_v22 = vld [vmem:[#allocation2 + $0xa8] sm:$0xf]  ;;  %v9258_v62 = vrot.slane %v4671_v26, 5 }
 0x1b6   : > { %6745 = vmatprep.mubr.bf16.mxu1 %v8987_v15  ;;  %v1712_v33 = vpop.f32.mrf.mxu1  ;;  %v6507_v5 = vpop.f32.mrf.mxu0  ;;  %v4654_v14 = vor.u32 %v4653_v20, %v9233_v21  ;;  %v4689_v45 = vshll.u32 %v4385_v22, 16  ;;  %v4695_v2 = vshll.u32 %v9254_v43, 16  ;;  %v4699_v57 = vshrl.u32 %v9254_v43, 16 }
 0x1b7   : > { %v9245_v15 = vadd.f32 %v6503_v40, %v1721_v23  ;;  %v1713_v46 = vadd.f32 %v1712_v33, %v10134_v32  ;;  %v4667_v40 = vrot.slane %v4665_v50, 5  ;;  %v4677_v23 = vrot.slane %v4675_v28, 4  ;;  %v10138_v50 = vld [vmem:[#allocation18_spill] sm:$0xff] }
 0x1b8   : > { %6794 = vmatmul.mubr.bf16.gmra.mxu0 %v10133_v44  ;;  %v6456_v41 = vpop.f32.mrf.mxu1  ;;  %v2181_v36 = vpop.f32.mrf.mxu0  ;;  %v5241_v44 = vrot.slane %v5239_v17, 4  ;;  %v4681_v28 = vshll.u32 %v9256_v47, 16  ;;  %v9285_v30 = vrot.slane %v4654_v14, 4  ;;  %v10143_v14 = vld [vmem:[#allocation24_spill] sm:$0xff] }
 0x1b9   : > { %6797 = vmatprep.mubr.bf16.mxu0 %v10135_v11  ;;  %v9260_v33 = vadd.f32 %v2165_v29, %v1713_v46  ;;  %v1724_v10 = vadd.f32 %v6456_v41, %v10136_v16  ;;  %v4686_v11 = vshrl.u32 %v4385_v22, 16  ;;  %v9271_v29 = vsel %vm7765_vm14, %v6134_v19, %v5239_v17  ;;  %v5114_v16 = vld [vmem:[#allocation2 + $0x9c] sm:$0xe] }
 0x1ba   : > { %v1715_v39 = vpop.f32.mrf.mxu1  ;;  %v6508_v32 = vpop.f32.mrf.mxu0  ;;  %v4668_v41 = vor.u32 %v4667_v40, %v4664_v13  ;;  %v10140_v17 = vld [vmem:[#allocation27_spill] sm:$0xff]  ;;  %v10142_v13 = vcombine.low %v9017_v51, %v9048_v25  ;;  %v9294_v40 = vld [vmem:[#allocation2 + $0xb0] sm:$0x1] }
 0x1bb   : > { %v9266_v42 = vadd.f32 %v6504_v4, %v1724_v10  ;;  %v1716_v26 = vadd.f32 %v1715_v39, %v10138_v50  ;;  %v4678_v4 = vor.u32 %v4677_v23, %v9258_v62  ;;  %v5246_v10 = vrot.slane %v9206_v59, 5  ;;  %v10141_v50 = vld [vmem:[#allocation35_spill] sm:$0xff] }
 0x1bc   : > { %v6459_v20 = vpop.f32.mrf.mxu1  ;;  %v2184_v46 = vpop.f32.mrf.mxu0  ;;  %v4688_v59 = vrot.slane %v4686_v11, 4  ;;  %v9296_v23 = vrot.slane %v4695_v2, 5  ;;  %v4669_v25 = vrot.slane %v4668_v41, 4  ;;  %v4388_v2 = vld [vmem:[#allocation2 + $0xb4] sm:$0xf] }
 0x1bd   : > { %10137 = vst [vmem:[#allocation15_spill] sm:$0xff] %v9266_v42  ;;  %6746 = vmatmul.mubr.bf16.gmra.mxu1 %v8991_v7  ;;  %v9281_v39 = vadd.f32 %v2168_v48, %v1716_v26  ;;  %v1737_v19 = vadd.f32 %v6459_v20, %v10140_v17  ;;  %v9289_v7 = vsel %vm7765_vm14, %v5241_v44, %v5242_v8  ;;  %v4691_v48 = vrot.slane %v4689_v45, 5 }
 0x1be   : > { %6749 = vmatprep.mubr.bf16.mxu1 %v10141_v50  ;;  %v1728_v12 = vpop.f32.mrf.mxu1  ;;  %v6511_v22 = vpop.f32.mrf.mxu0  ;;  %v4701_v26 = vrot.slane %v4699_v57, 4  ;;  %v10144_v8 = vcombine.low %v9073_v6, %v9122_v60  ;;  %v4683_v44 = vrot.slane %v4681_v28, 5  ;;  %v6135_v50 = vrot.slane %v5114_v16, 9  ;;  %v10145_v57 = vld [vmem:[#allocation29_spill] sm:$0xff]  ;;  %v5115_v16 = vld [vmem:[#allocation2 + $0xa8] sm:$0xe] }
 0x1bf   : > { %10139 = vst [vmem:[#allocation16_spill] sm:$0xff] %v9281_v39  ;;  %v9298_v20 = vadd.f32 %v6507_v5, %v1737_v19  ;;  %v1729_v17 = vadd.f32 %v1728_v12, %v10143_v14  ;;  %v5248_v42 = vrot.slane %v5246_v10, 4  ;;  %v5249_v45 = vrot.slane %v9256_v47, 5 }
 0x1c0   : > { %6798 = vmatmul.mubr.bf16.gmra.mxu0 %v10142_v13  ;;  %v6460_v39 = vpop.f32.mrf.mxu1  ;;  %v2197_v51 = vpop.f32.mrf.mxu0  ;;  %v4679_v13 = vrot.slane %v4678_v4, 4  ;;  %v4660_v6 = vsel %vm7395_vm9, %v9285_v30, %v9243_v58  ;;  %v4705_v60 = vshll.u32 %v9294_v40, 16  ;;  %v6150_v41 = vcombine.low %v9271_v29, %v9289_v7 }
 0x1c1   : > { %6801 = vmatprep.mubr.bf16.mxu0 %v10144_v8  ;;  %v9305_v11 = vadd.f32 %v2181_v36, %v1729_v17  ;;  %v1740_v5 = vadd.f32 %v6460_v39, %v10145_v57  ;;  %v4692_v4 = vor.u32 %v4691_v48, %v4688_v59  ;;  %v4702_v47 = vor.u32 %v4701_v26, %v9296_v23  ;;  %v10146_v39 = vld [vmem:[#allocation30_spill] sm:$0xff]  ;;  %v10147_v26 = vld [vmem:[#allocation31_spill] sm:$0xff] }
 0x1c2   : > { %v1731_v12 = vpop.f32.mrf.mxu1  ;;  %v6512_v28 = vpop.f32.mrf.mxu0  ;;  %v5253_v36 = vrot.slane %v9254_v43, 5  ;;  %v4710_v17 = vshrl.u32 %v4388_v2, 16  ;;  %v4713_v8 = vshll.u32 %v4388_v2, 16  ;;  %v4674_v57 = vsel %vm7395_vm9, %v4669_v25, %v9258_v62  ;;  %v9338_v62 = vld [vmem:[#allocation2 + $0xb8] sm:$0xf] }
 0x1c3   : > { %v9317_v19 = vadd.f32 %v6508_v32, %v1740_v5  ;;  %v1732_v14 = vadd.f32 %v1731_v12, %v10146_v39  ;;  %v4684_v59 = vsel %vm7395_vm9, %v4679_v13, %v4683_v44  ;;  %v9328_v43 = vsel %vm7765_vm14, %v6135_v50, %v5246_v10  ;;  %v10149_v12 = vld [vmem:[#allocation32_spill] sm:$0xff] }
 0x1c4   : > { %v6463_v30 = vpop.f32.mrf.mxu1  ;;  %v2200_v58 = vpop.f32.mrf.mxu0  ;;  %v9332_v32 = vsel %vm7765_vm14, %v5248_v42, %v5249_v45  ;;  %v4707_v2 = vrot.slane %v4705_v60, 5  ;;  %v6136_v5 = vrot.slane %v5115_v16, 9  ;;  %v10148_v10 = vcombine.low %v9142_v34, %v9146_v49 }
 0x1c5   : > { %6750 = vmatmul.mubr.bf16.gmra.mxu1 %v9187_v24  ;;  %v9334_v48 = vadd.f32 %v2184_v46, %v1732_v14  ;;  %v1753_v24 = vadd.f32 %v6463_v30, %v10147_v26  ;;  %v4693_v50 = vrot.slane %v4692_v4, 4  ;;  %v4703_v13 = vrot.slane %v4702_v47, 4  ;;  %v4391_v14 = vld [vmem:[#allocation2 + $0xc0] sm:$0xf]  ;;  %v10152_v4 = vld [vmem:[#allocation20_spill] sm:$0xff] }
 0x1c6   : > { %6753 = vmatprep.mubr.bf16.mxu1 %v9196_v0  ;;  %v1744_v25 = vpop.f32.mrf.mxu1  ;;  %v6515_v44 = vpop.f32.mrf.mxu0  ;;  %v5255_v42 = vrot.slane %v5253_v36, 4  ;;  %v5256_v46 = vrot.slane %v9294_v40, 5  ;;  %v10150_v0 = vcombine.low %v9156_v9, %v9160_v1  ;;  %v4712_v60 = vrot.slane %v4710_v17, 4 }
 0x1c7   : > { %v9344_v45 = vadd.f32 %v6511_v22, %v1753_v24  ;;  %v1745_v39 = vadd.f32 %v1744_v25, %v10149_v12  ;;  %v4715_v16 = vrot.slane %v4713_v8, 5  ;;  %v10151_v34 = vsel %vm7395_vm9, %v9251_v27, %v9233_v21  ;;  %v9370_v21 = vld [vmem:[#allocation2 + $0xc4] sm:$0xf]  ;;  %v9377_v25 = vld [vmem:[#allocation2 + $0xbc] sm:$0x1]  ;;  %v10153_v12 = vld [vmem:[#allocation38_spill] sm:$0xff] }
 0x1c8   : > { %6802 = vmatmul.mubr.bf16.gmra.mxu0 %v10148_v10  ;;  %v6464_v30 = vpop.f32.mrf.mxu1  ;;  %v2213_v26 = vpop.f32.mrf.mxu0  ;;  %v9355_v49 = vcombine.low %v10151_v34, %v4660_v6  ;;  %v6151_v22 = vcombine.low %v9328_v43, %v9332_v32  ;;  %v4719_v40 = vshll.u32 %v9338_v62, 16  ;;  %v4723_v9 = vshrl.u32 %v9338_v62, 16  ;;  %v10154_v34 = vld [vmem:[#allocation39_spill] sm:$0xff] }
 0x1c9   : > { %6805 = vmatprep.mubr.bf16.mxu0 %v10150_v0  ;;  %v9361_v1 = vadd.f32 %v2197_v51, %v1745_v39  ;;  %v1756_v47 = vadd.f32 %v6464_v30, %v10152_v4  ;;  %v9364_v17 = vcombine.low %v4674_v57, %v4684_v59  ;;  %v9368_v8 = vsel %vm7765_vm14, %v6136_v5, %v5253_v36  ;;  %v5116_v0 = vld [vmem:[#allocation2 + $0xb4] sm:$0xe] }
 0x1ca   : > { %v1747_v27 = vpop.f32.mrf.mxu1  ;;  %v6516_v6 = vpop.f32.mrf.mxu0  ;;  %v4698_v24 = vsel %vm7395_vm9, %v4693_v50, %v9296_v23  ;;  %v4708_v51 = vsel %vm7395_vm9, %v4703_v13, %v4707_v2  ;;  %v4734_v10 = vshrl.u32 %v4391_v14, 16  ;;  %v4737_v57 = vshll.u32 %v4391_v14, 16 }
 0x1cb   : > { %v9379_v59 = vadd.f32 %v6512_v28, %v1756_v47  ;;  %v1748_v36 = vadd.f32 %v1747_v27, %v10153_v12  ;;  %v9384_v5 = vsel %vm7765_vm14, %v5255_v42, %v5256_v46  ;;  %v4716_v39 = vor.u32 %v4715_v16, %v4712_v60  ;;  %v10156_v12 = vld [vmem:[#allocation40_spill] sm:$0xff] }
 0x1cc   : > { %v6467_v30 = vpop.f32.mrf.mxu1  ;;  %v2216_v23 = vpop.f32.mrf.mxu0  ;;  %v9387_v50 = vrot.slane %v4719_v40, 5  ;;  %v4725_v2 = vrot.slane %v4723_v9, 4  ;;  %v4743_v13 = vshll.u32 %v9370_v21, 16  ;;  %v4747_v28 = vshrl.u32 %v9370_v21, 16 }
 0x1cd   : > { %6754 = vmatmul.mubr.bf16.gmra.mxu1 %v9200_v56  ;;  %v9391_v14 = vadd.f32 %v2200_v58, %v1748_v36  ;;  %v1769_v4 = vadd.f32 %v6467_v30, %v10154_v34  ;;  %v9395_v42 = vcombine.low %v4698_v24, %v4708_v51  ;;  %v4729_v46 = vshll.u32 %v9377_v25, 16  ;;  %v5117_v24 = vld [vmem:[#allocation2 + $0xc0] sm:$0xe] }
 0x1ce   : > { %6757 = vmatprep.mubr.bf16.mxu1 %v9210_v54  ;;  %v1760_v60 = vpop.f32.mrf.mxu1  ;;  %v6519_v56 = vpop.f32.mrf.mxu0  ;;  %v10155_v16 = vcombine.low %v9216_v3, %v9226_v53  ;;  %v6137_v40 = vrot.slane %v5116_v0, 9  ;;  %v5260_v9 = vrot.slane %v9338_v62, 5  ;;  %v4736_v47 = vrot.slane %v4734_v10, 4 }
 0x1cf   : > { %v4739_v58 = vrot.slane %v4737_v57, 5  ;;  %v9402_v27 = vadd.f32 %v6515_v44, %v1769_v4  ;;  %v1761_v36 = vadd.f32 %v1760_v60, %v10156_v12  ;;  %v6152_v54 = vcombine.low %v9368_v8, %v9384_v5  ;;  %v4393_v8 = vld [vmem:[#allocation2 + $0xc8] sm:$0x1]  ;;  %v4394_v5 = vld [vmem:[#allocation2 + $0xcc] sm:$0xf] }
 0x1d0   : > { %6806 = vmatmul.mubr.bf16.gmra.mxu0 %v10155_v16  ;;  %v5267_v3 = vrot.slane %v9370_v21, 5  ;;  %v6468_v53 = vpop.f32.mrf.mxu1  ;;  %v2229_v51 = vpop.f32.mrf.mxu0  ;;  %v9411_v0 = vrot.slane %v4716_v39, 4  ;;  %v4726_v62 = vor.u32 %v4725_v2, %v9387_v50  ;;  %v9414_v44 = vrot.slane %v4743_v13, 5 }
 0x1d1   : > { %6809 = vmatprep.mubr.bf16.mxu0 %v6150_v41  ;;  %v4749_v10 = vrot.slane %v4747_v28, 4  ;;  %v9416_v57 = vadd.f32 %v2213_v26, %v1761_v36  ;;  %v1772_v29 = vadd.f32 %v6468_v53, %v9113_v63  ;;  %v9419_v7 = vrot.slane %v4729_v46, 5  ;;  %v9426_v28 = vld [vmem:[#allocation2 + $0xd0] sm:$0xf] }
 0x1d2   : > { %v5263_v41 = vrot.slane %v9377_v25, 5  ;;  %v1763_v21 = vpop.f32.mrf.mxu1  ;;  %v6520_v30 = vpop.f32.mrf.mxu0  ;;  %v9424_v39 = vsel %vm7765_vm14, %v6137_v40, %v5260_v9  ;;  %v5262_v2 = vrot.slane %v5260_v9, 4  ;;  %v4740_v13 = vor.u32 %v4739_v58, %v4736_v47  ;;  %v10157_v47 = vld [vmem:[#allocation22_spill] sm:$0xff] }
 0x1d3   : > { %v6138_v34 = vrot.slane %v5117_v24, 9  ;;  %v9428_v26 = vadd.f32 %v6516_v6, %v1772_v29  ;;  %v1764_v63 = vadd.f32 %v1763_v21, %v9125_v52  ;;  %v5269_v4 = vrot.slane %v5267_v3, 4 }
 0x1d4   : > { %v5270_v46 = vrot.slane %v4393_v8, 5  ;;  %v6471_v25 = vpop.f32.mrf.mxu1  ;;  %v2232_v60 = vpop.f32.mrf.mxu0  ;;  %v4750_v16 = vor.u32 %v4749_v10, %v9414_v44  ;;  %v4753_v12 = vshll.u32 %v4393_v8, 16  ;;  %v4758_v40 = vshrl.u32 %v4394_v5, 16 }
 0x1d5   : > { %6758 = vmatmul.mubr.bf16.gmra.mxu1 %v9239_v61  ;;  %v4761_v36 = vshll.u32 %v4394_v5, 16  ;;  %v9433_v9 = vadd.f32 %v2216_v23, %v1764_v63  ;;  %v1785_v58 = vadd.f32 %v6471_v25, %v10157_v47  ;;  %v4767_v6 = vshll.u32 %v9426_v28, 16  ;;  %v5118_v63 = vld [vmem:[#allocation2 + $0xcc] sm:$0xe] }
 0x1d6   : > { %6761 = vmatprep.mubr.bf16.mxu1 %v9355_v49  ;;  %v4771_v52 = vshrl.u32 %v9426_v28, 16  ;;  %v1776_v24 = vpop.f32.mrf.mxu1  ;;  %v6523_v53 = vpop.f32.mrf.mxu0  ;;  %v4727_v61 = vrot.slane %v4726_v62, 4  ;;  %v5264_v10 = vsel %vm7765_vm14, %v5262_v2, %v5263_v41  ;;  %v4741_v23 = vrot.slane %v4740_v13, 4  ;;  %v10158_v49 = vld [vmem:[#allocation17_spill] sm:$0xff] }
 0x1d7   : > { %v5268_v29 = vsel %vm7765_vm14, %v6138_v34, %v5267_v3  ;;  %v9446_v8 = vadd.f32 %v6519_v56, %v1785_v58  ;;  %v1777_v5 = vadd.f32 %v1776_v24, %v10158_v49  ;;  %v5271_v21 = vsel %vm7765_vm14, %v5269_v4, %v5270_v46  ;;  %v10159_v3 = vld [vmem:[#allocation25_spill] sm:$0xff]  ;;  %v4396_v34 = vld [vmem:[#allocation2 + $0xd4] sm:$0x1] }
 0x1d8   : > { %6810 = vmatmul.mubr.bf16.gmra.mxu0 %v6151_v22  ;;  %v5274_v43 = vrot.slane %v9426_v28, 5  ;;  %v6472_v32 = vpop.f32.mrf.mxu1  ;;  %v2245_v22 = vpop.f32.mrf.mxu0  ;;  %v4751_v62 = vrot.slane %v4750_v16, 4  ;;  %v4755_v25 = vrot.slane %v4753_v12, 5  ;;  %v4760_v41 = vrot.slane %v4758_v40, 4 }
 0x1d9   : > { %6813 = vmatprep.mubr.bf16.mxu0 %v6152_v54  ;;  %v4763_v2 = vrot.slane %v4761_v36, 5  ;;  %v9452_v13 = vadd.f32 %v2229_v51, %v1777_v5  ;;  %v1788_v56 = vadd.f32 %v6472_v32, %v10159_v3  ;;  %v4769_v47 = vrot.slane %v4767_v6, 5  ;;  %v10160_v51 = vld [vmem:[#allocation19_spill] sm:$0xff] }
 0x1da   : > { %v4773_v58 = vrot.slane %v4771_v52, 4  ;;  %v1779_v54 = vpop.f32.mrf.mxu1  ;;  %v6524_v24 = vpop.f32.mrf.mxu0  ;;  %v4722_v28 = vsel %vm7395_vm9, %v9411_v0, %v9387_v50  ;;  %v6153_v4 = vcombine.low %v9424_v39, %v5264_v10  ;;  %v6154_v46 = vcombine.low %v5268_v29, %v5271_v21  ;;  %v10161_v10 = vld [vmem:[#allocation26_spill] sm:$0xff] }
 0x1db   : > { %v6139_v16 = vrot.slane %v5118_v63, 9  ;;  %v9460_v12 = vadd.f32 %v6520_v30, %v1788_v56  ;;  %v1780_v40 = vadd.f32 %v1779_v54, %v10160_v51  ;;  %v5276_v36 = vrot.slane %v5274_v43, 4  ;;  %v10163_v56 = vld [vmem:[#allocation33_spill] sm:$0xff] }
 0x1dc   : > { %v5277_v49 = vrot.slane %v4396_v34, 5  ;;  %v6475_v5 = vpop.f32.mrf.mxu1  ;;  %v2248_v6 = vpop.f32.mrf.mxu0  ;;  %v4732_v52 = vsel %vm7395_vm9, %v4727_v61, %v9419_v7  ;;  %v4746_v50 = vsel %vm7395_vm9, %v4741_v23, %v9414_v44  ;;  %v4756_v0 = vsel %vm7395_vm9, %v4751_v62, %v4755_v25  ;;  %v10162_v61 = vld [vmem:[#allocation28_spill] sm:$0xff] }
 0x1dd   : > { %6762 = vmatmul.mubr.bf16.gmra.mxu1 %v9364_v17  ;;  %v4777_v30 = vshll.u32 %v4396_v34, 16  ;;  %v9472_v39 = vadd.f32 %v2232_v60, %v1780_v40  ;;  %v1801_v29 = vadd.f32 %v6475_v5, %v10161_v10  ;;  %v4764_v17 = vor.u32 %v4763_v2, %v4760_v41 }
 0x1de   : > { %6765 = vmatprep.mubr.bf16.mxu1 %v9395_v42  ;;  %v4774_v21 = vor.u32 %v4773_v58, %v4769_v47  ;;  %v1792_v63 = vpop.f32.mrf.mxu1  ;;  %v6527_v32 = vpop.f32.mrf.mxu0  ;;  %v5275_v44 = vsel %vm7765_vm14, %v6139_v16, %v5274_v43  ;;  %v5278_v60 = vsel %vm7765_vm14, %v5276_v36, %v5277_v49  ;;  %v6113_v62 = vcombine.low %v4722_v28, %v4732_v52  ;;  %v10164_v43 = vld [vmem:[#allocation34_spill] sm:$0xff]  ;;  %v10165_v36 = vld [vmem:[#allocation36_spill] sm:$0xff] }
 0x1df   : > { %v9476_v7 = vadd.f32 %v6523_v53, %v1801_v29  ;;  %v1793_v3 = vadd.f32 %v1792_v63, %v10162_v61  ;;  %v6114_v42 = vcombine.low %v4746_v50, %v4756_v0  ;;  %v4779_v41 = vrot.slane %v4777_v30, 5  ;;  %v10166_v0 = vld [vmem:[#allocation21_spill] sm:$0xff] }
 0x1e0   : > { %6814 = vmatmul.mubr.bf16.gmra.mxu0 %v6153_v4  ;;  %v6476_v23 = vpop.f32.mrf.mxu1  ;;  %v2261_v25 = vpop.f32.mrf.mxu0  ;;  %v4765_v53 = vrot.slane %v4764_v17, 4  ;;  %v4775_v58 = vrot.slane %v4774_v21, 4  ;;  %v10167_v21 = vld [vmem:[#allocation37_spill] sm:$0xff] }
 0x1e1   : > { %6817 = vmatprep.mubr.bf16.mxu0 %v6154_v46  ;;  %v9483_v2 = vadd.f32 %v2245_v22, %v1793_v3  ;;  %v1804_v34 = vadd.f32 %v6476_v23, %v10163_v56  ;;  %v6155_v46 = vcombine.low %v5275_v44, %v5278_v60 }
 0x1e2   : > { %v1795_v54 = vpop.f32.mrf.mxu1  ;;  %v6528_v4 = vpop.f32.mrf.mxu0  ;;  %v4770_v22 = vsel %vm7395_vm9, %v4765_v53, %v4769_v47  ;;  %v4780_v5 = vsel %vm7395_vm9, %v4775_v58, %v4779_v41 }
 0x1e3   : > { %v9486_v51 = vadd.f32 %v6524_v24, %v1804_v34  ;;  %v1796_v16 = vadd.f32 %v1795_v54, %v10164_v43  ;;  %v6115_v29 = vcombine.low %v4770_v22, %v4780_v5 }
 0x1e4   : > { %v2264_v40 = vpop.f32.mrf.mxu0 }
 0x1e5   : > { %v6479_v37 = vpop.f32.mrf.mxu1  ;;  %6766 = vmatmul.mubr.bf16.gmra.mxu1 %v6113_v62  ;;  %v9489_v28 = vadd.f32 %v2248_v6, %v1796_v16 }
 0x1e6   : > { %v1817_v49 = vadd.f32 %v6479_v37, %v10165_v36  ;;  %6769 = vmatprep.mubr.bf16.mxu1 %v6114_v42  ;;  %v6531_v50 = vpop.f32.mrf.mxu0 }
 0x1e7   : > { %v1808_v52 = vpop.f32.mrf.mxu1 }
 0x1e8   : > { %6818 = vmatmul.mubr.bf16.gmra.mxu0 %v6155_v46  ;;  %v9496_v24 = vadd.f32 %v6527_v32, %v1817_v49  ;;  %v1809_v30 = vadd.f32 %v1808_v52, %v10166_v0  ;;  %v2277_v6 = vpop.f32.mrf.mxu0  ;;  %v10169_v0 = vld [vmem:[#allocation15_spill] sm:$0xff] }
 0x1e9   : > { %v6480_v10 = vpop.f32.mrf.mxu1 }
 0x1ea   : > { %v9499_v17 = vadd.f32 %v2261_v25, %v1809_v30  ;;  %v1820_v63 = vadd.f32 %v6480_v10, %v10167_v21  ;;  %v6532_v3 = vpop.f32.mrf.mxu0 }
 0x1eb   : > { %v1811_v61 = vpop.f32.mrf.mxu1 }
 0x1ec   : > { %v9502_v47 = vadd.f32 %v6528_v4, %v1820_v63  ;;  %v1812_v44 = vadd.f32 %v1811_v61, %v10168_v35  ;;  %v2280_v23 = vpop.f32.mrf.mxu0 }
 0x1ed   : > { %v6483_v60 = vpop.f32.mrf.mxu1  ;;  %6770 = vmatmul.mubr.bf16.gmra.mxu1 %v6115_v29 }
 0x1ee   : > { %v9505_v32 = vadd.f32 %v2264_v40, %v1812_v44  ;;  %v1833_v62 = vadd.f32 %v6483_v60, %v9129_v55  ;;  %v6599_v41 = vpop.f32.mrf.mxu0 }
 0x1ef   : > { %v1824_v42 = vpop.f32.mrf.mxu1 }
 0x1f0   : > { %v9508_v56 = vadd.f32 %v6531_v50, %v1833_v62  ;;  %v1825_v25 = vadd.f32 %v1824_v42, %v9162_v31  ;;  %v3305_v53 = vpop.f32.mrf.mxu0 }
 0x1f1   : > { %v6484_v34 = vpop.f32.mrf.mxu1 }
 0x1f2   : > { %v9511_v58 = vadd.f32 %v2277_v6, %v1825_v25  ;;  %v1836_v54 = vadd.f32 %v6484_v34, %v9175_v18  ;;  %v6600_v46 = vpop.f32.mrf.mxu0  ;;  %v10170_v6 = vld [vmem:[#allocation16_spill] sm:$0xff] }
 0x1f3   : > { %v1827_v4 = vpop.f32.mrf.mxu1 }
 0x1f4   : > { %v9514_v43 = vadd.f32 %v6532_v3, %v1836_v54  ;;  %v1828_v16 = vadd.f32 %v1827_v4, %v9208_v38  ;;  %v3308_v55 = vpop.f32.mrf.mxu0 }
 0x1f5   : > { %v6551_v37 = vpop.f32.mrf.mxu1 }
 0x1f6   : > { %v9517_v40 = vadd.f32 %v2280_v23, %v1828_v16  ;;  %v2680_v36 = vadd.f32 %v6551_v37, %v9245_v15 }
 0x1f7   : > { %v2551_v49 = vpop.f32.mrf.mxu1  ;;  %v6603_v31 = vpop.f32.mrf.mxu0 }
 0x1f8   : > { %v9520_v22 = vadd.f32 %v6599_v41, %v2680_v36  ;;  %v2678_v5 = vadd.f32 %v2551_v49, %v9260_v33 }
 0x1f9   : > { %v6552_v52 = vpop.f32.mrf.mxu1  ;;  %v3321_v18 = vpop.f32.mrf.mxu0 }
 0x1fa   : > { %v9523_v50 = vadd.f32 %v3305_v53, %v2678_v5  ;;  %v2681_v30 = vadd.f32 %v6552_v52, %v10169_v0 }
 0x1fb   : > { %v2554_v10 = vpop.f32.mrf.mxu1  ;;  %v6604_v38 = vpop.f32.mrf.mxu0 }
 0x1fc   : > { %v9526_v29 = vadd.f32 %v6600_v46, %v2681_v30  ;;  %v2679_v21 = vadd.f32 %v2554_v10, %v10170_v6 }
 0x1fd   : > { %v6555_v63 = vpop.f32.mrf.mxu1  ;;  %v3324_v15 = vpop.f32.mrf.mxu0 }
 0x1fe   : > { %v9529_v61 = vadd.f32 %v3308_v55, %v2679_v21  ;;  %v2684_v3 = vadd.f32 %v6555_v63, %v9298_v20 }
 0x1ff   : > { %v2567_v35 = vpop.f32.mrf.mxu1  ;;  %v6607_v33 = vpop.f32.mrf.mxu0 }
 0x200   : > { %v9532_v44 = vadd.f32 %v6603_v31, %v2684_v3  ;;  %v2682_v60 = vadd.f32 %v2567_v35, %v9305_v11 }
 0x201   : > { %v6556_v23 = vpop.f32.mrf.mxu1  ;;  %v3337_v62 = vpop.f32.mrf.mxu0 }
 0x202   : > { %v9535_v42 = vadd.f32 %v3321_v18, %v2682_v60  ;;  %v2685_v41 = vadd.f32 %v6556_v23, %v9317_v19 }
 0x203   : > { %v2570_v25 = vpop.f32.mrf.mxu1  ;;  %v6608_v34 = vpop.f32.mrf.mxu0 }
 0x204   : > { %v9538_v53 = vadd.f32 %v6604_v38, %v2685_v41  ;;  %v2683_v54 = vadd.f32 %v2570_v25, %v9334_v48 }
 0x205   : > { %v6559_v4 = vpop.f32.mrf.mxu1  ;;  %v3340_v20 = vpop.f32.mrf.mxu0 }
 0x206   : > { %v9541_v46 = vadd.f32 %v3324_v15, %v2683_v54  ;;  %v2688_v16 = vadd.f32 %v6559_v4, %v9344_v45 }
 0x207   : > { %v2583_v37 = vpop.f32.mrf.mxu1  ;;  %v6611_v11 = vpop.f32.mrf.mxu0 }
 0x208   : > { %v9544_v55 = vadd.f32 %v6607_v33, %v2688_v16  ;;  %v2686_v36 = vadd.f32 %v2583_v37, %v9361_v1 }
 0x209   : > { %v6560_v49 = vpop.f32.mrf.mxu1  ;;  %v3353_v19 = vpop.f32.mrf.mxu0 }
 0x20a   : > { %v9547_v31 = vadd.f32 %v3337_v62, %v2686_v36  ;;  %v2689_v5 = vadd.f32 %v6560_v49, %v9379_v59 }
 0x20b   : > { %v2586_v52 = vpop.f32.mrf.mxu1  ;;  %v6612_v48 = vpop.f32.mrf.mxu0 }
 0x20c   : > { %v9550_v18 = vadd.f32 %v6608_v34, %v2689_v5  ;;  %v2687_v0 = vadd.f32 %v2586_v52, %v9391_v14 }
 0x20d   : > { %v6563_v30 = vpop.f32.mrf.mxu1  ;;  %v3356_v45 = vpop.f32.mrf.mxu0 }
 0x20e   : > { %v9553_v10 = vadd.f32 %v3340_v20, %v2687_v0  ;;  %v2692_v38 = vadd.f32 %v6563_v30, %v9402_v27 }
 0x20f   : > { %v2599_v6 = vpop.f32.mrf.mxu1  ;;  %v6615_v1 = vpop.f32.mrf.mxu0 }
 0x210   : > { %v9556_v21 = vadd.f32 %v6611_v11, %v2692_v38  ;;  %v2690_v63 = vadd.f32 %v2599_v6, %v9416_v57 }
 0x211   : > { %v6564_v15 = vpop.f32.mrf.mxu1  ;;  %v3369_v59 = vpop.f32.mrf.mxu0 }
 0x212   : > { %v9559_v3 = vadd.f32 %v3353_v19, %v2690_v63  ;;  %v2693_v35 = vadd.f32 %v6564_v15, %v9428_v26 }
 0x213   : > { %v2602_v33 = vpop.f32.mrf.mxu1  ;;  %v6616_v14 = vpop.f32.mrf.mxu0 }
 0x214   : > { %v9562_v60 = vadd.f32 %v6612_v48, %v2693_v35  ;;  %v2691_v23 = vadd.f32 %v2602_v33, %v9433_v9 }
 0x215   : > { %v6567_v62 = vpop.f32.mrf.mxu1  ;;  %v3372_v27 = vpop.f32.mrf.mxu0 }
 0x216   : > { %v9565_v41 = vadd.f32 %v3356_v45, %v2691_v23  ;;  %v2696_v25 = vadd.f32 %v6567_v62, %v9446_v8 }
 0x217   : > { %v2615_v34 = vpop.f32.mrf.mxu1  ;;  %v6619_v57 = vpop.f32.mrf.mxu0 }
 0x218   : > { %v9568_v54 = vadd.f32 %v6615_v1, %v2696_v25  ;;  %v2694_v4 = vadd.f32 %v2615_v34, %v9452_v13 }
 0x219   : > { %v6568_v20 = vpop.f32.mrf.mxu1  ;;  %v3385_v26 = vpop.f32.mrf.mxu0 }
 0x21a   : > { %v9571_v16 = vadd.f32 %v3369_v59, %v2694_v4  ;;  %v2697_v37 = vadd.f32 %v6568_v20, %v9460_v12 }
 0x21b   : > { %v2618_v11 = vpop.f32.mrf.mxu1  ;;  %v6620_v9 = vpop.f32.mrf.mxu0 }
 0x21c   : > { %v9574_v36 = vadd.f32 %v6616_v14, %v2697_v37  ;;  %v2695_v49 = vadd.f32 %v2618_v11, %v9472_v39 }
 0x21d   : > { %v6571_v19 = vpop.f32.mrf.mxu1  ;;  %v3388_v8 = vpop.f32.mrf.mxu0 }
 0x21e   : > { %10171 = vst [vmem:[#allocation23_spill] sm:$0xff] %v9574_v36  ;;  %v9577_v5 = vadd.f32 %v3372_v27, %v2695_v49  ;;  %v2700_v52 = vadd.f32 %v6571_v19, %v9476_v7 }
 0x21f   : > { %v2631_v48 = vpop.f32.mrf.mxu1  ;;  %v6623_v13 = vpop.f32.mrf.mxu0 }
 0x220   : > { %10172 = vst [vmem:[#allocation18_spill] sm:$0xff] %v9577_v5  ;;  %v9580_v0 = vadd.f32 %v6619_v57, %v2700_v52  ;;  %v2698_v30 = vadd.f32 %v2631_v48, %v9483_v2 }
 0x221   : > { %v6572_v45 = vpop.f32.mrf.mxu1  ;;  %v3401_v12 = vpop.f32.mrf.mxu0 }
 0x222   : > { %10173 = vst [vmem:[#allocation27_spill] sm:$0xff] %v9580_v0  ;;  %v9583_v38 = vadd.f32 %v3385_v26, %v2698_v30  ;;  %v2701_v6 = vadd.f32 %v6572_v45, %v9486_v51 }
 0x223   : > { %v2634_v1 = vpop.f32.mrf.mxu1  ;;  %v6624_v39 = vpop.f32.mrf.mxu0 }
 0x224   : > { %10174 = vst [vmem:[#allocation35_spill] sm:$0xff] %v9583_v38  ;;  %v9586_v63 = vadd.f32 %v6620_v9, %v2701_v6  ;;  %v2699_v15 = vadd.f32 %v2634_v1, %v9489_v28 }
 0x225   : > { %v6575_v59 = vpop.f32.mrf.mxu1  ;;  %v3404_v7 = vpop.f32.mrf.mxu0 }
 0x226   : > { %10175 = vst [vmem:[#allocation24_spill] sm:$0xff] %v9586_v63  ;;  %v9589_v35 = vadd.f32 %v3388_v8, %v2699_v15  ;;  %v2704_v33 = vadd.f32 %v6575_v59, %v9496_v24 }
 0x227   : > { %v2647_v14 = vpop.f32.mrf.mxu1  ;;  %v6627_v2 = vpop.f32.mrf.mxu0 }
 0x228   : > { %10176 = vst [vmem:[#allocation29_spill] sm:$0xff] %v9589_v35  ;;  %v9592_v23 = vadd.f32 %v6623_v13, %v2704_v33  ;;  %v2702_v62 = vadd.f32 %v2647_v14, %v9499_v17 }
 0x229   : > { %v6576_v27 = vpop.f32.mrf.mxu1  ;;  %v3417_v51 = vpop.f32.mrf.mxu0 }
 0x22a   : > { %10177 = vst [vmem:[#allocation30_spill] sm:$0xff] %v9592_v23  ;;  %v9595_v25 = vadd.f32 %v3401_v12, %v2702_v62  ;;  %v2705_v34 = vadd.f32 %v6576_v27, %v9502_v47 }
 0x22b   : > { %v2650_v57 = vpop.f32.mrf.mxu1  ;;  %v6628_v28 = vpop.f32.mrf.mxu0 }
 0x22c   : > { %10178 = vst [vmem:[#allocation31_spill] sm:$0xff] %v9595_v25  ;;  %v9598_v4 = vadd.f32 %v6624_v39, %v2705_v34  ;;  %v2703_v20 = vadd.f32 %v2650_v57, %v9505_v32 }
 0x22d   : > { %v6579_v26 = vpop.f32.mrf.mxu1  ;;  %v3420_v24 = vpop.f32.mrf.mxu0 }
 0x22e   : > { %10179 = vst [vmem:[#allocation32_spill] sm:$0xff] %v9598_v4  ;;  %v9601_v37 = vadd.f32 %v3404_v7, %v2703_v20  ;;  %v2708_v11 = vadd.f32 %v6579_v26, %v9508_v56 }
 0x22f   : > { %v2663_v9 = vpop.f32.mrf.mxu1  ;;  %v9604_v17 = vpop.f32.mrf.mxu0 }
 0x230   : > { %10180 = vst [vmem:[#allocation20_spill] sm:$0xff] %v9601_v37  ;;  %v9606_v49 = vadd.f32 %v6627_v2, %v2708_v11  ;;  %v2706_v19 = vadd.f32 %v2663_v9, %v9511_v58 }
 0x231   : > { %v6580_v47 = vpop.f32.mrf.mxu1  ;;  %v9609_v8 = vpop.f32.mrf.mxu0 }
 0x232   : > { %10181 = vst [vmem:[#allocation38_spill] sm:$0xff] %v9606_v49  ;;  %v9611_v52 = vadd.f32 %v3417_v51, %v2706_v19  ;;  %v2709_v32 = vadd.f32 %v6580_v47, %v9514_v43 }
 0x233   : > { %v2666_v48 = vpop.f32.mrf.mxu1  ;;  %v9614_v13 = vpop.f32.mrf.mxu0 }
 0x234   : > { %10182 = vst [vmem:[#allocation39_spill] sm:$0xff] %v9611_v52  ;;  %v9616_v30 = vadd.f32 %v6628_v28, %v2709_v32  ;;  %v2707_v56 = vadd.f32 %v2666_v48, %v9517_v40 }
 0x235   : > { %v6647_v45 = vpop.f32.mrf.mxu1  ;;  %v9619_v12 = vpop.f32.mrf.mxu0 }
 0x236   : > { %10183 = vst [vmem:[#allocation40_spill] sm:$0xff] %v9616_v30  ;;  %v9621_v6 = vadd.f32 %v3420_v24, %v2707_v56 }
 0x237   : > { %v3803_v58 = vpop.f32.mrf.mxu1  ;;  %v9623_v1 = vpop.f32.mrf.mxu0 }
 0x238   : > { %10184 = vst [vmem:[#allocation22_spill] sm:$0xff] %v9621_v6 }
 0x239   : > { %v9625_v39 = vpop.f32.mrf.mxu1  ;;  %v9627_v15 = vpop.f32.mrf.mxu0 }
 0x23b   : > { %v9629_v43 = vpop.f32.mrf.mxu1  ;;  %v9631_v59 = vpop.f32.mrf.mxu0 }
 0x23d   : > { %v9633_v7 = vpop.f32.mrf.mxu1  ;;  %v9635_v33 = vpop.f32.mrf.mxu0 }
 0x23f   : > { %v9637_v40 = vpop.f32.mrf.mxu1  ;;  %v9639_v14 = vpop.f32.mrf.mxu0 }
 0x241   : > { %v9641_v2 = vpop.f32.mrf.mxu1  ;;  %v9643_v62 = vpop.f32.mrf.mxu0 }
 0x243   : > { %v9645_v27 = vpop.f32.mrf.mxu1  ;;  %v9647_v51 = vpop.f32.mrf.mxu0 }
 0x245   : > { %v9649_v34 = vpop.f32.mrf.mxu1  ;;  %v9651_v57 = vpop.f32.mrf.mxu0 }
 0x247   : > { %v9653_v28 = vpop.f32.mrf.mxu1  ;;  %v9655_v20 = vpop.f32.mrf.mxu0 }
 0x249   : > { %v9657_v26 = vpop.f32.mrf.mxu1  ;;  %v9659_v24 = vpop.f32.mrf.mxu0 }
 0x24b   : > { %v9661_v11 = vpop.f32.mrf.mxu1  ;;  %v9663_v9 = vpop.f32.mrf.mxu0 }
 0x24d   : > { %v9665_v19 = vpop.f32.mrf.mxu1  ;;  %v9667_v47 = vpop.f32.mrf.mxu0 }
 0x24e   : > { %10185 = vst [vmem:[#allocation17_spill] sm:$0xff] %v9667_v47 }
 0x24f   : > { %v9669_v32 = vpop.f32.mrf.mxu1  ;;  %v9671_v48 = vpop.f32.mrf.mxu0 }
 0x250   : > { %10186 = vst [vmem:[#allocation25_spill] sm:$0xff] %v9671_v48 }
 0x251   : > { %v9673_v56 = vpop.f32.mrf.mxu1  ;;  %v9675_v6 = vpop.f32.mrf.mxu0 }
 0x252   : > { %10187 = vst [vmem:[#allocation19_spill] sm:$0xff] %v9675_v6 }
 0x253   : > { %v9677_v30 = vpop.f32.mrf.mxu1  ;;  %v9679_v52 = vpop.f32.mrf.mxu0 }
 0x254   : > { %10188 = vst [vmem:[#allocation26_spill] sm:$0xff] %v9679_v52 }
 0x255   : > { %v9681_v49 = vpop.f32.mrf.mxu1  ;;  %v9683_v37 = vpop.f32.mrf.mxu0 }
 0x256   : > { %10189 = vst [vmem:[#allocation28_spill] sm:$0xff] %v9683_v37 }
 0x257   : > { %v9685_v4 = vpop.f32.mrf.mxu1  ;;  %v9687_v25 = vpop.f32.mrf.mxu0 }
 0x258   : > { %10190 = vst [vmem:[#allocation33_spill] sm:$0xff] %v9687_v25 }
 0x259   : > { %v9689_v23 = vpop.f32.mrf.mxu1  ;;  %v9691_v35 = vpop.f32.mrf.mxu0 }
 0x25a   : > { %10191 = vst [vmem:[#allocation34_spill] sm:$0xff] %v9689_v23  ;;  %10192 = vst [vmem:[#allocation36_spill] sm:$0xff] %v9691_v35 }
 0x25b   : > { %v9693_v63 = vpop.f32.mrf.mxu1  ;;  %v9695_v38 = vpop.f32.mrf.mxu0 }
 0x25c   : > { %10193 = vst [vmem:[#allocation21_spill] sm:$0xff] %v9693_v63  ;;  %10194 = vst [vmem:[#allocation37_spill] sm:$0xff] %v9695_v38 }
 0x25d   : > { %v9697_v0 = vpop.f32.mrf.mxu1  ;;  %v9699_v5 = vpop.f32.mrf.mxu0 }
 0x25e   : > { %10195 = vst [vmem:[#allocation41_spill] sm:$0xff] %v9697_v0  ;;  %10196 = vst [vmem:[#allocation15_spill] sm:$0xff] %v9699_v5 }
 0x25f   : > { %v9701_v52 = vpop.f32.mrf.mxu1  ;;  %v9703_v6 = vpop.f32.mrf.mxu0 }
 0x260   : > { %10197 = vst [vmem:[#allocation16_spill] sm:$0xff] %v9701_v52  ;;  %10198 = vst [vmem:[#allocation42_spill] sm:$0xff] %v9703_v6 }
 0x261   : > { %v9705_v37 = vpop.f32.mrf.mxu1  ;;  %v9707_v36 = vpop.f32.mrf.mxu0 }
 0x262   : > { %10199 = vst [vmem:[#allocation43_spill] sm:$0xff] %v9705_v37  ;;  %10200 = vst [vmem:[#allocation44_spill] sm:$0xff] %v9707_v36 }
 0x263   : > { %v9709_v25 = vpop.f32.mrf.mxu1  ;;  %v9711_v23 = vpop.f32.mrf.mxu0 }
 0x264   : > { %10201 = vst [vmem:[#allocation45_spill] sm:$0xff] %v9709_v25  ;;  %10202 = vst [vmem:[#allocation46_spill] sm:$0xff] %v9711_v23 }
 0x265   : > { %v9713_v35 = vpop.f32.mrf.mxu1  ;;  %v9715_v63 = vpop.f32.mrf.mxu0 }
 0x266   : > { %10203 = vst [vmem:[#allocation47_spill] sm:$0xff] %v9713_v35  ;;  %10204 = vst [vmem:[#allocation48_spill] sm:$0xff] %v9715_v63 }
 0x267   : > { %v9717_v38 = vpop.f32.mrf.mxu1  ;;  %v9719_v0 = vpop.f32.mrf.mxu0 }
 0x268   : > { %10205 = vst [vmem:[#allocation49_spill] sm:$0xff] %v9717_v38  ;;  %10206 = vst [vmem:[#allocation50_spill] sm:$0xff] %v9719_v0  ;;  %v3932_v38 = vadd.f32 %v6647_v45, %v9520_v22  ;;  %v3931_v22 = vadd.f32 %v9629_v43, %v9529_v61 }
 0x269   : > { %v9721_v5 = vpop.f32.mrf.mxu1  ;;  %v9723_v6 = vpop.f32.mrf.mxu0 }
 0x26a   : > { %10207 = vst [vmem:[#allocation51_spill] sm:$0xff] %v9721_v5  ;;  %10208 = vst [vmem:[#allocation52_spill] sm:$0xff] %v9723_v6  ;;  %v3930_v5 = vadd.f32 %v3803_v58, %v9523_v50  ;;  %v3936_v58 = vadd.f32 %v9633_v7, %v9532_v44 }
 0x26b   : > { %v9725_v37 = vpop.f32.mrf.mxu1  ;;  %v9727_v36 = vpop.f32.mrf.mxu0 }
 0x26c   : > { %10209 = vst [vmem:[#allocation53_spill] sm:$0xff] %v9725_v37  ;;  %10210 = vst [vmem:[#allocation54_spill] sm:$0xff] %v9727_v36  ;;  %v4319_v37 = vadd.f32 %v9604_v17, %v3932_v38  ;;  %v3933_v36 = vadd.f32 %v9625_v39, %v9526_v29  ;;  %v4318_v39 = vadd.f32 %v9619_v12, %v3931_v22 }
 0x26d   : > { %v9729_v25 = vpop.f32.mrf.mxu1  ;;  %v9731_v23 = vpop.f32.mrf.mxu0  ;;  %v4323_v44 = vadd.f32 %v9623_v1, %v3936_v58  ;;  %v3940_v1 = vadd.f32 %v9649_v34, %v9544_v55 }
 0x26e   : > { %10211 = vst [vmem:[#allocation55_spill] sm:$0xff] %v9729_v25  ;;  %10212 = vst [vmem:[#allocation56_spill] sm:$0xff] %v9731_v23  ;;  %v4320_v50 = vadd.f32 %v9614_v13, %v3933_v36 }
 0x26f   : > { %v9733_v35 = vpop.f32.mrf.mxu1  ;;  %v4327_v34 = vadd.f32 %v9639_v14, %v3940_v1 }
 0x270   : > { %10213 = vst [vmem:[#allocation57_spill] sm:$0xff] %v9733_v35  ;;  %v6791_v63 = vpop.f32.mrf.mxu0  ;;  %v4317_v35 = vadd.f32 %v9609_v8, %v3930_v5  ;;  %v3934_v5 = vadd.f32 %v9637_v40, %v9535_v42  ;;  %v3937_v8 = vadd.f32 %v9641_v2, %v9538_v53  ;;  %v3935_v42 = vadd.f32 %v9645_v27, %v9541_v46 }
 0x271   : > { %v9736_v52 = vpop.f32.mrf.mxu1 }
 0x272   : > { %10214 = vst [vmem:[#allocation58_spill] sm:$0xff] %v9736_v52  ;;  %v5442_v0 = vpop.f32.mrf.mxu0  ;;  %v4321_v12 = vadd.f32 %v9627_v15, %v3934_v5  ;;  %v4324_v46 = vadd.f32 %v9631_v59, %v3937_v8  ;;  %v4322_v27 = vadd.f32 %v9635_v33, %v3935_v42 }
 0x273   : > { %v9739_v48 = vpop.f32.mrf.mxu1 }
 0x274   : > { %10215 = vst [vmem:[#allocation59_spill] sm:$0xff] %v9739_v48  ;;  %v6792_v6 = vpop.f32.mrf.mxu0 }
 0x275   : > { %v6743_v23 = vpop.f32.mrf.mxu1 }
 0x276   : > { %v5445_v25 = vpop.f32.mrf.mxu0  ;;  %v5073_v45 = vadd.f32 %v6743_v23, %v4319_v37 }
 0x277   : > { %v4944_v52 = vpop.f32.mrf.mxu1 }
 0x278   : > { %v6795_v47 = vpop.f32.mrf.mxu0  ;;  %v5571_v38 = vadd.f32 %v6791_v63, %v5073_v45  ;;  %v5071_v17 = vadd.f32 %v4944_v52, %v4317_v35 }
 0x279   : > { %v6744_v48 = vpop.f32.mrf.mxu1 }
 0x27a   : > { %v5458_v29 = vpop.f32.mrf.mxu0  ;;  %5603 = vst [vmem:[%s9754_s20 + $0x10] sm:$0xff] %v5571_v38  ;;  %v5569_v61 = vadd.f32 %v5442_v0, %v5071_v17  ;;  %v5074_v36 = vadd.f32 %v6744_v48, %v4320_v50  ;;  %v5673_v45 = vmul.f32 %v5571_v38, %v5571_v38  ;;  %v3938_v17 = vadd.f32 %v9653_v28, %v9547_v31 }
 0x27b   : > { %v4947_v23 = vpop.f32.mrf.mxu1 }
 0x27c   : > { %v6796_v37 = vpop.f32.mrf.mxu0  ;;  %5601 = vst [vmem:[%s9754_s20] sm:$0xff] %v5569_v61  ;;  %v5572_v63 = vadd.f32 %v6792_v6, %v5074_v36  ;;  %v5072_v35 = vadd.f32 %v4947_v23, %v4318_v39  ;;  %v5671_v7 = vmul.f32 %v5569_v61, %v5569_v61  ;;  %v4325_v8 = vadd.f32 %v9643_v62, %v3938_v17 }
 0x27d   : > { %v6747_v52 = vpop.f32.mrf.mxu1  ;;  %v3948_v17 = vadd.f32 %v9681_v49, %v9568_v54 }
 0x27e   : > { %v5461_v13 = vpop.f32.mrf.mxu0  ;;  %5604 = vst [vmem:[%s9754_s20 + $0x18] sm:$0xff] %v5572_v63  ;;  %v5570_v0 = vadd.f32 %v5445_v25, %v5072_v35  ;;  %v5077_v43 = vadd.f32 %v6747_v52, %v4323_v44  ;;  %v5674_v33 = vmul.f32 %v5572_v63, %v5572_v63 }
 0x27f   : > { %v4960_v6 = vpop.f32.mrf.mxu1 }
 0x280   : > { %v6799_v40 = vpop.f32.mrf.mxu0  ;;  %5602 = vst [vmem:[%s9754_s20 + $0x8] sm:$0xff] %v5570_v0  ;;  %v5633_v48 = vadd.f32 %v5570_v0, %v5569_v61  ;;  %v5672_v53 = vmul.f32 %v5570_v0, %v5570_v0  ;;  %v5575_v2 = vadd.f32 %v6795_v47, %v5077_v43  ;;  %v5075_v22 = vadd.f32 %v4960_v6, %v4321_v12 }
 0x281   : > { %v6748_v15 = vpop.f32.mrf.mxu1  ;;  %v3941_v47 = vadd.f32 %v9657_v26, %v9550_v18  ;;  %v3944_v43 = vadd.f32 %v9665_v19, %v9556_v21 }
 0x282   : > { %v5474_v25 = vpop.f32.mrf.mxu0  ;;  %v5634_v50 = vadd.f32 %v5633_v48, %v5571_v38  ;;  %v5703_v58 = vadd.f32 %v5672_v53, %v5671_v7  ;;  %5607 = vst [vmem:[%s9754_s20 + $0x30] sm:$0xff] %v5575_v2  ;;  %v5573_v55 = vadd.f32 %v5458_v29, %v5075_v22  ;;  %v5078_v39 = vadd.f32 %v6748_v15, %v4324_v46 }
 0x283   : > { %v4963_v59 = vpop.f32.mrf.mxu1  ;;  %v3939_v29 = vadd.f32 %v9661_v11, %v9553_v10  ;;  %v4328_v42 = vadd.f32 %v9647_v51, %v3941_v47  ;;  %v5677_v7 = vmul.f32 %v5575_v2, %v5575_v2  ;;  %v4331_v15 = vadd.f32 %v9655_v20, %v3944_v43 }
 0x284   : > { %v6800_v5 = vpop.f32.mrf.mxu0  ;;  %v5704_v61 = vadd.f32 %v5703_v58, %v5673_v45  ;;  %5605 = vst [vmem:[%s9754_s20 + $0x20] sm:$0xff] %v5573_v55  ;;  %v5635_v36 = vadd.f32 %v5634_v50, %v5572_v63  ;;  %v5076_v38 = vadd.f32 %v4963_v59, %v4322_v27  ;;  %v5675_v14 = vmul.f32 %v5573_v55, %v5573_v55 }
 0x285   : > { %v5576_v23 = vadd.f32 %v6796_v37, %v5078_v39  ;;  %v6751_v44 = vpop.f32.mrf.mxu1  ;;  %v4326_v37 = vadd.f32 %v9651_v57, %v3939_v29 }
 0x286   : > { %v5477_v31 = vpop.f32.mrf.mxu0  ;;  %v5636_v28 = vadd.f32 %v5635_v36, %v5573_v55  ;;  %v5705_v35 = vadd.f32 %v5704_v61, %v5674_v33  ;;  %v5574_v18 = vadd.f32 %v5461_v13, %v5076_v38  ;;  %v5081_v26 = vadd.f32 %v6751_v44, %v4327_v34  ;;  %v10217_v44 = vld [vmem:[#allocation25_spill] sm:$0xff] }
 0x287   : > { %5608 = vst [vmem:[%s9754_s20 + $0x38] sm:$0xff] %v5576_v23  ;;  %v4976_v52 = vpop.f32.mrf.mxu1  ;;  %v3942_v13 = vadd.f32 %v9669_v32, %v9559_v3  ;;  %v5678_v22 = vmul.f32 %v5576_v23, %v5576_v23  ;;  %v3943_v34 = vadd.f32 %v9677_v30, %v9565_v41  ;;  %v3946_v61 = vadd.f32 %v9685_v4, %v9571_v16 }
 0x288   : > { %v6803_v63 = vpop.f32.mrf.mxu0  ;;  %v5706_v12 = vadd.f32 %v5705_v35, %v5675_v14  ;;  %5606 = vst [vmem:[%s9754_s20 + $0x28] sm:$0xff] %v5574_v18  ;;  %v5637_v0 = vadd.f32 %v5636_v28, %v5574_v18  ;;  %v5676_v10 = vmul.f32 %v5574_v18, %v5574_v18  ;;  %v5579_v11 = vadd.f32 %v6799_v40, %v5081_v26  ;;  %v10216_v14 = vld [vmem:[#allocation17_spill] sm:$0xff]  ;;  %v10218_v28 = vld [vmem:[#allocation23_spill] sm:$0xff]  ;;  %v10219_v35 = vld [vmem:[#allocation34_spill] sm:$0xff] }
 0x289   : > { %v5079_v62 = vadd.f32 %v4976_v52, %v4325_v8  ;;  %v6752_v1 = vpop.f32.mrf.mxu1  ;;  %v3945_v40 = vadd.f32 %v9673_v56, %v9562_v60  ;;  %v4329_v45 = vadd.f32 %v9659_v24, %v3942_v13  ;;  %v3949_v18 = vadd.f32 %v10219_v35, %v10218_v28  ;;  %v10234_v28 = vld [vmem:[#allocation45_spill] sm:$0xff] }
 0x28a   : > { %v5490_v51 = vpop.f32.mrf.mxu0  ;;  %v5638_v6 = vadd.f32 %v5637_v0, %v5575_v2  ;;  %v5707_v48 = vadd.f32 %v5706_v12, %v5676_v10  ;;  %5611 = vst [vmem:[%s9754_s20 + $0x50] sm:$0xff] %v5579_v11  ;;  %v5082_v53 = vadd.f32 %v6752_v1, %v4328_v42  ;;  %v5681_v36 = vmul.f32 %v5579_v11, %v5579_v11  ;;  %v10221_v0 = vld [vmem:[#allocation18_spill] sm:$0xff]  ;;  %v10222_v10 = vld [vmem:[#allocation21_spill] sm:$0xff] }
 0x28b   : > { %v5577_v57 = vadd.f32 %v5474_v25, %v5079_v62  ;;  %v4979_v46 = vpop.f32.mrf.mxu1  ;;  %v4332_v25 = vadd.f32 %v9663_v9, %v3945_v40 }
 0x28c   : > { %v6804_v21 = vpop.f32.mrf.mxu0  ;;  %v5708_v19 = vadd.f32 %v5707_v48, %v5677_v7  ;;  %v5639_v27 = vadd.f32 %v5638_v6, %v5576_v23  ;;  %v5580_v3 = vadd.f32 %v6800_v5, %v5082_v53  ;;  %v5080_v32 = vadd.f32 %v4979_v46, %v4326_v37  ;;  %v10223_v6 = vld [vmem:[#allocation26_spill] sm:$0xff]  ;;  %v10225_v46 = vld [vmem:[#allocation41_spill] sm:$0xff] }
 0x28d   : > { %5609 = vst [vmem:[%s9754_s20 + $0x40] sm:$0xff] %v5577_v57  ;;  %v6755_v2 = vpop.f32.mrf.mxu1  ;;  %v5679_v55 = vmul.f32 %v5577_v57, %v5577_v57  ;;  %v4330_v23 = vadd.f32 %v10216_v14, %v3943_v34  ;;  %v4336_v48 = vadd.f32 %v10223_v6, %v3949_v18 }
 0x28e   : > { %v5493_v50 = vpop.f32.mrf.mxu0  ;;  %v5640_v58 = vadd.f32 %v5639_v27, %v5577_v57  ;;  %v5709_v60 = vadd.f32 %v5708_v19, %v5678_v22  ;;  %5612 = vst [vmem:[%s9754_s20 + $0x58] sm:$0xff] %v5580_v3  ;;  %v5578_v56 = vadd.f32 %v5477_v31, %v5080_v32  ;;  %v5085_v20 = vadd.f32 %v6755_v2, %v4331_v15  ;;  %v10224_v57 = vld [vmem:[#allocation27_spill] sm:$0xff] }
 0x28f   : > { %v4992_v47 = vpop.f32.mrf.mxu1  ;;  %v4335_v31 = vadd.f32 %v10217_v44, %v3948_v17  ;;  %v5682_v4 = vmul.f32 %v5580_v3, %v5580_v3  ;;  %v10229_v17 = vld [vmem:[#allocation24_spill] sm:$0xff] }
 0x290   : > { %v6807_v24 = vpop.f32.mrf.mxu0  ;;  %v5710_v39 = vadd.f32 %v5709_v60, %v5679_v55  ;;  %5610 = vst [vmem:[%s9754_s20 + $0x48] sm:$0xff] %v5578_v56  ;;  %v5641_v59 = vadd.f32 %v5640_v58, %v5578_v56  ;;  %v5680_v5 = vmul.f32 %v5578_v56, %v5578_v56  ;;  %v5083_v33 = vadd.f32 %v4992_v47, %v4329_v45  ;;  %v10226_v58 = vld [vmem:[#allocation28_spill] sm:$0xff]  ;;  %v10227_v60 = vld [vmem:[#allocation35_spill] sm:$0xff] }
 0x291   : > { %v5583_v9 = vadd.f32 %v6803_v63, %v5085_v20  ;;  %v6756_v38 = vpop.f32.mrf.mxu1  ;;  %v10220_v63 = vld [vmem:[#allocation19_spill] sm:$0xff]  ;;  %v10228_v56 = vld [vmem:[#allocation16_spill] sm:$0xff] }
 0x292   : > { %v5506_v41 = vpop.f32.mrf.mxu0  ;;  %v5642_v30 = vadd.f32 %v5641_v59, %v5579_v11  ;;  %v5711_v29 = vadd.f32 %v5710_v39, %v5680_v5  ;;  %v5581_v54 = vadd.f32 %v5490_v51, %v5083_v33  ;;  %v5086_v49 = vadd.f32 %v6756_v38, %v4332_v25  ;;  %v10230_v20 = vld [vmem:[#allocation43_spill] sm:$0xff] }
 0x293   : > { %5615 = vst [vmem:[%s9754_s20 + $0x70] sm:$0xff] %v5583_v9  ;;  %v4995_v26 = vpop.f32.mrf.mxu1  ;;  %v4333_v12 = vadd.f32 %v10220_v63, %v3946_v61  ;;  %v3947_v11 = vadd.f32 %v10222_v10, %v10221_v0  ;;  %v3950_v25 = vadd.f32 %v10228_v56, %v10227_v60  ;;  %v3953_v47 = vadd.f32 %v10230_v20, %v10229_v17  ;;  %v10231_v61 = vld [vmem:[#allocation33_spill] sm:$0xff]  ;;  %v10236_v0 = vld [vmem:[#allocation30_spill] sm:$0xff] }
 0x294   : > { %v6808_v16 = vpop.f32.mrf.mxu0  ;;  %v5712_v8 = vadd.f32 %v5711_v29, %v5681_v36  ;;  %5613 = vst [vmem:[%s9754_s20 + $0x60] sm:$0xff] %v5581_v54  ;;  %v5643_v42 = vadd.f32 %v5642_v30, %v5580_v3  ;;  %v5584_v52 = vadd.f32 %v6804_v21, %v5086_v49  ;;  %v5084_v37 = vadd.f32 %v4995_v26, %v4330_v23  ;;  %v10232_v23 = vld [vmem:[#allocation36_spill] sm:$0xff]  ;;  %v10235_v26 = vld [vmem:[#allocation37_spill] sm:$0xff] }
 0x295   : > { %v6759_v43 = vpop.f32.mrf.mxu1  ;;  %v5683_v1 = vmul.f32 %v5581_v54, %v5581_v54  ;;  %v3952_v21 = vadd.f32 %v10225_v46, %v10224_v57  ;;  %v4334_v55 = vadd.f32 %v10226_v58, %v3947_v11  ;;  %v5685_v39 = vmul.f32 %v5583_v9, %v5583_v9 }
 0x296   : > { %v5509_v13 = vpop.f32.mrf.mxu0  ;;  %v5644_v62 = vadd.f32 %v5643_v42, %v5581_v54  ;;  %v5713_v51 = vadd.f32 %v5712_v8, %v5682_v4  ;;  %5616 = vst [vmem:[%s9754_s20 + $0x78] sm:$0xff] %v5584_v52  ;;  %v5089_v7 = vadd.f32 %v6759_v43, %v4335_v31  ;;  %v5582_v53 = vadd.f32 %v5493_v50, %v5084_v37  ;;  %v10233_v31 = vld [vmem:[#allocation29_spill] sm:$0xff] }
 0x297   : > { %v5008_v40 = vpop.f32.mrf.mxu1  ;;  %v4339_v36 = vadd.f32 %v10231_v61, %v3952_v21  ;;  %v5686_v29 = vmul.f32 %v5584_v52, %v5584_v52  ;;  %v4337_v44 = vadd.f32 %v10232_v23, %v3950_v25  ;;  %v3951_v35 = vadd.f32 %v10234_v28, %v10233_v31  ;;  %v10241_v21 = vld [vmem:[#allocation32_spill] sm:$0xff]  ;;  %v10249_v23 = vld [vmem:[#allocation55_spill] sm:$0xff] }
 0x298   : > { %v6811_v22 = vpop.f32.mrf.mxu0  ;;  %v5714_v19 = vadd.f32 %v5713_v51, %v5683_v1  ;;  %v5587_v27 = vadd.f32 %v6807_v24, %v5089_v7  ;;  %v5087_v3 = vadd.f32 %v5008_v40, %v4333_v12  ;;  %5614 = vst [vmem:[%s9754_s20 + $0x68] sm:$0xff] %v5582_v53  ;;  %v5645_v32 = vadd.f32 %v5644_v62, %v5582_v53  ;;  %v10238_v7 = vld [vmem:[#allocation15_spill] sm:$0xff] }
 0x299   : > { %v5684_v15 = vmul.f32 %v5582_v53, %v5582_v53  ;;  %v6760_v45 = vpop.f32.mrf.mxu1  ;;  %v4340_v4 = vadd.f32 %v10235_v26, %v3953_v47  ;;  %v4338_v6 = vadd.f32 %v10238_v7, %v3951_v35  ;;  %v10240_v53 = vld [vmem:[#allocation49_spill] sm:$0xff]  ;;  %v10244_v47 = vld [vmem:[#allocation44_spill] sm:$0xff] }
 0x29a   : > { %v5522_v2 = vpop.f32.mrf.mxu0  ;;  %5619 = vst [vmem:[%s9754_s20 + $0x90] sm:$0xff] %v5587_v27  ;;  %v5585_v50 = vadd.f32 %v5506_v41, %v5087_v3  ;;  %v5090_v34 = vadd.f32 %v6760_v45, %v4336_v48  ;;  %v5646_v24 = vadd.f32 %v5645_v32, %v5583_v9  ;;  %v10239_v48 = vld [vmem:[#allocation31_spill] sm:$0xff]  ;;  %v5689_v32 = vmul.f32 %v5587_v27, %v5587_v27  ;;  %v10250_v26 = vld [vmem:[#allocation48_spill] sm:$0xff] }
 0x29b   : > { %v5715_v59 = vadd.f32 %v5714_v19, %v5684_v15  ;;  %v5011_v5 = vpop.f32.mrf.mxu1  ;;  %v3954_v40 = vadd.f32 %v10240_v53, %v10239_v48  ;;  %v10242_v19 = vld [vmem:[#allocation51_spill] sm:$0xff] }
 0x29c   : > { %v6812_v33 = vpop.f32.mrf.mxu0  ;;  %5617 = vst [vmem:[%s9754_s20 + $0x80] sm:$0xff] %v5585_v50  ;;  %v5588_v38 = vadd.f32 %v6808_v16, %v5090_v34  ;;  %v5088_v30 = vadd.f32 %v5011_v5, %v4334_v55  ;;  %v5647_v49 = vadd.f32 %v5646_v24, %v5584_v52  ;;  %v5687_v16 = vmul.f32 %v5585_v50, %v5585_v50  ;;  %v10237_v52 = vld [vmem:[#allocation47_spill] sm:$0xff]  ;;  %v10243_v55 = vld [vmem:[#allocation42_spill] sm:$0xff]  ;;  %v10245_v24 = vld [vmem:[#allocation20_spill] sm:$0xff] }
 0x29d   : > { %v5716_v54 = vadd.f32 %v5715_v59, %v5685_v39  ;;  %v6763_v41 = vpop.f32.mrf.mxu1  ;;  %v3956_v10 = vadd.f32 %v10237_v52, %v10236_v0  ;;  %v3957_v3 = vadd.f32 %v10242_v19, %v10241_v21  ;;  %v4341_v39 = vadd.f32 %v10244_v47, %v3954_v40  ;;  %v10246_v59 = vld [vmem:[#allocation53_spill] sm:$0xff]  ;;  %v10256_v21 = vld [vmem:[#allocation52_spill] sm:$0xff] }
 0x29e   : > { %v5525_v14 = vpop.f32.mrf.mxu0  ;;  %5620 = vst [vmem:[%s9754_s20 + $0x98] sm:$0xff] %v5588_v38  ;;  %v5586_v9 = vadd.f32 %v5509_v13, %v5088_v30  ;;  %v5093_v18 = vadd.f32 %v6763_v41, %v4339_v36  ;;  %v5648_v8 = vadd.f32 %v5647_v49, %v5585_v50  ;;  %v5690_v50 = vmul.f32 %v5588_v38, %v5588_v38  ;;  %v10247_v36 = vld [vmem:[#allocation46_spill] sm:$0xff] }
 0x29f   : > { %v5717_v42 = vadd.f32 %v5716_v54, %v5686_v29  ;;  %v5024_v63 = vpop.f32.mrf.mxu1  ;;  %v4343_v60 = vadd.f32 %v10243_v55, %v3956_v10  ;;  %v3955_v5 = vadd.f32 %v10246_v59, %v10245_v24  ;;  %v4344_v30 = vadd.f32 %v10247_v36, %v3957_v3  ;;  %v10248_v41 = vld [vmem:[#allocation38_spill] sm:$0xff] }
 0x2a0   : > { %v6815_v12 = vpop.f32.mrf.mxu0  ;;  %5618 = vst [vmem:[%s9754_s20 + $0x88] sm:$0xff] %v5586_v9  ;;  %v5688_v11 = vmul.f32 %v5586_v9, %v5586_v9  ;;  %v5591_v37 = vadd.f32 %v6811_v22, %v5093_v18  ;;  %v5091_v43 = vadd.f32 %v5024_v63, %v4337_v44  ;;  %v5649_v1 = vadd.f32 %v5648_v8, %v5586_v9  ;;  %v10251_v8 = vld [vmem:[#allocation39_spill] sm:$0xff]  ;;  %v10257_v3 = vld [vmem:[#allocation22_spill] sm:$0xff] }
 0x2a1   : > { %v5718_v62 = vadd.f32 %v5717_v42, %v5687_v16  ;;  %v6764_v13 = vpop.f32.mrf.mxu1  ;;  %v10252_v16 = vld [vmem:[#allocation57_spill] sm:$0xff] }
 0x2a2   : > { %v5538_v51 = vpop.f32.mrf.mxu0  ;;  %5623 = vst [vmem:[%s9754_s20 + $0xb0] sm:$0xff] %v5591_v37  ;;  %v5589_v57 = vadd.f32 %v5522_v2, %v5091_v43  ;;  %v5094_v46 = vadd.f32 %v6764_v13, %v4340_v4  ;;  %v5650_v22 = vadd.f32 %v5649_v1, %v5587_v27  ;;  %v4342_v4 = vadd.f32 %v10250_v26, %v3955_v5  ;;  %v10254_v1 = vld [vmem:[#allocation40_spill] sm:$0xff]  ;;  %v10255_v13 = vld [vmem:[#allocation58_spill] sm:$0xff] }
 0x2a3   : > { %v5719_v15 = vadd.f32 %v5718_v62, %v5688_v11  ;;  %v5027_v45 = vpop.f32.mrf.mxu1  ;;  %v3958_v42 = vadd.f32 %v10252_v16, %v10251_v8  ;;  %v5693_v52 = vmul.f32 %v5591_v37, %v5591_v37  ;;  %v3961_v7 = vadd.f32 %v10255_v13, %v10254_v1 }
 0x2a4   : > { %v6816_v58 = vpop.f32.mrf.mxu0  ;;  %5621 = vst [vmem:[%s9754_s20 + $0xa0] sm:$0xff] %v5589_v57  ;;  %v5592_v56 = vadd.f32 %v6812_v33, %v5094_v46  ;;  %v5092_v25 = vadd.f32 %v5027_v45, %v4338_v6  ;;  %v5651_v17 = vadd.f32 %v5650_v22, %v5588_v38  ;;  %v5691_v33 = vmul.f32 %v5589_v57, %v5589_v57 }
 0x2a5   : > { %v5720_v34 = vadd.f32 %v5719_v15, %v5689_v32  ;;  %v6767_v2 = vpop.f32.mrf.mxu1  ;;  %v3960_v38 = vadd.f32 %v10249_v23, %v10248_v41  ;;  %v4345_v19 = vadd.f32 %v10256_v21, %v3958_v42 }
 0x2a6   : > { %v5541_v20 = vpop.f32.mrf.mxu0  ;;  %5624 = vst [vmem:[%s9754_s20 + $0xb8] sm:$0xff] %v5592_v56  ;;  %v5590_v27 = vadd.f32 %v5525_v14, %v5092_v25  ;;  %v5097_v61 = vadd.f32 %v6767_v2, %v4343_v60  ;;  %v5652_v29 = vadd.f32 %v5651_v17, %v5589_v57  ;;  %v5694_v53 = vmul.f32 %v5592_v56, %v5592_v56  ;;  %v10259_v25 = vld [vmem:[#allocation54_spill] sm:$0xff] }
 0x2a7   : > { %v5721_v54 = vadd.f32 %v5720_v34, %v5690_v50  ;;  %v5040_v49 = vpop.f32.mrf.mxu1  ;;  %v4348_v50 = vadd.f32 %v10259_v25, %v3961_v7 }
 0x2a8   : > { %5622 = vst [vmem:[%s9754_s20 + $0xa8] sm:$0xff] %v5590_v27  ;;  %v5692_v44 = vmul.f32 %v5590_v27, %v5590_v27  ;;  %v5595_v31 = vadd.f32 %v6815_v12, %v5097_v61  ;;  %v5095_v28 = vadd.f32 %v5040_v49, %v4341_v39  ;;  %v5653_v9 = vadd.f32 %v5652_v29, %v5590_v27  ;;  %v6819_v14 = vpop.f32.mrf.mxu0  ;;  %v10253_v12 = vld [vmem:[#allocation50_spill] sm:$0xff] }
 0x2a9   : > { %v5722_v35 = vadd.f32 %v5721_v54, %v5691_v33  ;;  %v6768_v18 = vpop.f32.mrf.mxu1  ;;  %v4347_v62 = vadd.f32 %v10253_v12, %v3960_v38 }
 0x2aa   : > { %5627 = vst [vmem:[%s9754_s20 + $0xd0] sm:$0xff] %v5595_v31  ;;  %v5593_v63 = vadd.f32 %v5538_v51, %v5095_v28  ;;  %v5098_v0 = vadd.f32 %v6768_v18, %v4344_v30  ;;  %v5654_v10 = vadd.f32 %v5653_v9, %v5591_v37  ;;  %v5554_v51 = vpop.f32.mrf.mxu0  ;;  %v10258_v37 = vld [vmem:[#allocation59_spill] sm:$0xff]  ;;  %v5697_v61 = vmul.f32 %v5595_v31, %v5595_v31 }
 0x2ab   : > { %v5723_v11 = vadd.f32 %v5722_v35, %v5692_v44  ;;  %v5043_v43 = vpop.f32.mrf.mxu1  ;;  %v3959_v32 = vadd.f32 %v10258_v37, %v10257_v3 }
 0x2ac   : > { %5625 = vst [vmem:[%s9754_s20 + $0xc0] sm:$0xff] %v5593_v63  ;;  %v5596_v6 = vadd.f32 %v6816_v58, %v5098_v0  ;;  %v5096_v48 = vadd.f32 %v5043_v43, %v4342_v4  ;;  %v5655_v57 = vadd.f32 %v5654_v10, %v5592_v56  ;;  %v5695_v55 = vmul.f32 %v5593_v63, %v5593_v63  ;;  %v6820_v24 = vpop.f32.mrf.mxu0 }
 0x2ad   : > { %v5724_v40 = vadd.f32 %v5723_v11, %v5693_v52  ;;  %v6771_v46 = vpop.f32.mrf.mxu1 }
 0x2ae   : > { %5628 = vst [vmem:[%s9754_s20 + $0xd8] sm:$0xff] %v5596_v6  ;;  %v5594_v22 = vadd.f32 %v5541_v20, %v5096_v48  ;;  %v5101_v15 = vadd.f32 %v6771_v46, %v4347_v62  ;;  %v5656_v45 = vadd.f32 %v5655_v57, %v5593_v63  ;;  %v10260_v20 = vld [vmem:[#allocation56_spill] sm:$0xff]  ;;  %v5698_v49 = vmul.f32 %v5596_v6, %v5596_v6  ;;  %v5557_v38 = vpop.f32.mrf.mxu0 }
 0x2af   : > { %v5725_v58 = vadd.f32 %v5724_v40, %v5694_v53  ;;  %v5056_v60 = vpop.f32.mrf.mxu1  ;;  %v4346_v59 = vadd.f32 %v10260_v20, %v3959_v32 }
 0x2b0   : > { %5626 = vst [vmem:[%s9754_s20 + $0xc8] sm:$0xff] %v5594_v22  ;;  %v5696_v56 = vmul.f32 %v5594_v22, %v5594_v22  ;;  %v5599_v34 = vadd.f32 %v6819_v14, %v5101_v15  ;;  %v5099_v17 = vadd.f32 %v5056_v60, %v4345_v19  ;;  %v5657_v47 = vadd.f32 %v5656_v45, %v5594_v22 }
 0x2b1   : > { %v5726_v2 = vadd.f32 %v5725_v58, %v5695_v55  ;;  %v6772_v39 = vpop.f32.mrf.mxu1 }
 0x2b2   : > { %5631 = vst [vmem:[%s9754_s20 + $0xf0] sm:$0xff] %v5599_v34  ;;  %v5597_v5 = vadd.f32 %v5554_v51, %v5099_v17  ;;  %v5102_v27 = vadd.f32 %v6772_v39, %v4348_v50  ;;  %v5658_v36 = vadd.f32 %v5657_v47, %v5595_v31 }
 0x2b3   : > { %v5727_v30 = vadd.f32 %v5726_v2, %v5696_v56  ;;  %v5059_v29 = vpop.f32.mrf.mxu1 }
 0x2b4   : > { %5629 = vst [vmem:[%s9754_s20 + $0xe0] sm:$0xff] %v5597_v5  ;;  %v5600_v33 = vadd.f32 %v6820_v24, %v5102_v27  ;;  %v5100_v54 = vadd.f32 %v5059_v29, %v4346_v59  ;;  %v5659_v23 = vadd.f32 %v5658_v36, %v5596_v6  ;;  %v5699_v28 = vmul.f32 %v5597_v5, %v5597_v5 }
 0x2b5   : > { %v5728_v41 = vadd.f32 %v5727_v30, %v5697_v61 }
 0x2b6   : > { %5632 = vst [vmem:[%s9754_s20 + $0xf8] sm:$0xff] %v5600_v33  ;;  %v5598_v44 = vadd.f32 %v5557_v38, %v5100_v54  ;;  %v5660_v31 = vadd.f32 %v5659_v23, %v5597_v5 }
 0x2b7   : > { %v5729_v35 = vadd.f32 %v5728_v41, %v5698_v49 }
 0x2b8   : > { %5630 = vst [vmem:[%s9754_s20 + $0xe8] sm:$0xff] %v5598_v44  ;;  %v5700_v9 = vmul.f32 %v5598_v44, %v5598_v44  ;;  %v5661_v14 = vadd.f32 %v5660_v31, %v5598_v44 }
 0x2b9   : > { %v5730_v18 = vadd.f32 %v5729_v35, %v5699_v28 }
 0x2ba   : > { %7118 = shalt.err (!%p7115_p0)
}
 0x2bb   : > { %s7119_s11 = scalar_lea.hbm %s9871_s23, 4096  ;;  %s7123_s30 = scalar_lea.hbm %s9938_s2, 8192 }
 0x2bc   : > { %p7120_p5 = scmp.ne.s32.totalorder %s9871_s23, %s7119_s11  ;;  %p7124_p4 = scmp.lt.s32.totalorder %s9871_s23, %s9938_s2 }
 0x2bd   : > { %p7125_p6 = scmp.lt.s32.totalorder %s7123_s30, %s7119_s11 }
 0x2be   : > { %p7121_p2 = pnand %p7120_p5, %p10261_p11 }
 0x2bf   : > { %p7126_p8 = por %p7125_p6, %p7124_p4 }
 0x2c0   : > { %p7122_p1 = pneg %p7121_p2 }
 0x2c2   : > { %p7127_p3 = pnand %p7126_p8, %p7122_p1 }
 0x2c4   : > { %7130 = shalt.err (!%p7127_p3)
}
 0x2c5   : > { %s7211_s20 = smov 128   ;;  %s7212_s28 = smov 8   ;;  %v5701_v26 = vmul.f32 %v5599_v34, %v5599_v34  ;;  %v5662_v4 = vadd.f32 %v5661_v14, %v5599_v34  ;;  %v5731_v8 = vadd.f32 %v5730_v18, %v5700_v9  ;;  %v5702_v16 = vmul.f32 %v5600_v33, %v5600_v33 }
 0x2c6   : > { %6843 = dma.vmem_to_hbm [thread:$0]  (%p10261_p11), %s9873_s29, 4096, %s9871_s23, %s5742_s25, %s7211_s20, %s7211_s20, %s7212_s28  }
 0x2c7   : > { %v5663_v42 = vadd.f32 %v5662_v4, %v5600_v33  ;;  %v5732_v63 = vadd.f32 %v5731_v8, %v5701_v26  ;;  %s5899_s17 = sshll.u32 %s7356_s26, 1  ;;  %s6168_s29 = sshll.u32 %s7255_s16, 5 }
 0x2c8   : > { %s214_s22 = scalar_lea.vmem [#allocation9], %s5899_s17  ;;  %s5774_s9 = scalar_lea.hbm %s9939_s3, %s6168_s29 }
 0x2c9   : > { %v5664_v0 = vrot.slane %v5663_v42, 4  ;;  %v5733_v52 = vadd.f32 %v5732_v63, %v5702_v16  ;;  %s5776_s23 = sshll.u32 %s214_s22, 4  ;;  %s5747_s7 = scalar_lea.sflag [#allocation10], %s7356_s26  ;;  %s5777_s23 = int_to_ptr.vmem [resolvable:$true] %s5776_s23 }
 0x2ca   : > { %s7131_s10 = scalar_lea.vmem %s5777_s23, 32  ;;  %s7213_s11 = smov [#allocation9]  }
 0x2cb   : > { %v5665_v10 = vadd.f32 %v5664_v0, %v5663_v42  ;;  %v5734_v11 = vrot.slane %v5733_v52, 4  ;;  %p7132_p7 = scmp.ne.s32.totalorder %s5777_s23, %s7131_s10  ;;  %s7135_s16 = sshll.u32 %s7213_s11, 4  ;;  %s7136_s16 = int_to_ptr.vmem [resolvable:$false] %s7135_s16 }
 0x2cc   : > { %s7137_s21 = scalar_lea.vmem %s7136_s16, 64  ;;  %p7138_p12 = scmp.lt.s32.totalorder %s5777_s23, %s7136_s16 }
 0x2cd   : > { %v5666_v43 = vrot.slane %v5665_v10, 2  ;;  %v5735_v12 = vadd.f32 %v5734_v11, %v5733_v52  ;;  %p7133_p9 = pnand %p7132_p7, %p10261_p11  ;;  %p7139_p13 = scmp.lt.s32.totalorder %s7137_s21, %s7131_s10 }
 0x2cf   : > { %v5667_v62 = vadd.f32 %v5666_v43, %v5665_v10  ;;  %v5736_v1 = vrot.slane %v5735_v12, 2  ;;  %p7134_p10 = pneg %p7133_p9  ;;  %p7140_p0 = por %p7139_p13, %p7138_p12 }
 0x2d1   : > { %v5668_v13 = vrot.slane %v5667_v62, 1  ;;  %v5737_v7 = vadd.f32 %v5736_v1, %v5735_v12  ;;  %p7141_p5 = pnand %p7140_p0, %p7134_p10 }
 0x2d3   : > { %v5669_v6 = vadd.f32 %v5668_v13, %v5667_v62  ;;  %v5738_v48 = vrot.slane %v5737_v7, 1 }
 0x2d5   : > { %5670 = vst [vmem:[%s214_s22] sm:$0x1] %v5669_v6  ;;  %v5739_v53 = vadd.f32 %v5738_v48, %v5737_v7 }
 0x2d7   : > { %5740 = vst [vmem:[%s214_s22 + $0x1] sm:$0x1] %v5739_v53 }
 0x2d8   : > { %7144 = shalt.err (!%p7141_p5)
}
 0x2d9   : > { %s7145_s27 = scalar_lea.hbm %s5774_s9, 32  ;;  %s7149_s4 = scalar_lea.hbm %s9939_s3, 64 }
 0x2da   : > { %p7146_p2 = scmp.ne.s32.totalorder %s5774_s9, %s7145_s27  ;;  %p7150_p6 = scmp.lt.s32.totalorder %s5774_s9, %s9939_s3 }
 0x2db   : > { %p7151_p8 = scmp.lt.s32.totalorder %s7149_s4, %s7145_s27 }
 0x2dc   : > { %p7147_p1 = pnand %p7146_p2, %p10261_p11 }
 0x2dd   : > { %p7152_p3 = por %p7151_p8, %p7150_p6 }
 0x2de   : > { %p7148_p4 = pneg %p7147_p1 }
 0x2e0   : > { %p7153_p7 = pnand %p7152_p3, %p7148_p4 }
 0x2e2   : > { %7156 = shalt.err (!%p7153_p7)
}
 0x2e3   : > { %6844 = dma.vmem_to_hbm [thread:$0]  (%p10261_p11), %s5777_s23, 32, %s5774_s9, %s5747_s7  }
 0x2e4 PF: > { %s5788_s28 = sand.u32 1, %s7191_s12   ;;  %p10262_p9 = scmp.ne.s32.totalorder %s9978_s19, 0 }
 0x2e5   : > { %p10263_p10 = scmp.ge.s32.totalorder %s7203_s15, 2  ;;  %s5789_s17 = scalar_lea.sflag [#allocation5], %s5788_s28 }
 0x2e7   : > { %p6856_p12 = pnand %p10263_p10, %p10262_p9 }
 0x2e9   : > { %p6857_p13 = pneg %p6856_p12 }
 0x2eb   : > { %7182 = dma.done.wait (%p6857_p13), %s5789_s17, 4096  }
 0x2ec   : > { %7184 = vsyncadd (%p6857_p13), %s5789_s17, 4294963200  ;;  %s5798_s29 = scalar_lea.sflag [#allocation10], %s5788_s28 }
 0x2ed   : > { %7186 = dma.done.wait (%p6857_p13), %s5798_s29, 32  }
 0x2ee   : > { %7188 = vsyncadd (%p6857_p13), %s5798_s29, 4294967264  ;;  %p21_p11 = scmp.ge.s32.totalorder %s7288_s24, 4   ;;  %s10264_s12 = smov %s7195_s13 }
 0x2ef   : > { %s10265_s13 = smov %s7199_s14  ;;  %s10266_s14 = smov %s7308_s5 }
 0x2f0   : > { %s10267_s15 = smov %s7288_s24  ;;  %23 = sbr.rel (!%p21_p11) target bundleno = 8 (0x8), region = 105 }
 0x2f5   :  { %5803 = vsyncpa [#allocation4], 1 }
 0x2f6   :  { %5805 = vsyncpa [#allocation4 + $0x1], 1 }
 0x2f7   :  { %5806 = vsyncpa [#allocation7], 1 }
 0x2f8   :  { %5807 = vsyncpa [#allocation5], 1 }
 0x2f9   :  { %5809 = vsyncpa [#allocation5 + $0x1], 1 }
 0x2fa   :  { %5810 = vsyncpa [#allocation10], 1 }
 0x2fb   :  { %5812 = vsyncpa [#allocation10 + $0x1], 1 }

</bundles_post_ra>
